<compile_context>
chip_gen: v7x
topology: tpu7x:2x2x1
jax: 0.10.0
libtpu: 0.0.40
codegen_flags: <defaults>
</compile_context>

<pallas_src>
import jax
import jax.numpy as jnp
from jax.experimental import pallas as pl
from jax.experimental.pallas import tpu as pltpu

IN_FEATURES = 3 * 40 * 40      # 4800
IN_PAD = 4864                  # 38 * 128 -> lane-dense K
HIDDEN = 512
NUM_CLASSES = 10
OUT_PAD = 128                  # lane-dense output; padded classes masked via -1e30 bias
_NEG = -1e30                   # effectively -inf for padded class logits (f32-safe)

DEFAULT_BATCH_TILE = 512       # fits comfortably in 64 MiB VMEM (v7x); fine on v5e/v6e too


def _round_up(x, m):
    return (x + m - 1) // m * m


def _mlp_kernel(x_ref, w1_ref, b1_ref, w2_ref, b2_ref, out_ref):
    # x_ref  : (TB, IN_PAD)      bf16   (pipelined over the batch grid)
    # w1_ref : (IN_PAD, HIDDEN)  bf16   (constant block index -> resident in VMEM)
    # b1_ref : (1, HIDDEN)       f32
    # w2_ref : (HIDDEN, OUT_PAD) bf16   (resident)
    # b2_ref : (1, OUT_PAD)      f32    (cols >= NUM_CLASSES carry -1e30 -> masked)
    # out_ref: (TB, OUT_PAD)     f32    log-probs; cols >= NUM_CLASSES sliced off by wrapper
    h = jnp.dot(x_ref[...], w1_ref[...],
                preferred_element_type=jnp.float32) + b1_ref[...]          # (TB, 512) f32
    h = jnp.maximum(h, 0.0)                                                # ReLU
    logits = jnp.dot(h.astype(jnp.bfloat16), w2_ref[...],
                     preferred_element_type=jnp.float32) + b2_ref[...]     # (TB, 128) f32
    # Numerically-stable log_softmax over the lane axis. Padded columns hold
    # ~-1e30 so they never win the max and their exp() is exactly 0.
    m = jnp.max(logits, axis=-1, keepdims=True)
    shifted = logits - m
    lse = jnp.log(jnp.sum(jnp.exp(shifted), axis=-1, keepdims=True))
    out_ref[...] = shifted - lse


def best_model_forward(x_nchw, w1, b1, w2, b2, *, batch_tile=DEFAULT_BATCH_TILE):
    """x_nchw: (B, 3, 40, 40). w1: (4800, 512), b1: (1, 512), w2: (512, 10),
    b2: (1, 10), all float32 in (in_features, out_features) layout.
    Returns (B, 10) log-probabilities (float32)."""
    B = x_nchw.shape[0]
    x_flat = x_nchw.reshape(B, -1).astype(jnp.float32)   # row-major == torch .view(B, -1)

    tb = min(batch_tile, _round_up(B, 8))                # sublane-aligned batch tile
    padded_b = _round_up(B, tb)
    grid = (padded_b // tb,)

    # Zero-pad K to a multiple of 128 and the batch to a multiple of the tile;
    # cast matmul operands to bf16 (accumulation stays f32 on the MXU).
    x_pad = jnp.pad(
        x_flat, ((0, padded_b - B), (0, IN_PAD - IN_FEATURES))
    ).astype(jnp.bfloat16)
    w1_pad = jnp.pad(
        w1.astype(jnp.float32), ((0, IN_PAD - IN_FEATURES), (0, 0))
    ).astype(jnp.bfloat16)
    b1_f32 = b1.reshape(1, HIDDEN).astype(jnp.float32)
    w2_pad = jnp.pad(
        w2.astype(jnp.float32), ((0, 0), (0, OUT_PAD - NUM_CLASSES))
    ).astype(jnp.bfloat16)
    b2_pad = jnp.pad(
        b2.reshape(1, NUM_CLASSES).astype(jnp.float32),
        ((0, 0), (0, OUT_PAD - NUM_CLASSES)), constant_values=_NEG)

    cost = pl.CostEstimate(
        flops=2 * padded_b * IN_PAD * HIDDEN + 2 * padded_b * HIDDEN * OUT_PAD,
        transcendentals=padded_b * OUT_PAD,
        bytes_accessed=(x_pad.size * 2 + w1_pad.size * 2 + w2_pad.size * 2
                        + b1_f32.size * 4 + b2_pad.size * 4
                        + padded_b * OUT_PAD * 4),
    )

    out_padded = pl.pallas_call(
        _mlp_kernel,
        out_shape=jax.ShapeDtypeStruct((padded_b, OUT_PAD), jnp.float32),
        grid=grid,
        in_specs=[
            pl.BlockSpec((tb, IN_PAD), lambda i: (i, 0)),       # x: tiled over batch
            pl.BlockSpec((IN_PAD, HIDDEN), lambda i: (0, 0)),   # W1: resident
            pl.BlockSpec((1, HIDDEN), lambda i: (0, 0)),        # b1: resident
            pl.BlockSpec((HIDDEN, OUT_PAD), lambda i: (0, 0)),  # W2: resident
            pl.BlockSpec((1, OUT_PAD), lambda i: (0, 0)),       # b2: resident
        ],
        out_specs=pl.BlockSpec((tb, OUT_PAD), lambda i: (i, 0)),
        compiler_params=pltpu.CompilerParams(
            dimension_semantics=("parallel",),   # shards across v7x's 2 TCs; no-op on v5e/v6e
            vmem_limit_bytes=48 << 20,           # headroom under v7x's 64 MiB physical VMEM
        ),
        cost_estimate=cost,
    )(x_pad, w1_pad, b1_f32, w2_pad, b2_pad)

    return out_padded[:B, :NUM_CLASSES]


def init_params(key):
    """Deterministic init mimicking PyTorch's default Linear init
    (uniform in [-1/sqrt(fan_in), 1/sqrt(fan_in)]), stored as (in, out)."""
    k1, k2, k3, k4 = jax.random.split(key, 4)
    bound1 = 1.0 / (IN_FEATURES ** 0.5)
    bound2 = 1.0 / (HIDDEN ** 0.5)
    w1 = jax.random.uniform(k1, (IN_FEATURES, HIDDEN), jnp.float32, -bound1, bound1)
    b1 = jax.random.uniform(k2, (1, HIDDEN), jnp.float32, -bound1, bound1)
    w2 = jax.random.uniform(k3, (HIDDEN, NUM_CLASSES), jnp.float32, -bound2, bound2)
    b2 = jax.random.uniform(k4, (1, NUM_CLASSES), jnp.float32, -bound2, bound2)
    return w1, b1, w2, b2


if __name__ == "__main__":
    key = jax.random.PRNGKey(0)
    k_x, k_p = jax.random.split(key)

    B = 4
    x = jax.random.normal(k_x, (B, 3, 40, 40), dtype=jnp.float32)
    w1, b1, w2, b2 = init_params(k_p)

    out = best_model_forward(x, w1, b1, w2, b2)
    out = jax.block_until_ready(out)

    # Reference with matching numerics (bf16 matmul inputs, f32 accumulate).
    x_flat = x.reshape(B, -1)
    h_ref = jnp.maximum(
        jnp.dot(x_flat.astype(jnp.bfloat16), w1.astype(jnp.bfloat16),
                preferred_element_type=jnp.float32) + b1, 0.0)
    logits_ref = jnp.dot(h_ref.astype(jnp.bfloat16), w2.astype(jnp.bfloat16),
                         preferred_element_type=jnp.float32) + b2
    ref = jax.nn.log_softmax(logits_ref, axis=1)

    assert out.shape == (B, NUM_CLASSES)
    assert jnp.allclose(out, ref, atol=5e-3, rtol=5e-3), float(jnp.max(jnp.abs(out - ref)))
    # log_softmax rows should exponentiate-sum to 1 (proves padded classes are masked out)
    assert jnp.allclose(jnp.sum(jnp.exp(out), axis=1), 1.0, atol=1e-3)

    print("KERNEL_OK")
</pallas_src>

<mosaic_0001>
module attributes {stable_mosaic.version = 11 : i64} {
  func.func @_mlp_kernel(%arg0: i32, %arg1: memref<8x4864xbf16, #tpu.memory_space<vmem>>, %arg2: memref<4864x512xbf16, #tpu.memory_space<vmem>>, %arg3: memref<1x512xf32, #tpu.memory_space<vmem>>, %arg4: memref<512x128xbf16, #tpu.memory_space<vmem>>, %arg5: memref<1x128xf32, #tpu.memory_space<vmem>>, %arg6: memref<8x128xf32, #tpu.memory_space<vmem>>) attributes {dimension_semantics = [#tpu.dimension_semantics<parallel>], iteration_bounds = array<i64: 1>, scalar_prefetch = 0 : i64, scratch_operands = 0 : i64, tpu.core_type = #tpu.core_type<tc>, window_params = [{transform_indices = @transform_0, window_bounds = array<i64: 8, 4864>}, {pipeline_mode = #tpu.pipeline_mode<synchronous>, transform_indices = @transform_1, window_bounds = array<i64: 4864, 512>}, {pipeline_mode = #tpu.pipeline_mode<synchronous>, transform_indices = @transform_2, window_bounds = array<i64: 1, 512>}, {pipeline_mode = #tpu.pipeline_mode<synchronous>, transform_indices = @transform_3, window_bounds = array<i64: 512, 128>}, {pipeline_mode = #tpu.pipeline_mode<synchronous>, transform_indices = @transform_4, window_bounds = array<i64: 1, 128>}, {transform_indices = @transform_5, window_bounds = array<i64: 8, 128>}]} {
    %c0 = arith.constant 0 : index
    %c0_0 = arith.constant 0 : index
    %0 = vector.load %arg1[%c0, %c0_0] : memref<8x4864xbf16, #tpu.memory_space<vmem>>, vector<8x4864xbf16>
    %c0_1 = arith.constant 0 : index
    %c0_2 = arith.constant 0 : index
    %1 = vector.load %arg2[%c0_1, %c0_2] : memref<4864x512xbf16, #tpu.memory_space<vmem>>, vector<4864x512xbf16>
    %cst = arith.constant dense<0.000000e+00> : vector<8x512xf32>
    %2 = tpu.matmul %0, %1, %cst {dimension_numbers = #tpu.dot_dimension_numbers<[1], [0], [0], [1], [0, 0, 1, 1], [], []>} : vector<8x4864xbf16>, vector<4864x512xbf16>, vector<8x512xf32> -> vector<8x512xf32>
    %c0_3 = arith.constant 0 : index
    %c0_4 = arith.constant 0 : index
    %3 = vector.load %arg3[%c0_3, %c0_4] : memref<1x512xf32, #tpu.memory_space<vmem>>, vector<1x512xf32>
    %4 = vector.broadcast %3 : vector<1x512xf32> to vector<8x512xf32>
    %5 = arith.addf %2, %4 : vector<8x512xf32>
    %cst_5 = arith.constant 0.000000e+00 : f32
    %6 = vector.broadcast %cst_5 : f32 to vector<8x512xf32>
    %7 = arith.maximumf %5, %6 : vector<8x512xf32>
    %8 = arith.truncf %7 : vector<8x512xf32> to vector<8x512xbf16>
    %c0_6 = arith.constant 0 : index
    %c0_7 = arith.constant 0 : index
    %9 = vector.load %arg4[%c0_6, %c0_7] : memref<512x128xbf16, #tpu.memory_space<vmem>>, vector<512x128xbf16>
    %cst_8 = arith.constant dense<0.000000e+00> : vector<8x128xf32>
    %10 = tpu.matmul %8, %9, %cst_8 {dimension_numbers = #tpu.dot_dimension_numbers<[1], [0], [0], [1], [0, 0, 1, 1], [], []>} : vector<8x512xbf16>, vector<512x128xbf16>, vector<8x128xf32> -> vector<8x128xf32>
    %c0_9 = arith.constant 0 : index
    %c0_10 = arith.constant 0 : index
    %11 = vector.load %arg5[%c0_9, %c0_10] : memref<1x128xf32, #tpu.memory_space<vmem>>, vector<1x128xf32>
    %12 = vector.broadcast %11 : vector<1x128xf32> to vector<8x128xf32>
    %13 = arith.addf %10, %12 : vector<8x128xf32>
    %cst_11 = arith.constant dense<0xFF800000> : vector<8xf32>
    %14 = vector.multi_reduction <maximumf>, %13, %cst_11 [1] : vector<8x128xf32> to vector<8xf32>
    %15 = vector.shape_cast %14 : vector<8xf32> to vector<8x1xf32>
    %16 = vector.broadcast %15 : vector<8x1xf32> to vector<8x128xf32>
    %17 = arith.subf %13, %16 : vector<8x128xf32>
    %18 = math.exp %17 : vector<8x128xf32>
    %cst_12 = arith.constant dense<0.000000e+00> : vector<8xf32>
    %19 = vector.multi_reduction <add>, %18, %cst_12 [1] : vector<8x128xf32> to vector<8xf32>
    %20 = vector.shape_cast %19 : vector<8xf32> to vector<8x1xf32>
    %21 = math.log %20 : vector<8x1xf32>
    %22 = vector.broadcast %21 : vector<8x1xf32> to vector<8x128xf32>
    %23 = arith.subf %17, %22 : vector<8x128xf32>
    %c0_13 = arith.constant 0 : index
    %c0_14 = arith.constant 0 : index
    %24 = vector.load %arg6[%c0_13, %c0_14] : memref<8x128xf32, #tpu.memory_space<vmem>>, vector<8x128xf32>
    tpu.vector_store %arg6[%c0_13, %c0_14], %23 {strides = array<i32>} : memref<8x128xf32, #tpu.memory_space<vmem>>, vector<8x128xf32>,
    return
  }
  func.func @transform_0(%arg0: i32) -> (i32, i32) {
    %c0_i32 = arith.constant 0 : i32
    %c0_i32_0 = arith.constant 0 : i32
    return %arg0, %c0_i32 : i32, i32
  }
  func.func @transform_1(%arg0: i32) -> (i32, i32) {
    %c0_i32 = arith.constant 0 : i32
    %c0_i32_0 = arith.constant 0 : i32
    %c0_i32_1 = arith.constant 0 : i32
    return %c0_i32, %c0_i32_0 : i32, i32
  }
  func.func @transform_2(%arg0: i32) -> (i32, i32) {
    %c0_i32 = arith.constant 0 : i32
    %c0_i32_0 = arith.constant 0 : i32
    %c0_i32_1 = arith.constant 0 : i32
    return %c0_i32, %c0_i32_0 : i32, i32
  }
  func.func @transform_3(%arg0: i32) -> (i32, i32) {
    %c0_i32 = arith.constant 0 : i32
    %c0_i32_0 = arith.constant 0 : i32
    %c0_i32_1 = arith.constant 0 : i32
    return %c0_i32, %c0_i32_0 : i32, i32
  }
  func.func @transform_4(%arg0: i32) -> (i32, i32) {
    %c0_i32 = arith.constant 0 : i32
    %c0_i32_0 = arith.constant 0 : i32
    %c0_i32_1 = arith.constant 0 : i32
    return %c0_i32, %c0_i32_0 : i32, i32
  }
  func.func @transform_5(%arg0: i32) -> (i32, i32) {
    %c0_i32 = arith.constant 0 : i32
    %c0_i32_0 = arith.constant 0 : i32
    return %arg0, %c0_i32 : i32, i32
  }
}

</mosaic_0001>

<bundles_post_ra>
// kernel: tpu_custom_call.1
= control target key start
LH: loop header
LB: loop body
LE: loop exit
PB: predicated region body
PF: predicated region fallthrough
CT: control target
= control target key end

     0   :  { %10 = vsyncpa [#allocation3], 0  ;;  %s13238_s0 = inlined_call_operand.hbm [shape: bf16[8,4864], index: 0, kind: input, shape index: {}]   ;;  %s13239_s1 = inlined_call_operand.hbm [shape: bf16[4864,512], index: 1, kind: input, shape index: {}]   ;;  %s13240_s2 = inlined_call_operand.hbm [shape: f32[1,512], index: 2, kind: input, shape index: {}]   ;;  %s13241_s3 = inlined_call_operand.hbm [shape: bf16[512,128], index: 3, kind: input, shape index: {}]   ;;  %s13242_s4 = inlined_call_operand.hbm [shape: f32[1,128], index: 4, kind: input, shape index: {}]   ;;  %s13243_s5 = inlined_call_operand.hbm [shape: f32[8,128], index: 5, kind: output, shape index: {}]  }
   0x1   :  { %11 = vsyncpa [#allocation6], 0 }
   0x2   :  { %12 = vsyncpa [#allocation9], 0 }
   0x3   :  { %13 = vsyncpa [#allocation4], 0  ;;  %s13018_s18 = smov [#allocation5]   ;;  %s12878_s22 = scalar_lea.hbm %s13239_s1, 155648 }
   0x4   :  { %s29_s19 = sshll.u32 %s13018_s18, 4  ;;  %p12879_p0 = scmp.ne.s32.totalorder %s13239_s1, %s12878_s22  ;;  %s30_s19 = int_to_ptr.vmem [resolvable:$true] %s29_s19 }
   0x5   :  { %p12882_p1 = scmp.lt.u32.totalorder %s12878_s22, %s13239_s1 }
   0x7   :  { %p12884_p2 = pnand %p12882_p1, %p12879_p0 }
   0x9   :  { %12887 = shalt.err (!%p12884_p2)
}
   0xa   :  { %s12888_s27 = scalar_lea.vmem %s30_s19, 155648  ;;  %p12893_p4 = scmp.lt.s32.totalorder %s30_s19, %s30_s19 }
   0xb   :  { %p12889_p3 = scmp.ne.s32.totalorder %s30_s19, %s12888_s27  ;;  %p12894_p5 = scmp.lt.s32.totalorder %s12888_s27, %s12888_s27 }
   0xd   :  { %p12895_p6 = por %p12894_p5, %p12893_p4 }
   0xf   :  { %p12896_p7 = pnand %p12895_p6, %p12889_p3 }
  0x11   :  { %12899 = shalt.err (!%p12896_p7)
}
  0x12   :  { %s13019_s28 = smov 256   ;;  %s13020_s29 = smov 16  }
  0x13   :  { %35 = dma.hbm_to_vmem [thread:$0]  %s13239_s1, 155648, %s30_s19, [#allocation6], %s13019_s28, %s13019_s28, %s13020_s29  }
  0x14   :  { %s13021_s7 = smov [#allocation8]   ;;  %s12900_s11 = scalar_lea.hbm %s13241_s3, 4096 }
  0x15   :  { %s51_s8 = sshll.u32 %s13021_s7, 4  ;;  %p12901_p8 = scmp.ne.s32.totalorder %s13241_s3, %s12900_s11  ;;  %s52_s8 = int_to_ptr.vmem [resolvable:$true] %s51_s8 }
  0x16   :  { %p12904_p9 = scmp.lt.u32.totalorder %s12900_s11, %s13241_s3 }
  0x18   :  { %p12906_p10 = pnand %p12904_p9, %p12901_p8 }
  0x1a   :  { %12909 = shalt.err (!%p12906_p10)
}
  0x1b   :  { %s12910_s16 = scalar_lea.vmem %s52_s8, 4096  ;;  %p12915_p12 = scmp.lt.s32.totalorder %s52_s8, %s52_s8 }
  0x1c   :  { %p12911_p11 = scmp.ne.s32.totalorder %s52_s8, %s12910_s16  ;;  %p12916_p13 = scmp.lt.s32.totalorder %s12910_s16, %s12910_s16 }
  0x1e   :  { %p12917_p0 = por %p12916_p13, %p12915_p12 }
  0x20   :  { %p12918_p1 = pnand %p12917_p0, %p12911_p11 }
  0x22   :  { %12921 = shalt.err (!%p12918_p1)
}
  0x23   :  { %s13022_s1 = smov 64   ;;  %s13023_s17 = smov 4  }
  0x24   :  { %57 = dma.hbm_to_vmem [thread:$0]  %s13241_s3, 4096, %s52_s8, [#allocation9], %s13022_s1, %s13022_s1, %s13023_s17  }
  0x25   :  { %s13024_s20 = smov [#allocation2]   ;;  %s13025_s22 = smov [#allocation7]  }
  0x26   :  { %s20_s21 = sshll.u32 %s13024_s20, 4  ;;  %s42_s23 = sshll.u32 %s13025_s22, 4  ;;  %s21_s21 = int_to_ptr.vmem [resolvable:$true] %s20_s21  ;;  %s43_s23 = int_to_ptr.vmem [resolvable:$true] %s42_s23 }
  0x27   :  { %s12922_s26 = scalar_lea.hbm %s13238_s0, 2432 }
  0x28   :  { %p12923_p2 = scmp.ne.s32.totalorder %s13238_s0, %s12922_s26  ;;  %p12926_p3 = scmp.lt.u32.totalorder %s12922_s26, %s13238_s0 }
  0x2a   :  { %p12928_p4 = pnand %p12926_p3, %p12923_p2 }
  0x2c   :  { %12931 = shalt.err (!%p12928_p4)
}
  0x2d   :  { %s12932_s3 = scalar_lea.vmem %s21_s21, 2432  ;;  %p12937_p6 = scmp.lt.s32.totalorder %s21_s21, %s21_s21 }
  0x2e   :  { %p12933_p5 = scmp.ne.s32.totalorder %s21_s21, %s12932_s3  ;;  %p12938_p7 = scmp.lt.s32.totalorder %s12932_s3, %s12932_s3 }
  0x30   :  { %p12939_p8 = por %p12938_p7, %p12937_p6 }
  0x32   :  { %p12940_p9 = pnand %p12939_p8, %p12933_p5 }
  0x34   :  { %12943 = shalt.err (!%p12940_p9)
}
  0x35   :  { %23 = dma.hbm_to_vmem [thread:$0]  %s13238_s0, 2432, %s21_s21, [#allocation3]  }
  0x36   :  { %s12944_s10 = scalar_lea.hbm %s13240_s2, 64 }
  0x37   :  { %p12945_p10 = scmp.ne.s32.totalorder %s13240_s2, %s12944_s10  ;;  %p12948_p11 = scmp.lt.u32.totalorder %s12944_s10, %s13240_s2 }
  0x39   :  { %p12950_p12 = pnand %p12948_p11, %p12945_p10 }
  0x3b   :  { %12953 = shalt.err (!%p12950_p12)
}
  0x3c   :  { %s12954_s15 = scalar_lea.vmem %s43_s23, 64  ;;  %p12959_p0 = scmp.lt.s32.totalorder %s43_s23, %s43_s23 }
  0x3d   :  { %p12955_p13 = scmp.ne.s32.totalorder %s43_s23, %s12954_s15  ;;  %p12960_p1 = scmp.lt.s32.totalorder %s12954_s15, %s12954_s15 }
  0x3f   :  { %p12961_p2 = por %p12960_p1, %p12959_p0 }
  0x41   :  { %p12962_p3 = pnand %p12961_p2, %p12955_p13 }
  0x43   :  { %12965 = shalt.err (!%p12962_p3)
}
  0x44   :  { %45 = dma.hbm_to_vmem [thread:$0]  %s13240_s2, 64, %s43_s23, [#allocation6]  }
  0x45   :  { %s13026_s1 = smov [#allocation10]   ;;  %s12966_s20 = scalar_lea.hbm %s13242_s4, 16 }
  0x46   :  { %s64_s17 = sshll.u32 %s13026_s1, 4  ;;  %p12967_p4 = scmp.ne.s32.totalorder %s13242_s4, %s12966_s20  ;;  %s65_s17 = int_to_ptr.vmem [resolvable:$true] %s64_s17 }
  0x47   :  { %p12970_p5 = scmp.lt.u32.totalorder %s12966_s20, %s13242_s4 }
  0x49   :  { %p12972_p6 = pnand %p12970_p5, %p12967_p4 }
  0x4b   :  { %12975 = shalt.err (!%p12972_p6)
}
  0x4c   :  { %s12976_s26 = scalar_lea.vmem %s65_s17, 16  ;;  %s12980_s2 = scalar_lea.vmem %s65_s17, 32 }
  0x4d   :  { %p12977_p7 = scmp.ne.s32.totalorder %s65_s17, %s12976_s26  ;;  %p12981_p8 = scmp.lt.s32.totalorder %s65_s17, %s65_s17 }
  0x4e   :  { %p12982_p9 = scmp.lt.s32.totalorder %s12980_s2, %s12976_s26 }
  0x50   :  { %p12983_p10 = por %p12982_p9, %p12981_p8 }
  0x52   :  { %p12984_p11 = pnand %p12983_p10, %p12977_p7 }
  0x54   :  { %12987 = shalt.err (!%p12984_p11)
}
  0x55   :  { %67 = dma.hbm_to_vmem [thread:$0]  %s13242_s4, 16, %s65_s17, [#allocation9]  }
  0x56   :  { %13010 = dma.done.wait [#allocation3], 2432  }
  0x57   :  { %13011 = vsyncadd [#allocation3], 4294964864 }
  0x58   :  { %13012 = dma.done.wait [#allocation6], 155712  }
  0x59   :  { %13013 = vsyncadd [#allocation6], 4294811584 }
  0x5a   :  { %13014 = dma.done.wait [#allocation9], 4112  }
  0x5b   :  { %13015 = vsyncadd [#allocation9], 4294963184  ;;  %v10980_v0 = vld [vmem:[#allocation5 + $0x4] ss:$16 sps:$4 sm:$0xff]   ;;  %v10982_v1 = vld [vmem:[#allocation5 + $0xc] ss:$16 sps:$4 sm:$0xff]  }
  0x5c   :  { %7554 = vmatprep.subr.bf16.mxu0 %v10980_v0  ;;  %v10984_v2 = vld [vmem:[#allocation5] ss:$16 sps:$4 sm:$0xff]   ;;  %v10985_v3 = vld [vmem:[#allocation5 + $0x8] ss:$16 sps:$4 sm:$0xff]   ;;  %8333 = vmatprep.subr.bf16.mxu1 %v10982_v1  ;;  %v10986_v4 = vld [vmem:[#allocation5 + $0x24] ss:$16 sps:$4 sm:$0xff]  }
  0x5d   :  { %7555 = vmatpush1.bf16.msra.mxu0 %v10984_v2  ;;  %8334 = vmatpush1.bf16.msra.mxu1 %v10985_v3  ;;  %v10988_v5 = vld [vmem:[#allocation5 + $0x2c] ss:$16 sps:$4 sm:$0xff]   ;;  %v10990_v6 = vld [vmem:[#allocation5 + $0x20] ss:$16 sps:$4 sm:$0xff]   ;;  %v10991_v7 = vld [vmem:[#allocation5 + $0x28] ss:$16 sps:$4 sm:$0xff]  }
  0x5e   :  { %7556 = vmatprep.subr.bf16.mxu0 %v10986_v4  ;;  %8335 = vmatprep.subr.bf16.mxu1 %v10988_v5  ;;  %v10992_v8 = vld [vmem:[#allocation5 + $0x44] ss:$16 sps:$4 sm:$0xff]   ;;  %v10994_v9 = vld [vmem:[#allocation5 + $0x4c] ss:$16 sps:$4 sm:$0xff]   ;;  %v10996_v10 = vld [vmem:[#allocation5 + $0x40] ss:$16 sps:$4 sm:$0xff]  }
  0x5f   :  { %v10997_v11 = vld [vmem:[#allocation5 + $0x48] ss:$16 sps:$4 sm:$0xff]   ;;  %v10998_v12 = vld [vmem:[#allocation5 + $0x64] ss:$16 sps:$4 sm:$0xff]   ;;  %v11000_v13 = vld [vmem:[#allocation5 + $0x6c] ss:$16 sps:$4 sm:$0xff]  }
  0x60   :  { %v11002_v14 = vld [vmem:[#allocation5 + $0x60] ss:$16 sps:$4 sm:$0xff]   ;;  %v11003_v15 = vld [vmem:[#allocation5 + $0x68] ss:$16 sps:$4 sm:$0xff]   ;;  %v11004_v16 = vld [vmem:[#allocation5 + $0x84] ss:$16 sps:$4 sm:$0xff]  }
  0x61   :  { %7557 = vmatpush1.bf16.msra.mxu0 %v10990_v6  ;;  %8336 = vmatpush1.bf16.msra.mxu1 %v10991_v7  ;;  %v11006_v17 = vld [vmem:[#allocation5 + $0x8c] ss:$16 sps:$4 sm:$0xff]   ;;  %v11008_v18 = vld [vmem:[#allocation5 + $0x80] ss:$16 sps:$4 sm:$0xff]   ;;  %v11009_v19 = vld [vmem:[#allocation5 + $0x88] ss:$16 sps:$4 sm:$0xff]  }
  0x62   :  { %7558 = vmatprep.subr.bf16.mxu0 %v10992_v8  ;;  %8337 = vmatprep.subr.bf16.mxu1 %v10994_v9  ;;  %v11010_v20 = vld [vmem:[#allocation5 + $0xa4] ss:$16 sps:$4 sm:$0xff]   ;;  %v11012_v21 = vld [vmem:[#allocation5 + $0xac] ss:$16 sps:$4 sm:$0xff]   ;;  %v11014_v22 = vld [vmem:[#allocation5 + $0xa0] ss:$16 sps:$4 sm:$0xff]  }
  0x63   :  { %v11015_v23 = vld [vmem:[#allocation5 + $0xa8] ss:$16 sps:$4 sm:$0xff]   ;;  %v11016_v24 = vld [vmem:[#allocation5 + $0xc4] ss:$16 sps:$4 sm:$0xff]   ;;  %v11018_v25 = vld [vmem:[#allocation5 + $0xcc] ss:$16 sps:$4 sm:$0xff]  }
  0x64   :  { %v11020_v26 = vld [vmem:[#allocation5 + $0xc0] ss:$16 sps:$4 sm:$0xff]   ;;  %v11021_v27 = vld [vmem:[#allocation5 + $0xc8] ss:$16 sps:$4 sm:$0xff]   ;;  %v11022_v28 = vld [vmem:[#allocation5 + $0xe4] ss:$16 sps:$4 sm:$0xff]  }
  0x65   :  { %7559 = vmatpush1.bf16.msra.mxu0 %v10996_v10  ;;  %8338 = vmatpush1.bf16.msra.mxu1 %v10997_v11  ;;  %v11024_v29 = vld [vmem:[#allocation5 + $0xec] ss:$16 sps:$4 sm:$0xff]   ;;  %v11026_v30 = vld [vmem:[#allocation5 + $0xe0] ss:$16 sps:$4 sm:$0xff]   ;;  %v11027_v31 = vld [vmem:[#allocation5 + $0xe8] ss:$16 sps:$4 sm:$0xff]  }
  0x66   :  { %7560 = vmatprep.subr.bf16.mxu0 %v10998_v12  ;;  %8339 = vmatprep.subr.bf16.mxu1 %v11000_v13  ;;  %v11028_v32 = vld [vmem:[#allocation5 + $0x104] ss:$16 sps:$4 sm:$0xff]   ;;  %v11030_v33 = vld [vmem:[#allocation5 + $0x10c] ss:$16 sps:$4 sm:$0xff]   ;;  %v11032_v34 = vld [vmem:[#allocation5 + $0x100] ss:$16 sps:$4 sm:$0xff]  }
  0x67   :  { %v11033_v35 = vld [vmem:[#allocation5 + $0x108] ss:$16 sps:$4 sm:$0xff]   ;;  %v11034_v36 = vld [vmem:[#allocation5 + $0x124] ss:$16 sps:$4 sm:$0xff]   ;;  %v11036_v37 = vld [vmem:[#allocation5 + $0x12c] ss:$16 sps:$4 sm:$0xff]  }
  0x68   :  { %v11038_v38 = vld [vmem:[#allocation5 + $0x120] ss:$16 sps:$4 sm:$0xff]   ;;  %v11039_v39 = vld [vmem:[#allocation5 + $0x128] ss:$16 sps:$4 sm:$0xff]   ;;  %v11040_v40 = vld [vmem:[#allocation5 + $0x144] ss:$16 sps:$4 sm:$0xff]  }
  0x69   :  { %7561 = vmatpush1.bf16.msra.mxu0 %v11002_v14  ;;  %8340 = vmatpush1.bf16.msra.mxu1 %v11003_v15  ;;  %v11042_v41 = vld [vmem:[#allocation5 + $0x14c] ss:$16 sps:$4 sm:$0xff]   ;;  %v11044_v42 = vld [vmem:[#allocation5 + $0x140] ss:$16 sps:$4 sm:$0xff]   ;;  %v11045_v43 = vld [vmem:[#allocation5 + $0x148] ss:$16 sps:$4 sm:$0xff]  }
  0x6a   :  { %7562 = vmatprep.subr.bf16.mxu0 %v11004_v16  ;;  %8341 = vmatprep.subr.bf16.mxu1 %v11006_v17  ;;  %v11046_v44 = vld [vmem:[#allocation5 + $0x164] ss:$16 sps:$4 sm:$0xff]   ;;  %v11048_v45 = vld [vmem:[#allocation5 + $0x16c] ss:$16 sps:$4 sm:$0xff]   ;;  %v11050_v47 = vld [vmem:[#allocation5 + $0x160] ss:$16 sps:$4 sm:$0xff]  }
  0x6b   :  { %v84_v46 = vld [vmem:[#allocation2] sm:$0xff]  ;;  %v11052_v50 = vld [vmem:[#allocation5 + $0x184] ss:$16 sps:$4 sm:$0xff]   ;;  %v11056_v52 = vld [vmem:[#allocation5 + $0x180] ss:$16 sps:$4 sm:$0xff]   ;;  %s13027_s4 = smov [#allocation11]  }
  0x6c   :  { %v9492_v48 = vcombine.high %v84_v46, %v84_v46  ;;  %v11051_v49 = vld [vmem:[#allocation5 + $0x168] ss:$16 sps:$4 sm:$0xff]   ;;  %v11054_v51 = vld [vmem:[#allocation5 + $0x18c] ss:$16 sps:$4 sm:$0xff]   ;;  %v11058_v54 = vld [vmem:[#allocation5 + $0x1a4] ss:$16 sps:$4 sm:$0xff]   ;;  %v9491_v4 = vcombine.low %v84_v46, %v84_v46 }
  0x6d   :  { %7563 = vmatpush1.bf16.msra.mxu0 %v11008_v18  ;;  %8342 = vmatpush1.bf16.msra.mxu1 %v11009_v19  ;;  %v11057_v53 = vld [vmem:[#allocation5 + $0x188] ss:$16 sps:$4 sm:$0xff]   ;;  %v11060_v55 = vld [vmem:[#allocation5 + $0x1ac] ss:$16 sps:$4 sm:$0xff]   ;;  %v11062_v56 = vld [vmem:[#allocation5 + $0x1a0] ss:$16 sps:$4 sm:$0xff]  }
  0x6e   :  { %7564 = vmatprep.subr.bf16.mxu0 %v11010_v20  ;;  %8343 = vmatprep.subr.bf16.mxu1 %v11012_v21  ;;  %v11063_v57 = vld [vmem:[#allocation5 + $0x1a8] ss:$16 sps:$4 sm:$0xff]   ;;  %v11064_v58 = vld [vmem:[#allocation5 + $0x1c4] ss:$16 sps:$4 sm:$0xff]   ;;  %v11066_v59 = vld [vmem:[#allocation5 + $0x1cc] ss:$16 sps:$4 sm:$0xff]  }
  0x6f   :  { %7586 = vmatprep.mubr.bf16.mxu0 %v9492_v48  ;;  %8365 = vmatprep.mubr.bf16.mxu1 %v9492_v48  ;;  %v11068_v60 = vld [vmem:[#allocation5 + $0x1c0] ss:$16 sps:$4 sm:$0xff]   ;;  %v11069_v61 = vld [vmem:[#allocation5 + $0x1c8] ss:$16 sps:$4 sm:$0xff]   ;;  %v11070_v62 = vld [vmem:[#allocation5 + $0x1e4] ss:$16 sps:$4 sm:$0xff]  }
  0x70   :  { %v11072_v63 = vld [vmem:[#allocation5 + $0x1ec] ss:$16 sps:$4 sm:$0xff]   ;;  %v11074_v0 = vld [vmem:[#allocation5 + $0x1e0] ss:$16 sps:$4 sm:$0xff]   ;;  %v11075_v1 = vld [vmem:[#allocation5 + $0x1e8] ss:$16 sps:$4 sm:$0xff]  }
  0x71   :  { %7565 = vmatpush1.bf16.msra.mxu0 %v11014_v22  ;;  %8344 = vmatpush1.bf16.msra.mxu1 %v11015_v23  ;;  %v11080_v2 = vld [vmem:[#allocation5 + $0x204] ss:$16 sps:$4 sm:$0xff]   ;;  %v11083_v3 = vld [vmem:[#allocation5 + $0x20c] ss:$16 sps:$4 sm:$0xff]   ;;  %v11078_v5 = vld [vmem:[#allocation5 + $0x200] ss:$16 sps:$4 sm:$0xff]  }
  0x72   :  { %7566 = vmatprep.subr.bf16.mxu0 %v11016_v24  ;;  %8345 = vmatprep.subr.bf16.mxu1 %v11018_v25  ;;  %v11081_v6 = vld [vmem:[#allocation5 + $0x208] ss:$16 sps:$4 sm:$0xff]   ;;  %v11086_v7 = vld [vmem:[#allocation5 + $0x224] ss:$16 sps:$4 sm:$0xff]   ;;  %v11089_v8 = vld [vmem:[#allocation5 + $0x22c] ss:$16 sps:$4 sm:$0xff]  }
  0x73   :  { %v11084_v9 = vld [vmem:[#allocation5 + $0x220] ss:$16 sps:$4 sm:$0xff]   ;;  %v11087_v10 = vld [vmem:[#allocation5 + $0x228] ss:$16 sps:$4 sm:$0xff]   ;;  %v11092_v11 = vld [vmem:[#allocation5 + $0x244] ss:$16 sps:$4 sm:$0xff]  }
  0x74   :  { %v11095_v12 = vld [vmem:[#allocation5 + $0x24c] ss:$16 sps:$4 sm:$0xff]   ;;  %v11090_v13 = vld [vmem:[#allocation5 + $0x240] ss:$16 sps:$4 sm:$0xff]   ;;  %v11093_v14 = vld [vmem:[#allocation5 + $0x248] ss:$16 sps:$4 sm:$0xff]  }
  0x75   :  { %7567 = vmatpush1.bf16.msra.mxu0 %v11020_v26  ;;  %8346 = vmatpush1.bf16.msra.mxu1 %v11021_v27  ;;  %v11098_v15 = vld [vmem:[#allocation5 + $0x264] ss:$16 sps:$4 sm:$0xff]   ;;  %v11101_v16 = vld [vmem:[#allocation5 + $0x26c] ss:$16 sps:$4 sm:$0xff]   ;;  %v11096_v17 = vld [vmem:[#allocation5 + $0x260] ss:$16 sps:$4 sm:$0xff]  }
  0x76   :  { %7568 = vmatprep.subr.bf16.mxu0 %v11022_v28  ;;  %8347 = vmatprep.subr.bf16.mxu1 %v11024_v29  ;;  %v11099_v18 = vld [vmem:[#allocation5 + $0x268] ss:$16 sps:$4 sm:$0xff]   ;;  %v11104_v19 = vld [vmem:[#allocation5 + $0x284] ss:$16 sps:$4 sm:$0xff]   ;;  %v11107_v20 = vld [vmem:[#allocation5 + $0x28c] ss:$16 sps:$4 sm:$0xff]  }
  0x77   :  { %v11102_v21 = vld [vmem:[#allocation5 + $0x280] ss:$16 sps:$4 sm:$0xff]   ;;  %v11105_v22 = vld [vmem:[#allocation5 + $0x288] ss:$16 sps:$4 sm:$0xff]   ;;  %v11110_v23 = vld [vmem:[#allocation5 + $0x2a4] ss:$16 sps:$4 sm:$0xff]  }
  0x78   :  { %v11113_v24 = vld [vmem:[#allocation5 + $0x2ac] ss:$16 sps:$4 sm:$0xff]   ;;  %v11108_v25 = vld [vmem:[#allocation5 + $0x2a0] ss:$16 sps:$4 sm:$0xff]   ;;  %v11111_v26 = vld [vmem:[#allocation5 + $0x2a8] ss:$16 sps:$4 sm:$0xff]  }
  0x79   :  { %7569 = vmatpush1.bf16.msra.mxu0 %v11026_v30  ;;  %8348 = vmatpush1.bf16.msra.mxu1 %v11027_v31  ;;  %v11116_v27 = vld [vmem:[#allocation5 + $0x2c4] ss:$16 sps:$4 sm:$0xff]   ;;  %v11119_v28 = vld [vmem:[#allocation5 + $0x2cc] ss:$16 sps:$4 sm:$0xff]   ;;  %v11114_v31 = vld [vmem:[#allocation5 + $0x2c0] ss:$16 sps:$4 sm:$0xff]  }
  0x7a   :  { %7570 = vmatprep.subr.bf16.mxu0 %v11028_v32  ;;  %8349 = vmatprep.subr.bf16.mxu1 %v11030_v33  ;;  %v13118_v29 = vld [vmem:[#allocation2 + $0x8] sm:$0xff]  ;;  %v11117_v32 = vld [vmem:[#allocation5 + $0x2c8] ss:$16 sps:$4 sm:$0xff]   ;;  %v11143_v46 = vld [vmem:[#allocation5 + $0x34c] ss:$16 sps:$4 sm:$0xff]   ;;  %s9480_s28 = sshll.u32 %s13027_s4, 4  ;;  %s9481_s28 = int_to_ptr.vmem [resolvable:$true] %s9480_s28 }
  0x7b   :  { %v9494_v30 = vcombine.high %v13118_v29, %v13118_v29  ;;  %v11122_v33 = vld [vmem:[#allocation5 + $0x2e4] ss:$16 sps:$4 sm:$0xff]   ;;  %v11141_v48 = vld [vmem:[#allocation5 + $0x348] ss:$16 sps:$4 sm:$0xff]   ;;  %s12988_s29 = scalar_lea.vmem %s9481_s28, 128  ;;  %p12993_p13 = scmp.lt.s32.totalorder %s9481_s28, %s9481_s28 }
  0x7c   :  { %p12989_p12 = scmp.ne.s32.totalorder %s9481_s28, %s12988_s29  ;;  %p12994_p0 = scmp.lt.s32.totalorder %s12988_s29, %s12988_s29 }
  0x7d   :  { %7571 = vmatpush1.bf16.msra.mxu0 %v11032_v34  ;;  %8350 = vmatpush1.bf16.msra.mxu1 %v11033_v35  ;;  %v11125_v34 = vld [vmem:[#allocation5 + $0x2ec] ss:$16 sps:$4 sm:$0xff]   ;;  %v11120_v35 = vld [vmem:[#allocation5 + $0x2e0] ss:$16 sps:$4 sm:$0xff]  }
  0x7e   :  { %7572 = vmatprep.subr.bf16.mxu0 %v11034_v36  ;;  %8351 = vmatprep.subr.bf16.mxu1 %v11036_v37  ;;  %v11123_v36 = vld [vmem:[#allocation5 + $0x2e8] ss:$16 sps:$4 sm:$0xff]   ;;  %v11128_v37 = vld [vmem:[#allocation5 + $0x304] ss:$16 sps:$4 sm:$0xff]   ;;  %p12995_p1 = por %p12994_p0, %p12993_p13 }
  0x80   :  { %p12996_p2 = pnand %p12995_p1, %p12989_p12 }
  0x81   :  { %7573 = vmatpush1.bf16.msra.mxu0 %v11038_v38  ;;  %8352 = vmatpush1.bf16.msra.mxu1 %v11039_v39  ;;  %v11131_v38 = vld [vmem:[#allocation5 + $0x30c] ss:$16 sps:$4 sm:$0xff]   ;;  %v11126_v39 = vld [vmem:[#allocation5 + $0x300] ss:$16 sps:$4 sm:$0xff]  }
  0x82   :  { %7574 = vmatprep.subr.bf16.mxu0 %v11040_v40  ;;  %8353 = vmatprep.subr.bf16.mxu1 %v11042_v41  ;;  %v11129_v40 = vld [vmem:[#allocation5 + $0x308] ss:$16 sps:$4 sm:$0xff]   ;;  %v11134_v41 = vld [vmem:[#allocation5 + $0x324] ss:$16 sps:$4 sm:$0xff]  }
  0x85   :  { %7575 = vmatpush1.bf16.msra.mxu0 %v11044_v42  ;;  %8354 = vmatpush1.bf16.msra.mxu1 %v11045_v43  ;;  %v11137_v42 = vld [vmem:[#allocation5 + $0x32c] ss:$16 sps:$4 sm:$0xff]   ;;  %v11132_v43 = vld [vmem:[#allocation5 + $0x320] ss:$16 sps:$4 sm:$0xff]  }
  0x86   :  { %7576 = vmatprep.subr.bf16.mxu0 %v11046_v44  ;;  %8355 = vmatprep.subr.bf16.mxu1 %v11048_v45  ;;  %v11135_v44 = vld [vmem:[#allocation5 + $0x328] ss:$16 sps:$4 sm:$0xff]   ;;  %v11140_v45 = vld [vmem:[#allocation5 + $0x344] ss:$16 sps:$4 sm:$0xff]  }
  0x89   :  { %7577 = vmatpush1.bf16.msra.mxu0 %v11050_v47  ;;  %8356 = vmatpush1.bf16.msra.mxu1 %v11051_v49  ;;  %v11138_v47 = vld [vmem:[#allocation5 + $0x340] ss:$16 sps:$4 sm:$0xff]   ;;  %v11146_v49 = vld [vmem:[#allocation5 + $0x364] ss:$16 sps:$4 sm:$0xff]  }
  0x8a   :  { %7578 = vmatprep.subr.bf16.mxu0 %v11052_v50  ;;  %8357 = vmatprep.subr.bf16.mxu1 %v11054_v51  ;;  %v11149_v50 = vld [vmem:[#allocation5 + $0x36c] ss:$16 sps:$4 sm:$0xff]   ;;  %v11144_v51 = vld [vmem:[#allocation5 + $0x360] ss:$16 sps:$4 sm:$0xff]  }
  0x8d   :  { %7579 = vmatpush1.bf16.msra.mxu0 %v11056_v52  ;;  %8358 = vmatpush1.bf16.msra.mxu1 %v11057_v53  ;;  %v11147_v52 = vld [vmem:[#allocation5 + $0x368] ss:$16 sps:$4 sm:$0xff]   ;;  %v11152_v53 = vld [vmem:[#allocation5 + $0x384] ss:$16 sps:$4 sm:$0xff]  }
  0x8e   :  { %7580 = vmatprep.subr.bf16.mxu0 %v11058_v54  ;;  %8359 = vmatprep.subr.bf16.mxu1 %v11060_v55  ;;  %v11155_v54 = vld [vmem:[#allocation5 + $0x38c] ss:$16 sps:$4 sm:$0xff]   ;;  %v11150_v55 = vld [vmem:[#allocation5 + $0x380] ss:$16 sps:$4 sm:$0xff]  }
  0x91   :  { %7581 = vmatpush1.bf16.msra.mxu0 %v11062_v56  ;;  %8360 = vmatpush1.bf16.msra.mxu1 %v11063_v57  ;;  %v11153_v56 = vld [vmem:[#allocation5 + $0x388] ss:$16 sps:$4 sm:$0xff]   ;;  %v11158_v57 = vld [vmem:[#allocation5 + $0x3a4] ss:$16 sps:$4 sm:$0xff]  }
  0x92   :  { %7582 = vmatprep.subr.bf16.mxu0 %v11064_v58  ;;  %8361 = vmatprep.subr.bf16.mxu1 %v11066_v59  ;;  %v11161_v58 = vld [vmem:[#allocation5 + $0x3ac] ss:$16 sps:$4 sm:$0xff]   ;;  %v11156_v59 = vld [vmem:[#allocation5 + $0x3a0] ss:$16 sps:$4 sm:$0xff]  }
  0x95   :  { %7583 = vmatpush1.bf16.msra.mxu0 %v11068_v60  ;;  %8362 = vmatpush1.bf16.msra.mxu1 %v11069_v61  ;;  %v11159_v60 = vld [vmem:[#allocation5 + $0x3a8] ss:$16 sps:$4 sm:$0xff]   ;;  %v11164_v61 = vld [vmem:[#allocation5 + $0x3c4] ss:$16 sps:$4 sm:$0xff]  }
  0x96   :  { %7584 = vmatprep.subr.bf16.mxu0 %v11070_v62  ;;  %8363 = vmatprep.subr.bf16.mxu1 %v11072_v63  ;;  %v11167_v62 = vld [vmem:[#allocation5 + $0x3cc] ss:$16 sps:$4 sm:$0xff]   ;;  %v11162_v63 = vld [vmem:[#allocation5 + $0x3c0] ss:$16 sps:$4 sm:$0xff]  }
  0x99   :  { %7585 = vmatpush1.bf16.msra.mxu0 %v11074_v0  ;;  %8364 = vmatpush1.bf16.msra.mxu1 %v11075_v1  ;;  %v11165_v0 = vld [vmem:[#allocation5 + $0x3c8] ss:$16 sps:$4 sm:$0xff]   ;;  %v11170_v1 = vld [vmem:[#allocation5 + $0x3e4] ss:$16 sps:$4 sm:$0xff]  }
  0x9a   :  { %7595 = vmatprep.subr.bf16.mxu0 %v11080_v2  ;;  %8374 = vmatprep.subr.bf16.mxu1 %v11083_v3  ;;  %v11173_v2 = vld [vmem:[#allocation5 + $0x3ec] ss:$16 sps:$4 sm:$0xff]   ;;  %v11168_v3 = vld [vmem:[#allocation5 + $0x3e0] ss:$16 sps:$4 sm:$0xff]  }
  0x9c   :  { %7587 = vmatmul.mubr.bf16.vlgmr.msra.gmra.mrb[0].mxu0 %v9491_v4  ;;  %8366 = vmatmul.mubr.bf16.vlgmr.msra.gmra.mrb[0].mxu1 %v9491_v4  ;;  %v11171_v4 = vld [vmem:[#allocation5 + $0x3e8] ss:$16 sps:$4 sm:$0xff]  }
  0x9d   :  { %7596 = vmatpush1.bf16.msra.mxu0 %v11078_v5  ;;  %8375 = vmatpush1.bf16.msra.mxu1 %v11081_v6  ;;  %v11178_v5 = vld [vmem:[#allocation5 + $0x404] ss:$16 sps:$4 sm:$0xff]   ;;  %v11181_v6 = vld [vmem:[#allocation5 + $0x40c] ss:$16 sps:$4 sm:$0xff]  }
  0x9e   :  { %7597 = vmatprep.subr.bf16.mxu0 %v11086_v7  ;;  %8376 = vmatprep.subr.bf16.mxu1 %v11089_v8  ;;  %v9493_v7 = vcombine.low %v13118_v29, %v13118_v29  ;;  %v11176_v8 = vld [vmem:[#allocation5 + $0x400] ss:$16 sps:$4 sm:$0xff]   ;;  %v11211_v29 = vld [vmem:[#allocation5 + $0x4ac] ss:$16 sps:$4 sm:$0xff]  }
  0x9f   :  { %7627 = vmatprep.mubr.bf16.mxu0 %v9494_v30  ;;  %8406 = vmatprep.mubr.bf16.mxu1 %v9494_v30  ;;  %v11206_v30 = vld [vmem:[#allocation5 + $0x4a0] ss:$16 sps:$4 sm:$0xff]  }
  0xa1   :  { %7598 = vmatpush1.bf16.msra.mxu0 %v11084_v9  ;;  %8377 = vmatpush1.bf16.msra.mxu1 %v11087_v10  ;;  %v11179_v9 = vld [vmem:[#allocation5 + $0x408] ss:$16 sps:$4 sm:$0xff]   ;;  %v11184_v10 = vld [vmem:[#allocation5 + $0x424] ss:$16 sps:$4 sm:$0xff]  }
  0xa2   :  { %7599 = vmatprep.subr.bf16.mxu0 %v11092_v11  ;;  %8378 = vmatprep.subr.bf16.mxu1 %v11095_v12  ;;  %v13124_v11 = vld [vmem:[#allocation2 + $0x10] sm:$0xff] }
  0xa3   :  { %v11187_v12 = vld [vmem:[#allocation5 + $0x42c] ss:$16 sps:$4 sm:$0xff]  }
  0xa5   :  { %7600 = vmatpush1.bf16.msra.mxu0 %v11090_v13  ;;  %8379 = vmatpush1.bf16.msra.mxu1 %v11093_v14  ;;  %v9496_v13 = vcombine.high %v13124_v11, %v13124_v11  ;;  %v11182_v14 = vld [vmem:[#allocation5 + $0x420] ss:$16 sps:$4 sm:$0xff]  }
  0xa6   :  { %7601 = vmatprep.subr.bf16.mxu0 %v11098_v15  ;;  %8380 = vmatprep.subr.bf16.mxu1 %v11101_v16  ;;  %v11185_v15 = vld [vmem:[#allocation5 + $0x428] ss:$16 sps:$4 sm:$0xff]   ;;  %v11190_v16 = vld [vmem:[#allocation5 + $0x444] ss:$16 sps:$4 sm:$0xff]  }
  0xa9   :  { %7602 = vmatpush1.bf16.msra.mxu0 %v11096_v17  ;;  %8381 = vmatpush1.bf16.msra.mxu1 %v11099_v18  ;;  %v11193_v17 = vld [vmem:[#allocation5 + $0x44c] ss:$16 sps:$4 sm:$0xff]   ;;  %v11188_v18 = vld [vmem:[#allocation5 + $0x440] ss:$16 sps:$4 sm:$0xff]  }
  0xaa   :  { %7603 = vmatprep.subr.bf16.mxu0 %v11104_v19  ;;  %8382 = vmatprep.subr.bf16.mxu1 %v11107_v20  ;;  %v11191_v19 = vld [vmem:[#allocation5 + $0x448] ss:$16 sps:$4 sm:$0xff]   ;;  %v11196_v20 = vld [vmem:[#allocation5 + $0x464] ss:$16 sps:$4 sm:$0xff]  }
  0xad   :  { %7604 = vmatpush1.bf16.msra.mxu0 %v11102_v21  ;;  %8383 = vmatpush1.bf16.msra.mxu1 %v11105_v22  ;;  %v11199_v21 = vld [vmem:[#allocation5 + $0x46c] ss:$16 sps:$4 sm:$0xff]   ;;  %v11194_v22 = vld [vmem:[#allocation5 + $0x460] ss:$16 sps:$4 sm:$0xff]  }
  0xae   :  { %7605 = vmatprep.subr.bf16.mxu0 %v11110_v23  ;;  %8384 = vmatprep.subr.bf16.mxu1 %v11113_v24  ;;  %v11197_v23 = vld [vmem:[#allocation5 + $0x468] ss:$16 sps:$4 sm:$0xff]   ;;  %v11202_v24 = vld [vmem:[#allocation5 + $0x484] ss:$16 sps:$4 sm:$0xff]  }
  0xb1   :  { %7606 = vmatpush1.bf16.msra.mxu0 %v11108_v25  ;;  %8385 = vmatpush1.bf16.msra.mxu1 %v11111_v26  ;;  %v11205_v25 = vld [vmem:[#allocation5 + $0x48c] ss:$16 sps:$4 sm:$0xff]   ;;  %v11200_v26 = vld [vmem:[#allocation5 + $0x480] ss:$16 sps:$4 sm:$0xff]  }
  0xb2   :  { %7607 = vmatprep.subr.bf16.mxu0 %v11116_v27  ;;  %8386 = vmatprep.subr.bf16.mxu1 %v11119_v28  ;;  %v11203_v27 = vld [vmem:[#allocation5 + $0x488] ss:$16 sps:$4 sm:$0xff]   ;;  %v11208_v28 = vld [vmem:[#allocation5 + $0x4a4] ss:$16 sps:$4 sm:$0xff]  }
  0xb5   :  { %7608 = vmatpush1.bf16.msra.mxu0 %v11114_v31  ;;  %8387 = vmatpush1.bf16.msra.mxu1 %v11117_v32  ;;  %v11209_v31 = vld [vmem:[#allocation5 + $0x4a8] ss:$16 sps:$4 sm:$0xff]   ;;  %v11214_v32 = vld [vmem:[#allocation5 + $0x4c4] ss:$16 sps:$4 sm:$0xff]  }
  0xb6   :  { %7609 = vmatprep.subr.bf16.mxu0 %v11122_v33  ;;  %8388 = vmatprep.subr.bf16.mxu1 %v11125_v34  ;;  %v11217_v33 = vld [vmem:[#allocation5 + $0x4cc] ss:$16 sps:$4 sm:$0xff]   ;;  %v11212_v34 = vld [vmem:[#allocation5 + $0x4c0] ss:$16 sps:$4 sm:$0xff]  }
  0xb9   :  { %7610 = vmatpush1.bf16.msra.mxu0 %v11120_v35  ;;  %8389 = vmatpush1.bf16.msra.mxu1 %v11123_v36  ;;  %v11215_v35 = vld [vmem:[#allocation5 + $0x4c8] ss:$16 sps:$4 sm:$0xff]   ;;  %v11220_v36 = vld [vmem:[#allocation5 + $0x4e4] ss:$16 sps:$4 sm:$0xff]  }
  0xba   :  { %7611 = vmatprep.subr.bf16.mxu0 %v11128_v37  ;;  %8390 = vmatprep.subr.bf16.mxu1 %v11131_v38  ;;  %v11223_v37 = vld [vmem:[#allocation5 + $0x4ec] ss:$16 sps:$4 sm:$0xff]   ;;  %v11218_v38 = vld [vmem:[#allocation5 + $0x4e0] ss:$16 sps:$4 sm:$0xff]  }
  0xbd   :  { %7612 = vmatpush1.bf16.msra.mxu0 %v11126_v39  ;;  %8391 = vmatpush1.bf16.msra.mxu1 %v11129_v40  ;;  %v11221_v39 = vld [vmem:[#allocation5 + $0x4e8] ss:$16 sps:$4 sm:$0xff]   ;;  %v11226_v40 = vld [vmem:[#allocation5 + $0x504] ss:$16 sps:$4 sm:$0xff]  }
  0xbe   :  { %7613 = vmatprep.subr.bf16.mxu0 %v11134_v41  ;;  %8392 = vmatprep.subr.bf16.mxu1 %v11137_v42  ;;  %v11229_v41 = vld [vmem:[#allocation5 + $0x50c] ss:$16 sps:$4 sm:$0xff]   ;;  %v11224_v42 = vld [vmem:[#allocation5 + $0x500] ss:$16 sps:$4 sm:$0xff]  }
  0xc1   :  { %7614 = vmatpush1.bf16.msra.mxu0 %v11132_v43  ;;  %8393 = vmatpush1.bf16.msra.mxu1 %v11135_v44  ;;  %v11227_v43 = vld [vmem:[#allocation5 + $0x508] ss:$16 sps:$4 sm:$0xff]   ;;  %v11232_v44 = vld [vmem:[#allocation5 + $0x524] ss:$16 sps:$4 sm:$0xff]  }
  0xc2   :  { %7615 = vmatprep.subr.bf16.mxu0 %v11140_v45  ;;  %8394 = vmatprep.subr.bf16.mxu1 %v11143_v46  ;;  %v11235_v45 = vld [vmem:[#allocation5 + $0x52c] ss:$16 sps:$4 sm:$0xff]   ;;  %v11230_v46 = vld [vmem:[#allocation5 + $0x520] ss:$16 sps:$4 sm:$0xff]  }
  0xc5   :  { %7616 = vmatpush1.bf16.msra.mxu0 %v11138_v47  ;;  %8395 = vmatpush1.bf16.msra.mxu1 %v11141_v48  ;;  %v11233_v47 = vld [vmem:[#allocation5 + $0x528] ss:$16 sps:$4 sm:$0xff]   ;;  %v11238_v48 = vld [vmem:[#allocation5 + $0x544] ss:$16 sps:$4 sm:$0xff]  }
  0xc6   :  { %7617 = vmatprep.subr.bf16.mxu0 %v11146_v49  ;;  %8396 = vmatprep.subr.bf16.mxu1 %v11149_v50  ;;  %v11241_v49 = vld [vmem:[#allocation5 + $0x54c] ss:$16 sps:$4 sm:$0xff]   ;;  %v11236_v50 = vld [vmem:[#allocation5 + $0x540] ss:$16 sps:$4 sm:$0xff]  }
  0xc9   :  { %7618 = vmatpush1.bf16.msra.mxu0 %v11144_v51  ;;  %8397 = vmatpush1.bf16.msra.mxu1 %v11147_v52  ;;  %v11239_v51 = vld [vmem:[#allocation5 + $0x548] ss:$16 sps:$4 sm:$0xff]   ;;  %v11244_v52 = vld [vmem:[#allocation5 + $0x564] ss:$16 sps:$4 sm:$0xff]  }
  0xca   :  { %7619 = vmatprep.subr.bf16.mxu0 %v11152_v53  ;;  %8398 = vmatprep.subr.bf16.mxu1 %v11155_v54  ;;  %v11247_v53 = vld [vmem:[#allocation5 + $0x56c] ss:$16 sps:$4 sm:$0xff]   ;;  %v11242_v54 = vld [vmem:[#allocation5 + $0x560] ss:$16 sps:$4 sm:$0xff]  }
  0xcd   :  { %7620 = vmatpush1.bf16.msra.mxu0 %v11150_v55  ;;  %8399 = vmatpush1.bf16.msra.mxu1 %v11153_v56  ;;  %v11245_v55 = vld [vmem:[#allocation5 + $0x568] ss:$16 sps:$4 sm:$0xff]   ;;  %v11250_v56 = vld [vmem:[#allocation5 + $0x584] ss:$16 sps:$4 sm:$0xff]  }
  0xce   :  { %7621 = vmatprep.subr.bf16.mxu0 %v11158_v57  ;;  %8400 = vmatprep.subr.bf16.mxu1 %v11161_v58  ;;  %v11253_v57 = vld [vmem:[#allocation5 + $0x58c] ss:$16 sps:$4 sm:$0xff]   ;;  %v11248_v58 = vld [vmem:[#allocation5 + $0x580] ss:$16 sps:$4 sm:$0xff]  }
  0xd1   :  { %7622 = vmatpush1.bf16.msra.mxu0 %v11156_v59  ;;  %8401 = vmatpush1.bf16.msra.mxu1 %v11159_v60  ;;  %v11251_v59 = vld [vmem:[#allocation5 + $0x588] ss:$16 sps:$4 sm:$0xff]   ;;  %v11256_v60 = vld [vmem:[#allocation5 + $0x5a4] ss:$16 sps:$4 sm:$0xff]  }
  0xd2   :  { %7623 = vmatprep.subr.bf16.mxu0 %v11164_v61  ;;  %8402 = vmatprep.subr.bf16.mxu1 %v11167_v62  ;;  %v11259_v61 = vld [vmem:[#allocation5 + $0x5ac] ss:$16 sps:$4 sm:$0xff]   ;;  %v11254_v62 = vld [vmem:[#allocation5 + $0x5a0] ss:$16 sps:$4 sm:$0xff]  }
  0xd5   :  { %7624 = vmatpush1.bf16.msra.mxu0 %v11162_v63  ;;  %8403 = vmatpush1.bf16.msra.mxu1 %v11165_v0  ;;  %v11257_v63 = vld [vmem:[#allocation5 + $0x5a8] ss:$16 sps:$4 sm:$0xff]   ;;  %v11262_v0 = vld [vmem:[#allocation5 + $0x5c4] ss:$16 sps:$4 sm:$0xff]  }
  0xd6   :  { %7625 = vmatprep.subr.bf16.mxu0 %v11170_v1  ;;  %8404 = vmatprep.subr.bf16.mxu1 %v11173_v2  ;;  %v11265_v1 = vld [vmem:[#allocation5 + $0x5cc] ss:$16 sps:$4 sm:$0xff]   ;;  %v11260_v2 = vld [vmem:[#allocation5 + $0x5c0] ss:$16 sps:$4 sm:$0xff]  }
  0xd9   :  { %7626 = vmatpush1.bf16.msra.mxu0 %v11168_v3  ;;  %8405 = vmatpush1.bf16.msra.mxu1 %v11171_v4  ;;  %v11263_v3 = vld [vmem:[#allocation5 + $0x5c8] ss:$16 sps:$4 sm:$0xff]   ;;  %v11268_v4 = vld [vmem:[#allocation5 + $0x5e4] ss:$16 sps:$4 sm:$0xff]  }
  0xda   :  { %7636 = vmatprep.subr.bf16.mxu0 %v11178_v5  ;;  %8415 = vmatprep.subr.bf16.mxu1 %v11181_v6  ;;  %v11271_v5 = vld [vmem:[#allocation5 + $0x5ec] ss:$16 sps:$4 sm:$0xff]   ;;  %v11266_v6 = vld [vmem:[#allocation5 + $0x5e0] ss:$16 sps:$4 sm:$0xff]  }
  0xdc   :  { %7628 = vmatmul.mubr.bf16.vlgmr.msra.gmra.mrb[0].mxu0 %v9493_v7  ;;  %8407 = vmatmul.mubr.bf16.vlgmr.msra.gmra.mrb[0].mxu1 %v9493_v7  ;;  %v11269_v7 = vld [vmem:[#allocation5 + $0x5e8] ss:$16 sps:$4 sm:$0xff]  }
  0xdd   :  { %7637 = vmatpush1.bf16.msra.mxu0 %v11176_v8  ;;  %8416 = vmatpush1.bf16.msra.mxu1 %v11179_v9  ;;  %v11276_v8 = vld [vmem:[#allocation5 + $0x604] ss:$16 sps:$4 sm:$0xff]   ;;  %v11279_v9 = vld [vmem:[#allocation5 + $0x60c] ss:$16 sps:$4 sm:$0xff]  }
  0xde   :  { %7638 = vmatprep.subr.bf16.mxu0 %v11184_v10  ;;  %8417 = vmatprep.subr.bf16.mxu1 %v11187_v12  ;;  %v11274_v10 = vld [vmem:[#allocation5 + $0x600] ss:$16 sps:$4 sm:$0xff]   ;;  %v9495_v12 = vcombine.low %v13124_v11, %v13124_v11  ;;  %v11291_v11 = vld [vmem:[#allocation5 + $0x64c] ss:$16 sps:$4 sm:$0xff]  }
  0xdf   :  { %7668 = vmatprep.mubr.bf16.mxu0 %v9496_v13  ;;  %8447 = vmatprep.mubr.bf16.mxu1 %v9496_v13  ;;  %v11277_v13 = vld [vmem:[#allocation5 + $0x608] ss:$16 sps:$4 sm:$0xff]  }
  0xe1   :  { %7639 = vmatpush1.bf16.msra.mxu0 %v11182_v14  ;;  %8418 = vmatpush1.bf16.msra.mxu1 %v11185_v15  ;;  %v13130_v14 = vld [vmem:[#allocation2 + $0x18] sm:$0xff] }
  0xe2   :  { %7640 = vmatprep.subr.bf16.mxu0 %v11190_v16  ;;  %8419 = vmatprep.subr.bf16.mxu1 %v11193_v17  ;;  %v11282_v15 = vld [vmem:[#allocation5 + $0x624] ss:$16 sps:$4 sm:$0xff]   ;;  %v11285_v16 = vld [vmem:[#allocation5 + $0x62c] ss:$16 sps:$4 sm:$0xff]   ;;  %v9498_v17 = vcombine.high %v13130_v14, %v13130_v14 }
  0xe5   :  { %7641 = vmatpush1.bf16.msra.mxu0 %v11188_v18  ;;  %8420 = vmatpush1.bf16.msra.mxu1 %v11191_v19  ;;  %v11280_v18 = vld [vmem:[#allocation5 + $0x620] ss:$16 sps:$4 sm:$0xff]   ;;  %v11283_v19 = vld [vmem:[#allocation5 + $0x628] ss:$16 sps:$4 sm:$0xff]  }
  0xe6   :  { %7642 = vmatprep.subr.bf16.mxu0 %v11196_v20  ;;  %8421 = vmatprep.subr.bf16.mxu1 %v11199_v21  ;;  %v11288_v20 = vld [vmem:[#allocation5 + $0x644] ss:$16 sps:$4 sm:$0xff]   ;;  %v11286_v21 = vld [vmem:[#allocation5 + $0x640] ss:$16 sps:$4 sm:$0xff]  }
  0xe9   :  { %7643 = vmatpush1.bf16.msra.mxu0 %v11194_v22  ;;  %8422 = vmatpush1.bf16.msra.mxu1 %v11197_v23  ;;  %v11289_v22 = vld [vmem:[#allocation5 + $0x648] ss:$16 sps:$4 sm:$0xff]   ;;  %v11294_v23 = vld [vmem:[#allocation5 + $0x664] ss:$16 sps:$4 sm:$0xff]  }
  0xea   :  { %7644 = vmatprep.subr.bf16.mxu0 %v11202_v24  ;;  %8423 = vmatprep.subr.bf16.mxu1 %v11205_v25  ;;  %v11297_v24 = vld [vmem:[#allocation5 + $0x66c] ss:$16 sps:$4 sm:$0xff]   ;;  %v11292_v25 = vld [vmem:[#allocation5 + $0x660] ss:$16 sps:$4 sm:$0xff]  }
  0xed   :  { %7645 = vmatpush1.bf16.msra.mxu0 %v11200_v26  ;;  %8424 = vmatpush1.bf16.msra.mxu1 %v11203_v27  ;;  %v11295_v26 = vld [vmem:[#allocation5 + $0x668] ss:$16 sps:$4 sm:$0xff]   ;;  %v11300_v27 = vld [vmem:[#allocation5 + $0x684] ss:$16 sps:$4 sm:$0xff]  }
  0xee   :  { %7646 = vmatprep.subr.bf16.mxu0 %v11208_v28  ;;  %8425 = vmatprep.subr.bf16.mxu1 %v11211_v29  ;;  %v11303_v28 = vld [vmem:[#allocation5 + $0x68c] ss:$16 sps:$4 sm:$0xff]   ;;  %v11298_v29 = vld [vmem:[#allocation5 + $0x680] ss:$16 sps:$4 sm:$0xff]  }
  0xf1   :  { %7647 = vmatpush1.bf16.msra.mxu0 %v11206_v30  ;;  %8426 = vmatpush1.bf16.msra.mxu1 %v11209_v31  ;;  %v11301_v30 = vld [vmem:[#allocation5 + $0x688] ss:$16 sps:$4 sm:$0xff]   ;;  %v11306_v31 = vld [vmem:[#allocation5 + $0x6a4] ss:$16 sps:$4 sm:$0xff]  }
  0xf2   :  { %7648 = vmatprep.subr.bf16.mxu0 %v11214_v32  ;;  %8427 = vmatprep.subr.bf16.mxu1 %v11217_v33  ;;  %v11309_v32 = vld [vmem:[#allocation5 + $0x6ac] ss:$16 sps:$4 sm:$0xff]   ;;  %v11304_v33 = vld [vmem:[#allocation5 + $0x6a0] ss:$16 sps:$4 sm:$0xff]  }
  0xf5   :  { %7649 = vmatpush1.bf16.msra.mxu0 %v11212_v34  ;;  %8428 = vmatpush1.bf16.msra.mxu1 %v11215_v35  ;;  %v11307_v34 = vld [vmem:[#allocation5 + $0x6a8] ss:$16 sps:$4 sm:$0xff]   ;;  %v11312_v35 = vld [vmem:[#allocation5 + $0x6c4] ss:$16 sps:$4 sm:$0xff]  }
  0xf6   :  { %7650 = vmatprep.subr.bf16.mxu0 %v11220_v36  ;;  %8429 = vmatprep.subr.bf16.mxu1 %v11223_v37  ;;  %v11315_v36 = vld [vmem:[#allocation5 + $0x6cc] ss:$16 sps:$4 sm:$0xff]   ;;  %v11310_v37 = vld [vmem:[#allocation5 + $0x6c0] ss:$16 sps:$4 sm:$0xff]  }
  0xf9   :  { %7651 = vmatpush1.bf16.msra.mxu0 %v11218_v38  ;;  %8430 = vmatpush1.bf16.msra.mxu1 %v11221_v39  ;;  %v11313_v38 = vld [vmem:[#allocation5 + $0x6c8] ss:$16 sps:$4 sm:$0xff]   ;;  %v11318_v39 = vld [vmem:[#allocation5 + $0x6e4] ss:$16 sps:$4 sm:$0xff]  }
  0xfa   :  { %7652 = vmatprep.subr.bf16.mxu0 %v11226_v40  ;;  %8431 = vmatprep.subr.bf16.mxu1 %v11229_v41  ;;  %v11321_v40 = vld [vmem:[#allocation5 + $0x6ec] ss:$16 sps:$4 sm:$0xff]   ;;  %v11316_v41 = vld [vmem:[#allocation5 + $0x6e0] ss:$16 sps:$4 sm:$0xff]  }
  0xfd   :  { %7653 = vmatpush1.bf16.msra.mxu0 %v11224_v42  ;;  %8432 = vmatpush1.bf16.msra.mxu1 %v11227_v43  ;;  %v11319_v42 = vld [vmem:[#allocation5 + $0x6e8] ss:$16 sps:$4 sm:$0xff]   ;;  %v11324_v43 = vld [vmem:[#allocation5 + $0x704] ss:$16 sps:$4 sm:$0xff]  }
  0xfe   :  { %7654 = vmatprep.subr.bf16.mxu0 %v11232_v44  ;;  %8433 = vmatprep.subr.bf16.mxu1 %v11235_v45  ;;  %v11327_v44 = vld [vmem:[#allocation5 + $0x70c] ss:$16 sps:$4 sm:$0xff]   ;;  %v11322_v45 = vld [vmem:[#allocation5 + $0x700] ss:$16 sps:$4 sm:$0xff]  }
 0x101   :  { %7655 = vmatpush1.bf16.msra.mxu0 %v11230_v46  ;;  %8434 = vmatpush1.bf16.msra.mxu1 %v11233_v47  ;;  %v11325_v46 = vld [vmem:[#allocation5 + $0x708] ss:$16 sps:$4 sm:$0xff]   ;;  %v11330_v47 = vld [vmem:[#allocation5 + $0x724] ss:$16 sps:$4 sm:$0xff]  }
 0x102   :  { %7656 = vmatprep.subr.bf16.mxu0 %v11238_v48  ;;  %8435 = vmatprep.subr.bf16.mxu1 %v11241_v49  ;;  %v11333_v48 = vld [vmem:[#allocation5 + $0x72c] ss:$16 sps:$4 sm:$0xff]   ;;  %v11328_v49 = vld [vmem:[#allocation5 + $0x720] ss:$16 sps:$4 sm:$0xff]  }
 0x105   :  { %7657 = vmatpush1.bf16.msra.mxu0 %v11236_v50  ;;  %8436 = vmatpush1.bf16.msra.mxu1 %v11239_v51  ;;  %v11331_v50 = vld [vmem:[#allocation5 + $0x728] ss:$16 sps:$4 sm:$0xff]   ;;  %v11336_v51 = vld [vmem:[#allocation5 + $0x744] ss:$16 sps:$4 sm:$0xff]  }
 0x106   :  { %7658 = vmatprep.subr.bf16.mxu0 %v11244_v52  ;;  %8437 = vmatprep.subr.bf16.mxu1 %v11247_v53  ;;  %v11339_v52 = vld [vmem:[#allocation5 + $0x74c] ss:$16 sps:$4 sm:$0xff]   ;;  %v11334_v53 = vld [vmem:[#allocation5 + $0x740] ss:$16 sps:$4 sm:$0xff]  }
 0x109   :  { %7659 = vmatpush1.bf16.msra.mxu0 %v11242_v54  ;;  %8438 = vmatpush1.bf16.msra.mxu1 %v11245_v55  ;;  %v11337_v54 = vld [vmem:[#allocation5 + $0x748] ss:$16 sps:$4 sm:$0xff]   ;;  %v11342_v55 = vld [vmem:[#allocation5 + $0x764] ss:$16 sps:$4 sm:$0xff]  }
 0x10a   :  { %7660 = vmatprep.subr.bf16.mxu0 %v11250_v56  ;;  %8439 = vmatprep.subr.bf16.mxu1 %v11253_v57  ;;  %v11345_v56 = vld [vmem:[#allocation5 + $0x76c] ss:$16 sps:$4 sm:$0xff]   ;;  %v11340_v57 = vld [vmem:[#allocation5 + $0x760] ss:$16 sps:$4 sm:$0xff]  }
 0x10d   :  { %7661 = vmatpush1.bf16.msra.mxu0 %v11248_v58  ;;  %8440 = vmatpush1.bf16.msra.mxu1 %v11251_v59  ;;  %v11343_v58 = vld [vmem:[#allocation5 + $0x768] ss:$16 sps:$4 sm:$0xff]   ;;  %v11348_v59 = vld [vmem:[#allocation5 + $0x784] ss:$16 sps:$4 sm:$0xff]  }
 0x10e   :  { %7662 = vmatprep.subr.bf16.mxu0 %v11256_v60  ;;  %8441 = vmatprep.subr.bf16.mxu1 %v11259_v61  ;;  %v11351_v60 = vld [vmem:[#allocation5 + $0x78c] ss:$16 sps:$4 sm:$0xff]   ;;  %v11346_v61 = vld [vmem:[#allocation5 + $0x780] ss:$16 sps:$4 sm:$0xff]  }
 0x111   :  { %7663 = vmatpush1.bf16.msra.mxu0 %v11254_v62  ;;  %8442 = vmatpush1.bf16.msra.mxu1 %v11257_v63  ;;  %v11349_v62 = vld [vmem:[#allocation5 + $0x788] ss:$16 sps:$4 sm:$0xff]   ;;  %v11354_v63 = vld [vmem:[#allocation5 + $0x7a4] ss:$16 sps:$4 sm:$0xff]  }
 0x112   :  { %7664 = vmatprep.subr.bf16.mxu0 %v11262_v0  ;;  %8443 = vmatprep.subr.bf16.mxu1 %v11265_v1  ;;  %v11357_v0 = vld [vmem:[#allocation5 + $0x7ac] ss:$16 sps:$4 sm:$0xff]   ;;  %v11352_v1 = vld [vmem:[#allocation5 + $0x7a0] ss:$16 sps:$4 sm:$0xff]  }
 0x115   :  { %7665 = vmatpush1.bf16.msra.mxu0 %v11260_v2  ;;  %8444 = vmatpush1.bf16.msra.mxu1 %v11263_v3  ;;  %v11355_v2 = vld [vmem:[#allocation5 + $0x7a8] ss:$16 sps:$4 sm:$0xff]   ;;  %v11360_v3 = vld [vmem:[#allocation5 + $0x7c4] ss:$16 sps:$4 sm:$0xff]  }
 0x116   :  { %7666 = vmatprep.subr.bf16.mxu0 %v11268_v4  ;;  %8445 = vmatprep.subr.bf16.mxu1 %v11271_v5  ;;  %v11363_v4 = vld [vmem:[#allocation5 + $0x7cc] ss:$16 sps:$4 sm:$0xff]   ;;  %v11358_v5 = vld [vmem:[#allocation5 + $0x7c0] ss:$16 sps:$4 sm:$0xff]  }
 0x119   :  { %7667 = vmatpush1.bf16.msra.mxu0 %v11266_v6  ;;  %8446 = vmatpush1.bf16.msra.mxu1 %v11269_v7  ;;  %v11361_v6 = vld [vmem:[#allocation5 + $0x7c8] ss:$16 sps:$4 sm:$0xff]   ;;  %v11366_v7 = vld [vmem:[#allocation5 + $0x7e4] ss:$16 sps:$4 sm:$0xff]  }
 0x11a   :  { %7677 = vmatprep.subr.bf16.mxu0 %v11276_v8  ;;  %8456 = vmatprep.subr.bf16.mxu1 %v11279_v9  ;;  %v11369_v8 = vld [vmem:[#allocation5 + $0x7ec] ss:$16 sps:$4 sm:$0xff]   ;;  %v11364_v9 = vld [vmem:[#allocation5 + $0x7e0] ss:$16 sps:$4 sm:$0xff]  }
 0x11c   :  { %7669 = vmatmul.mubr.bf16.vlgmr.msra.gmra.mrb[0].mxu0 %v9495_v12  ;;  %8448 = vmatmul.mubr.bf16.vlgmr.msra.gmra.mrb[0].mxu1 %v9495_v12  ;;  %v11374_v12 = vld [vmem:[#allocation5 + $0x804] ss:$16 sps:$4 sm:$0xff]  }
 0x11d   :  { %7678 = vmatpush1.bf16.msra.mxu0 %v11274_v10  ;;  %8457 = vmatpush1.bf16.msra.mxu1 %v11277_v13  ;;  %v11367_v10 = vld [vmem:[#allocation5 + $0x7e8] ss:$16 sps:$4 sm:$0xff]   ;;  %v11377_v13 = vld [vmem:[#allocation5 + $0x80c] ss:$16 sps:$4 sm:$0xff]  }
 0x11e   :  { %7679 = vmatprep.subr.bf16.mxu0 %v11282_v15  ;;  %8458 = vmatprep.subr.bf16.mxu1 %v11285_v16  ;;  %v11372_v15 = vld [vmem:[#allocation5 + $0x800] ss:$16 sps:$4 sm:$0xff]   ;;  %v9497_v16 = vcombine.low %v13130_v14, %v13130_v14  ;;  %v11386_v14 = vld [vmem:[#allocation5 + $0x844] ss:$16 sps:$4 sm:$0xff]  }
 0x11f   :  { %7709 = vmatprep.mubr.bf16.mxu0 %v9498_v17  ;;  %8488 = vmatprep.mubr.bf16.mxu1 %v9498_v17  ;;  %v13136_v17 = vld [vmem:[#allocation2 + $0x20] sm:$0xff] }
 0x121   :  { %7680 = vmatpush1.bf16.msra.mxu0 %v11280_v18  ;;  %8459 = vmatpush1.bf16.msra.mxu1 %v11283_v19  ;;  %v11375_v18 = vld [vmem:[#allocation5 + $0x808] ss:$16 sps:$4 sm:$0xff]   ;;  %v11380_v19 = vld [vmem:[#allocation5 + $0x824] ss:$16 sps:$4 sm:$0xff]  }
 0x122   :  { %7681 = vmatprep.subr.bf16.mxu0 %v11288_v20  ;;  %8460 = vmatprep.subr.bf16.mxu1 %v11291_v11  ;;  %v11383_v20 = vld [vmem:[#allocation5 + $0x82c] ss:$16 sps:$4 sm:$0xff]   ;;  %v9500_v11 = vcombine.high %v13136_v17, %v13136_v17 }
 0x125   :  { %7682 = vmatpush1.bf16.msra.mxu0 %v11286_v21  ;;  %8461 = vmatpush1.bf16.msra.mxu1 %v11289_v22  ;;  %v11378_v21 = vld [vmem:[#allocation5 + $0x820] ss:$16 sps:$4 sm:$0xff]   ;;  %v11381_v22 = vld [vmem:[#allocation5 + $0x828] ss:$16 sps:$4 sm:$0xff]  }
 0x126   :  { %7683 = vmatprep.subr.bf16.mxu0 %v11294_v23  ;;  %8462 = vmatprep.subr.bf16.mxu1 %v11297_v24  ;;  %v11389_v23 = vld [vmem:[#allocation5 + $0x84c] ss:$16 sps:$4 sm:$0xff]   ;;  %v11384_v24 = vld [vmem:[#allocation5 + $0x840] ss:$16 sps:$4 sm:$0xff]  }
 0x129   :  { %7684 = vmatpush1.bf16.msra.mxu0 %v11292_v25  ;;  %8463 = vmatpush1.bf16.msra.mxu1 %v11295_v26  ;;  %v11387_v25 = vld [vmem:[#allocation5 + $0x848] ss:$16 sps:$4 sm:$0xff]   ;;  %v11392_v26 = vld [vmem:[#allocation5 + $0x864] ss:$16 sps:$4 sm:$0xff]  }
 0x12a   :  { %7685 = vmatprep.subr.bf16.mxu0 %v11300_v27  ;;  %8464 = vmatprep.subr.bf16.mxu1 %v11303_v28  ;;  %v11395_v27 = vld [vmem:[#allocation5 + $0x86c] ss:$16 sps:$4 sm:$0xff]   ;;  %v11390_v28 = vld [vmem:[#allocation5 + $0x860] ss:$16 sps:$4 sm:$0xff]  }
 0x12d   :  { %7686 = vmatpush1.bf16.msra.mxu0 %v11298_v29  ;;  %8465 = vmatpush1.bf16.msra.mxu1 %v11301_v30  ;;  %v11393_v29 = vld [vmem:[#allocation5 + $0x868] ss:$16 sps:$4 sm:$0xff]   ;;  %v11398_v30 = vld [vmem:[#allocation5 + $0x884] ss:$16 sps:$4 sm:$0xff]  }
 0x12e   :  { %7687 = vmatprep.subr.bf16.mxu0 %v11306_v31  ;;  %8466 = vmatprep.subr.bf16.mxu1 %v11309_v32  ;;  %v11401_v31 = vld [vmem:[#allocation5 + $0x88c] ss:$16 sps:$4 sm:$0xff]   ;;  %v11396_v32 = vld [vmem:[#allocation5 + $0x880] ss:$16 sps:$4 sm:$0xff]  }
 0x131   :  { %7688 = vmatpush1.bf16.msra.mxu0 %v11304_v33  ;;  %8467 = vmatpush1.bf16.msra.mxu1 %v11307_v34  ;;  %v11399_v33 = vld [vmem:[#allocation5 + $0x888] ss:$16 sps:$4 sm:$0xff]   ;;  %v11404_v34 = vld [vmem:[#allocation5 + $0x8a4] ss:$16 sps:$4 sm:$0xff]  }
 0x132   :  { %7689 = vmatprep.subr.bf16.mxu0 %v11312_v35  ;;  %8468 = vmatprep.subr.bf16.mxu1 %v11315_v36  ;;  %v11407_v35 = vld [vmem:[#allocation5 + $0x8ac] ss:$16 sps:$4 sm:$0xff]   ;;  %v11402_v36 = vld [vmem:[#allocation5 + $0x8a0] ss:$16 sps:$4 sm:$0xff]  }
 0x135   :  { %7690 = vmatpush1.bf16.msra.mxu0 %v11310_v37  ;;  %8469 = vmatpush1.bf16.msra.mxu1 %v11313_v38  ;;  %v11405_v37 = vld [vmem:[#allocation5 + $0x8a8] ss:$16 sps:$4 sm:$0xff]   ;;  %v11410_v38 = vld [vmem:[#allocation5 + $0x8c4] ss:$16 sps:$4 sm:$0xff]  }
 0x136   :  { %7691 = vmatprep.subr.bf16.mxu0 %v11318_v39  ;;  %8470 = vmatprep.subr.bf16.mxu1 %v11321_v40  ;;  %v11413_v39 = vld [vmem:[#allocation5 + $0x8cc] ss:$16 sps:$4 sm:$0xff]   ;;  %v11408_v40 = vld [vmem:[#allocation5 + $0x8c0] ss:$16 sps:$4 sm:$0xff]  }
 0x139   :  { %7692 = vmatpush1.bf16.msra.mxu0 %v11316_v41  ;;  %8471 = vmatpush1.bf16.msra.mxu1 %v11319_v42  ;;  %v11411_v41 = vld [vmem:[#allocation5 + $0x8c8] ss:$16 sps:$4 sm:$0xff]   ;;  %v11416_v42 = vld [vmem:[#allocation5 + $0x8e4] ss:$16 sps:$4 sm:$0xff]  }
 0x13a   :  { %7693 = vmatprep.subr.bf16.mxu0 %v11324_v43  ;;  %8472 = vmatprep.subr.bf16.mxu1 %v11327_v44  ;;  %v11419_v43 = vld [vmem:[#allocation5 + $0x8ec] ss:$16 sps:$4 sm:$0xff]   ;;  %v11414_v44 = vld [vmem:[#allocation5 + $0x8e0] ss:$16 sps:$4 sm:$0xff]  }
 0x13d   :  { %7694 = vmatpush1.bf16.msra.mxu0 %v11322_v45  ;;  %8473 = vmatpush1.bf16.msra.mxu1 %v11325_v46  ;;  %v11417_v45 = vld [vmem:[#allocation5 + $0x8e8] ss:$16 sps:$4 sm:$0xff]   ;;  %v11422_v46 = vld [vmem:[#allocation5 + $0x904] ss:$16 sps:$4 sm:$0xff]  }
 0x13e   :  { %7695 = vmatprep.subr.bf16.mxu0 %v11330_v47  ;;  %8474 = vmatprep.subr.bf16.mxu1 %v11333_v48  ;;  %v11425_v47 = vld [vmem:[#allocation5 + $0x90c] ss:$16 sps:$4 sm:$0xff]   ;;  %v11420_v48 = vld [vmem:[#allocation5 + $0x900] ss:$16 sps:$4 sm:$0xff]  }
 0x141   :  { %7696 = vmatpush1.bf16.msra.mxu0 %v11328_v49  ;;  %8475 = vmatpush1.bf16.msra.mxu1 %v11331_v50  ;;  %v11423_v49 = vld [vmem:[#allocation5 + $0x908] ss:$16 sps:$4 sm:$0xff]   ;;  %v11428_v50 = vld [vmem:[#allocation5 + $0x924] ss:$16 sps:$4 sm:$0xff]  }
 0x142   :  { %7697 = vmatprep.subr.bf16.mxu0 %v11336_v51  ;;  %8476 = vmatprep.subr.bf16.mxu1 %v11339_v52  ;;  %v11431_v51 = vld [vmem:[#allocation5 + $0x92c] ss:$16 sps:$4 sm:$0xff]   ;;  %v11426_v52 = vld [vmem:[#allocation5 + $0x920] ss:$16 sps:$4 sm:$0xff]  }
 0x145   :  { %7698 = vmatpush1.bf16.msra.mxu0 %v11334_v53  ;;  %8477 = vmatpush1.bf16.msra.mxu1 %v11337_v54  ;;  %v11429_v53 = vld [vmem:[#allocation5 + $0x928] ss:$16 sps:$4 sm:$0xff]   ;;  %v11434_v54 = vld [vmem:[#allocation5 + $0x944] ss:$16 sps:$4 sm:$0xff]  }
 0x146   :  { %7699 = vmatprep.subr.bf16.mxu0 %v11342_v55  ;;  %8478 = vmatprep.subr.bf16.mxu1 %v11345_v56  ;;  %v11437_v55 = vld [vmem:[#allocation5 + $0x94c] ss:$16 sps:$4 sm:$0xff]   ;;  %v11432_v56 = vld [vmem:[#allocation5 + $0x940] ss:$16 sps:$4 sm:$0xff]  }
 0x149   :  { %7700 = vmatpush1.bf16.msra.mxu0 %v11340_v57  ;;  %8479 = vmatpush1.bf16.msra.mxu1 %v11343_v58  ;;  %v11435_v57 = vld [vmem:[#allocation5 + $0x948] ss:$16 sps:$4 sm:$0xff]   ;;  %v11440_v58 = vld [vmem:[#allocation5 + $0x964] ss:$16 sps:$4 sm:$0xff]  }
 0x14a   :  { %7701 = vmatprep.subr.bf16.mxu0 %v11348_v59  ;;  %8480 = vmatprep.subr.bf16.mxu1 %v11351_v60  ;;  %v11443_v59 = vld [vmem:[#allocation5 + $0x96c] ss:$16 sps:$4 sm:$0xff]   ;;  %v11438_v60 = vld [vmem:[#allocation5 + $0x960] ss:$16 sps:$4 sm:$0xff]  }
 0x14d   :  { %7702 = vmatpush1.bf16.msra.mxu0 %v11346_v61  ;;  %8481 = vmatpush1.bf16.msra.mxu1 %v11349_v62  ;;  %v11441_v61 = vld [vmem:[#allocation5 + $0x968] ss:$16 sps:$4 sm:$0xff]   ;;  %v11446_v62 = vld [vmem:[#allocation5 + $0x984] ss:$16 sps:$4 sm:$0xff]  }
 0x14e   :  { %7703 = vmatprep.subr.bf16.mxu0 %v11354_v63  ;;  %8482 = vmatprep.subr.bf16.mxu1 %v11357_v0  ;;  %v11449_v63 = vld [vmem:[#allocation5 + $0x98c] ss:$16 sps:$4 sm:$0xff]   ;;  %v11444_v0 = vld [vmem:[#allocation5 + $0x980] ss:$16 sps:$4 sm:$0xff]  }
 0x151   :  { %7704 = vmatpush1.bf16.msra.mxu0 %v11352_v1  ;;  %8483 = vmatpush1.bf16.msra.mxu1 %v11355_v2  ;;  %v11447_v1 = vld [vmem:[#allocation5 + $0x988] ss:$16 sps:$4 sm:$0xff]   ;;  %v11452_v2 = vld [vmem:[#allocation5 + $0x9a4] ss:$16 sps:$4 sm:$0xff]  }
 0x152   :  { %7705 = vmatprep.subr.bf16.mxu0 %v11360_v3  ;;  %8484 = vmatprep.subr.bf16.mxu1 %v11363_v4  ;;  %v11455_v3 = vld [vmem:[#allocation5 + $0x9ac] ss:$16 sps:$4 sm:$0xff]   ;;  %v11450_v4 = vld [vmem:[#allocation5 + $0x9a0] ss:$16 sps:$4 sm:$0xff]  }
 0x155   :  { %7706 = vmatpush1.bf16.msra.mxu0 %v11358_v5  ;;  %8485 = vmatpush1.bf16.msra.mxu1 %v11361_v6  ;;  %v11453_v5 = vld [vmem:[#allocation5 + $0x9a8] ss:$16 sps:$4 sm:$0xff]   ;;  %v11458_v6 = vld [vmem:[#allocation5 + $0x9c4] ss:$16 sps:$4 sm:$0xff]  }
 0x156   :  { %7707 = vmatprep.subr.bf16.mxu0 %v11366_v7  ;;  %8486 = vmatprep.subr.bf16.mxu1 %v11369_v8  ;;  %v11461_v7 = vld [vmem:[#allocation5 + $0x9cc] ss:$16 sps:$4 sm:$0xff]   ;;  %v11456_v8 = vld [vmem:[#allocation5 + $0x9c0] ss:$16 sps:$4 sm:$0xff]  }
 0x159   :  { %7708 = vmatpush1.bf16.msra.mxu0 %v11364_v9  ;;  %8487 = vmatpush1.bf16.msra.mxu1 %v11367_v10  ;;  %v11459_v9 = vld [vmem:[#allocation5 + $0x9c8] ss:$16 sps:$4 sm:$0xff]   ;;  %v11464_v10 = vld [vmem:[#allocation5 + $0x9e4] ss:$16 sps:$4 sm:$0xff]  }
 0x15a   :  { %7718 = vmatprep.subr.bf16.mxu0 %v11374_v12  ;;  %8497 = vmatprep.subr.bf16.mxu1 %v11377_v13  ;;  %v11467_v12 = vld [vmem:[#allocation5 + $0x9ec] ss:$16 sps:$4 sm:$0xff]   ;;  %v11462_v13 = vld [vmem:[#allocation5 + $0x9e0] ss:$16 sps:$4 sm:$0xff]  }
 0x15c   :  { %7710 = vmatmul.mubr.bf16.vlgmr.msra.gmra.mrb[0].mxu0 %v9497_v16  ;;  %8489 = vmatmul.mubr.bf16.vlgmr.msra.gmra.mrb[0].mxu1 %v9497_v16  ;;  %v11472_v16 = vld [vmem:[#allocation5 + $0xa04] ss:$16 sps:$4 sm:$0xff]  }
 0x15d   :  { %7719 = vmatpush1.bf16.msra.mxu0 %v11372_v15  ;;  %8498 = vmatpush1.bf16.msra.mxu1 %v11375_v18  ;;  %v11465_v15 = vld [vmem:[#allocation5 + $0x9e8] ss:$16 sps:$4 sm:$0xff]   ;;  %v11475_v18 = vld [vmem:[#allocation5 + $0xa0c] ss:$16 sps:$4 sm:$0xff]  }
 0x15e   :  { %7720 = vmatprep.subr.bf16.mxu0 %v11380_v19  ;;  %8499 = vmatprep.subr.bf16.mxu1 %v11383_v20  ;;  %v13140_v19 = vld [vmem:[#allocation2 + $0x28] sm:$0xff]  ;;  %v9499_v20 = vcombine.low %v13136_v17, %v13136_v17 }
 0x15f   :  { %7750 = vmatprep.mubr.bf16.mxu0 %v9500_v11  ;;  %8529 = vmatprep.mubr.bf16.mxu1 %v9500_v11  ;;  %v11470_v11 = vld [vmem:[#allocation5 + $0xa00] ss:$16 sps:$4 sm:$0xff]   ;;  %v11484_v17 = vld [vmem:[#allocation5 + $0xa44] ss:$16 sps:$4 sm:$0xff]  }
 0x161   :  { %7721 = vmatpush1.bf16.msra.mxu0 %v11378_v21  ;;  %8500 = vmatpush1.bf16.msra.mxu1 %v11381_v22  ;;  %v11473_v21 = vld [vmem:[#allocation5 + $0xa08] ss:$16 sps:$4 sm:$0xff]   ;;  %v11478_v22 = vld [vmem:[#allocation5 + $0xa24] ss:$16 sps:$4 sm:$0xff]  }
 0x162   :  { %7722 = vmatprep.subr.bf16.mxu0 %v11386_v14  ;;  %8501 = vmatprep.subr.bf16.mxu1 %v11389_v23  ;;  %v11481_v14 = vld [vmem:[#allocation5 + $0xa2c] ss:$16 sps:$4 sm:$0xff]   ;;  %v9502_v23 = vcombine.high %v13140_v19, %v13140_v19 }
 0x165   :  { %7723 = vmatpush1.bf16.msra.mxu0 %v11384_v24  ;;  %8502 = vmatpush1.bf16.msra.mxu1 %v11387_v25  ;;  %v11476_v24 = vld [vmem:[#allocation5 + $0xa20] ss:$16 sps:$4 sm:$0xff]   ;;  %v11479_v25 = vld [vmem:[#allocation5 + $0xa28] ss:$16 sps:$4 sm:$0xff]  }
 0x166   :  { %7724 = vmatprep.subr.bf16.mxu0 %v11392_v26  ;;  %8503 = vmatprep.subr.bf16.mxu1 %v11395_v27  ;;  %v11487_v26 = vld [vmem:[#allocation5 + $0xa4c] ss:$16 sps:$4 sm:$0xff]   ;;  %v11482_v27 = vld [vmem:[#allocation5 + $0xa40] ss:$16 sps:$4 sm:$0xff]  }
 0x169   :  { %7725 = vmatpush1.bf16.msra.mxu0 %v11390_v28  ;;  %8504 = vmatpush1.bf16.msra.mxu1 %v11393_v29  ;;  %v11485_v28 = vld [vmem:[#allocation5 + $0xa48] ss:$16 sps:$4 sm:$0xff]   ;;  %v11490_v29 = vld [vmem:[#allocation5 + $0xa64] ss:$16 sps:$4 sm:$0xff]  }
 0x16a   :  { %7726 = vmatprep.subr.bf16.mxu0 %v11398_v30  ;;  %8505 = vmatprep.subr.bf16.mxu1 %v11401_v31  ;;  %v11493_v30 = vld [vmem:[#allocation5 + $0xa6c] ss:$16 sps:$4 sm:$0xff]   ;;  %v11488_v31 = vld [vmem:[#allocation5 + $0xa60] ss:$16 sps:$4 sm:$0xff]  }
 0x16d   :  { %7727 = vmatpush1.bf16.msra.mxu0 %v11396_v32  ;;  %8506 = vmatpush1.bf16.msra.mxu1 %v11399_v33  ;;  %v11491_v32 = vld [vmem:[#allocation5 + $0xa68] ss:$16 sps:$4 sm:$0xff]   ;;  %v11496_v33 = vld [vmem:[#allocation5 + $0xa84] ss:$16 sps:$4 sm:$0xff]  }
 0x16e   :  { %7728 = vmatprep.subr.bf16.mxu0 %v11404_v34  ;;  %8507 = vmatprep.subr.bf16.mxu1 %v11407_v35  ;;  %v11499_v34 = vld [vmem:[#allocation5 + $0xa8c] ss:$16 sps:$4 sm:$0xff]   ;;  %v11494_v35 = vld [vmem:[#allocation5 + $0xa80] ss:$16 sps:$4 sm:$0xff]  }
 0x171   :  { %7729 = vmatpush1.bf16.msra.mxu0 %v11402_v36  ;;  %8508 = vmatpush1.bf16.msra.mxu1 %v11405_v37  ;;  %v11497_v36 = vld [vmem:[#allocation5 + $0xa88] ss:$16 sps:$4 sm:$0xff]   ;;  %v11502_v37 = vld [vmem:[#allocation5 + $0xaa4] ss:$16 sps:$4 sm:$0xff]  }
 0x172   :  { %7730 = vmatprep.subr.bf16.mxu0 %v11410_v38  ;;  %8509 = vmatprep.subr.bf16.mxu1 %v11413_v39  ;;  %v11505_v38 = vld [vmem:[#allocation5 + $0xaac] ss:$16 sps:$4 sm:$0xff]   ;;  %v11500_v39 = vld [vmem:[#allocation5 + $0xaa0] ss:$16 sps:$4 sm:$0xff]  }
 0x175   :  { %7731 = vmatpush1.bf16.msra.mxu0 %v11408_v40  ;;  %8510 = vmatpush1.bf16.msra.mxu1 %v11411_v41  ;;  %v11503_v40 = vld [vmem:[#allocation5 + $0xaa8] ss:$16 sps:$4 sm:$0xff]   ;;  %v11508_v41 = vld [vmem:[#allocation5 + $0xac4] ss:$16 sps:$4 sm:$0xff]  }
 0x176   :  { %7732 = vmatprep.subr.bf16.mxu0 %v11416_v42  ;;  %8511 = vmatprep.subr.bf16.mxu1 %v11419_v43  ;;  %v11511_v42 = vld [vmem:[#allocation5 + $0xacc] ss:$16 sps:$4 sm:$0xff]   ;;  %v11506_v43 = vld [vmem:[#allocation5 + $0xac0] ss:$16 sps:$4 sm:$0xff]  }
 0x179   :  { %7733 = vmatpush1.bf16.msra.mxu0 %v11414_v44  ;;  %8512 = vmatpush1.bf16.msra.mxu1 %v11417_v45  ;;  %v11509_v44 = vld [vmem:[#allocation5 + $0xac8] ss:$16 sps:$4 sm:$0xff]   ;;  %v11514_v45 = vld [vmem:[#allocation5 + $0xae4] ss:$16 sps:$4 sm:$0xff]  }
 0x17a   :  { %7734 = vmatprep.subr.bf16.mxu0 %v11422_v46  ;;  %8513 = vmatprep.subr.bf16.mxu1 %v11425_v47  ;;  %v11517_v46 = vld [vmem:[#allocation5 + $0xaec] ss:$16 sps:$4 sm:$0xff]   ;;  %v11512_v47 = vld [vmem:[#allocation5 + $0xae0] ss:$16 sps:$4 sm:$0xff]  }
 0x17d   :  { %7735 = vmatpush1.bf16.msra.mxu0 %v11420_v48  ;;  %8514 = vmatpush1.bf16.msra.mxu1 %v11423_v49  ;;  %v11515_v48 = vld [vmem:[#allocation5 + $0xae8] ss:$16 sps:$4 sm:$0xff]   ;;  %v11520_v49 = vld [vmem:[#allocation5 + $0xb04] ss:$16 sps:$4 sm:$0xff]  }
 0x17e   :  { %7736 = vmatprep.subr.bf16.mxu0 %v11428_v50  ;;  %8515 = vmatprep.subr.bf16.mxu1 %v11431_v51  ;;  %v11523_v50 = vld [vmem:[#allocation5 + $0xb0c] ss:$16 sps:$4 sm:$0xff]   ;;  %v11518_v51 = vld [vmem:[#allocation5 + $0xb00] ss:$16 sps:$4 sm:$0xff]  }
 0x181   :  { %7737 = vmatpush1.bf16.msra.mxu0 %v11426_v52  ;;  %8516 = vmatpush1.bf16.msra.mxu1 %v11429_v53  ;;  %v11521_v52 = vld [vmem:[#allocation5 + $0xb08] ss:$16 sps:$4 sm:$0xff]   ;;  %v11526_v53 = vld [vmem:[#allocation5 + $0xb24] ss:$16 sps:$4 sm:$0xff]  }
 0x182   :  { %7738 = vmatprep.subr.bf16.mxu0 %v11434_v54  ;;  %8517 = vmatprep.subr.bf16.mxu1 %v11437_v55  ;;  %v11529_v54 = vld [vmem:[#allocation5 + $0xb2c] ss:$16 sps:$4 sm:$0xff]   ;;  %v11524_v55 = vld [vmem:[#allocation5 + $0xb20] ss:$16 sps:$4 sm:$0xff]  }
 0x185   :  { %7739 = vmatpush1.bf16.msra.mxu0 %v11432_v56  ;;  %8518 = vmatpush1.bf16.msra.mxu1 %v11435_v57  ;;  %v11527_v56 = vld [vmem:[#allocation5 + $0xb28] ss:$16 sps:$4 sm:$0xff]   ;;  %v11532_v57 = vld [vmem:[#allocation5 + $0xb44] ss:$16 sps:$4 sm:$0xff]  }
 0x186   :  { %7740 = vmatprep.subr.bf16.mxu0 %v11440_v58  ;;  %8519 = vmatprep.subr.bf16.mxu1 %v11443_v59  ;;  %v11535_v58 = vld [vmem:[#allocation5 + $0xb4c] ss:$16 sps:$4 sm:$0xff]   ;;  %v11530_v59 = vld [vmem:[#allocation5 + $0xb40] ss:$16 sps:$4 sm:$0xff]  }
 0x189   :  { %7741 = vmatpush1.bf16.msra.mxu0 %v11438_v60  ;;  %8520 = vmatpush1.bf16.msra.mxu1 %v11441_v61  ;;  %v11533_v60 = vld [vmem:[#allocation5 + $0xb48] ss:$16 sps:$4 sm:$0xff]   ;;  %v11538_v61 = vld [vmem:[#allocation5 + $0xb64] ss:$16 sps:$4 sm:$0xff]  }
 0x18a   :  { %7742 = vmatprep.subr.bf16.mxu0 %v11446_v62  ;;  %8521 = vmatprep.subr.bf16.mxu1 %v11449_v63  ;;  %v11541_v62 = vld [vmem:[#allocation5 + $0xb6c] ss:$16 sps:$4 sm:$0xff]   ;;  %v11536_v63 = vld [vmem:[#allocation5 + $0xb60] ss:$16 sps:$4 sm:$0xff]  }
 0x18d   :  { %7743 = vmatpush1.bf16.msra.mxu0 %v11444_v0  ;;  %8522 = vmatpush1.bf16.msra.mxu1 %v11447_v1  ;;  %v11539_v0 = vld [vmem:[#allocation5 + $0xb68] ss:$16 sps:$4 sm:$0xff]   ;;  %v11544_v1 = vld [vmem:[#allocation5 + $0xb84] ss:$16 sps:$4 sm:$0xff]  }
 0x18e   :  { %7744 = vmatprep.subr.bf16.mxu0 %v11452_v2  ;;  %8523 = vmatprep.subr.bf16.mxu1 %v11455_v3  ;;  %v11547_v2 = vld [vmem:[#allocation5 + $0xb8c] ss:$16 sps:$4 sm:$0xff]   ;;  %v11542_v3 = vld [vmem:[#allocation5 + $0xb80] ss:$16 sps:$4 sm:$0xff]  }
 0x191   :  { %7745 = vmatpush1.bf16.msra.mxu0 %v11450_v4  ;;  %8524 = vmatpush1.bf16.msra.mxu1 %v11453_v5  ;;  %v11545_v4 = vld [vmem:[#allocation5 + $0xb88] ss:$16 sps:$4 sm:$0xff]   ;;  %v11550_v5 = vld [vmem:[#allocation5 + $0xba4] ss:$16 sps:$4 sm:$0xff]  }
 0x192   :  { %7746 = vmatprep.subr.bf16.mxu0 %v11458_v6  ;;  %8525 = vmatprep.subr.bf16.mxu1 %v11461_v7  ;;  %v11553_v6 = vld [vmem:[#allocation5 + $0xbac] ss:$16 sps:$4 sm:$0xff]   ;;  %v11548_v7 = vld [vmem:[#allocation5 + $0xba0] ss:$16 sps:$4 sm:$0xff]  }
 0x195   :  { %7747 = vmatpush1.bf16.msra.mxu0 %v11456_v8  ;;  %8526 = vmatpush1.bf16.msra.mxu1 %v11459_v9  ;;  %v11551_v8 = vld [vmem:[#allocation5 + $0xba8] ss:$16 sps:$4 sm:$0xff]   ;;  %v11556_v9 = vld [vmem:[#allocation5 + $0xbc4] ss:$16 sps:$4 sm:$0xff]  }
 0x196   :  { %7748 = vmatprep.subr.bf16.mxu0 %v11464_v10  ;;  %8527 = vmatprep.subr.bf16.mxu1 %v11467_v12  ;;  %v11559_v10 = vld [vmem:[#allocation5 + $0xbcc] ss:$16 sps:$4 sm:$0xff]   ;;  %v11554_v12 = vld [vmem:[#allocation5 + $0xbc0] ss:$16 sps:$4 sm:$0xff]  }
 0x199   :  { %7749 = vmatpush1.bf16.msra.mxu0 %v11462_v13  ;;  %8528 = vmatpush1.bf16.msra.mxu1 %v11465_v15  ;;  %v11557_v13 = vld [vmem:[#allocation5 + $0xbc8] ss:$16 sps:$4 sm:$0xff]   ;;  %v11562_v15 = vld [vmem:[#allocation5 + $0xbe4] ss:$16 sps:$4 sm:$0xff]  }
 0x19a   :  { %7759 = vmatprep.subr.bf16.mxu0 %v11472_v16  ;;  %8538 = vmatprep.subr.bf16.mxu1 %v11475_v18  ;;  %v11565_v16 = vld [vmem:[#allocation5 + $0xbec] ss:$16 sps:$4 sm:$0xff]   ;;  %v11560_v18 = vld [vmem:[#allocation5 + $0xbe0] ss:$16 sps:$4 sm:$0xff]  }
 0x19c   :  { %7751 = vmatmul.mubr.bf16.vlgmr.msra.gmra.mrb[0].mxu0 %v9499_v20  ;;  %8530 = vmatmul.mubr.bf16.vlgmr.msra.gmra.mrb[0].mxu1 %v9499_v20  ;;  %v11563_v20 = vld [vmem:[#allocation5 + $0xbe8] ss:$16 sps:$4 sm:$0xff]  }
 0x19d   :  { %7760 = vmatpush1.bf16.msra.mxu0 %v11470_v11  ;;  %8539 = vmatpush1.bf16.msra.mxu1 %v11473_v21  ;;  %v11570_v11 = vld [vmem:[#allocation5 + $0xc04] ss:$16 sps:$4 sm:$0xff]   ;;  %v11573_v21 = vld [vmem:[#allocation5 + $0xc0c] ss:$16 sps:$4 sm:$0xff]  }
 0x19e   :  { %7761 = vmatprep.subr.bf16.mxu0 %v11478_v22  ;;  %8540 = vmatprep.subr.bf16.mxu1 %v11481_v14  ;;  %v13146_v22 = vld [vmem:[#allocation2 + $0x30] sm:$0xff]  ;;  %v9501_v14 = vcombine.low %v13140_v19, %v13140_v19  ;;  %v11582_v19 = vld [vmem:[#allocation5 + $0xc44] ss:$16 sps:$4 sm:$0xff]  }
 0x19f   :  { %7791 = vmatprep.mubr.bf16.mxu0 %v9502_v23  ;;  %8570 = vmatprep.mubr.bf16.mxu1 %v9502_v23  ;;  %v11568_v23 = vld [vmem:[#allocation5 + $0xc00] ss:$16 sps:$4 sm:$0xff]  }
 0x1a1   :  { %7762 = vmatpush1.bf16.msra.mxu0 %v11476_v24  ;;  %8541 = vmatpush1.bf16.msra.mxu1 %v11479_v25  ;;  %v11571_v24 = vld [vmem:[#allocation5 + $0xc08] ss:$16 sps:$4 sm:$0xff]   ;;  %v11576_v25 = vld [vmem:[#allocation5 + $0xc24] ss:$16 sps:$4 sm:$0xff]  }
 0x1a2   :  { %7763 = vmatprep.subr.bf16.mxu0 %v11484_v17  ;;  %8542 = vmatprep.subr.bf16.mxu1 %v11487_v26  ;;  %v11579_v17 = vld [vmem:[#allocation5 + $0xc2c] ss:$16 sps:$4 sm:$0xff]   ;;  %v9504_v26 = vcombine.high %v13146_v22, %v13146_v22 }
 0x1a5   :  { %7764 = vmatpush1.bf16.msra.mxu0 %v11482_v27  ;;  %8543 = vmatpush1.bf16.msra.mxu1 %v11485_v28  ;;  %v11574_v27 = vld [vmem:[#allocation5 + $0xc20] ss:$16 sps:$4 sm:$0xff]   ;;  %v11577_v28 = vld [vmem:[#allocation5 + $0xc28] ss:$16 sps:$4 sm:$0xff]  }
 0x1a6   :  { %7765 = vmatprep.subr.bf16.mxu0 %v11490_v29  ;;  %8544 = vmatprep.subr.bf16.mxu1 %v11493_v30  ;;  %v11585_v29 = vld [vmem:[#allocation5 + $0xc4c] ss:$16 sps:$4 sm:$0xff]   ;;  %v11580_v30 = vld [vmem:[#allocation5 + $0xc40] ss:$16 sps:$4 sm:$0xff]  }
 0x1a9   :  { %7766 = vmatpush1.bf16.msra.mxu0 %v11488_v31  ;;  %8545 = vmatpush1.bf16.msra.mxu1 %v11491_v32  ;;  %v11583_v31 = vld [vmem:[#allocation5 + $0xc48] ss:$16 sps:$4 sm:$0xff]   ;;  %v11588_v32 = vld [vmem:[#allocation5 + $0xc64] ss:$16 sps:$4 sm:$0xff]  }
 0x1aa   :  { %7767 = vmatprep.subr.bf16.mxu0 %v11496_v33  ;;  %8546 = vmatprep.subr.bf16.mxu1 %v11499_v34  ;;  %v11591_v33 = vld [vmem:[#allocation5 + $0xc6c] ss:$16 sps:$4 sm:$0xff]   ;;  %v11586_v34 = vld [vmem:[#allocation5 + $0xc60] ss:$16 sps:$4 sm:$0xff]  }
 0x1ad   :  { %7768 = vmatpush1.bf16.msra.mxu0 %v11494_v35  ;;  %8547 = vmatpush1.bf16.msra.mxu1 %v11497_v36  ;;  %v11589_v35 = vld [vmem:[#allocation5 + $0xc68] ss:$16 sps:$4 sm:$0xff]   ;;  %v11594_v36 = vld [vmem:[#allocation5 + $0xc84] ss:$16 sps:$4 sm:$0xff]  }
 0x1ae   :  { %7769 = vmatprep.subr.bf16.mxu0 %v11502_v37  ;;  %8548 = vmatprep.subr.bf16.mxu1 %v11505_v38  ;;  %v11597_v37 = vld [vmem:[#allocation5 + $0xc8c] ss:$16 sps:$4 sm:$0xff]   ;;  %v11592_v38 = vld [vmem:[#allocation5 + $0xc80] ss:$16 sps:$4 sm:$0xff]  }
 0x1b1   :  { %7770 = vmatpush1.bf16.msra.mxu0 %v11500_v39  ;;  %8549 = vmatpush1.bf16.msra.mxu1 %v11503_v40  ;;  %v11595_v39 = vld [vmem:[#allocation5 + $0xc88] ss:$16 sps:$4 sm:$0xff]   ;;  %v11600_v40 = vld [vmem:[#allocation5 + $0xca4] ss:$16 sps:$4 sm:$0xff]  }
 0x1b2   :  { %7771 = vmatprep.subr.bf16.mxu0 %v11508_v41  ;;  %8550 = vmatprep.subr.bf16.mxu1 %v11511_v42  ;;  %v11603_v41 = vld [vmem:[#allocation5 + $0xcac] ss:$16 sps:$4 sm:$0xff]   ;;  %v11598_v42 = vld [vmem:[#allocation5 + $0xca0] ss:$16 sps:$4 sm:$0xff]  }
 0x1b5   :  { %7772 = vmatpush1.bf16.msra.mxu0 %v11506_v43  ;;  %8551 = vmatpush1.bf16.msra.mxu1 %v11509_v44  ;;  %v11601_v43 = vld [vmem:[#allocation5 + $0xca8] ss:$16 sps:$4 sm:$0xff]   ;;  %v11606_v44 = vld [vmem:[#allocation5 + $0xcc4] ss:$16 sps:$4 sm:$0xff]  }
 0x1b6   :  { %7773 = vmatprep.subr.bf16.mxu0 %v11514_v45  ;;  %8552 = vmatprep.subr.bf16.mxu1 %v11517_v46  ;;  %v11609_v45 = vld [vmem:[#allocation5 + $0xccc] ss:$16 sps:$4 sm:$0xff]   ;;  %v11604_v46 = vld [vmem:[#allocation5 + $0xcc0] ss:$16 sps:$4 sm:$0xff]  }
 0x1b9   :  { %7774 = vmatpush1.bf16.msra.mxu0 %v11512_v47  ;;  %8553 = vmatpush1.bf16.msra.mxu1 %v11515_v48  ;;  %v11607_v47 = vld [vmem:[#allocation5 + $0xcc8] ss:$16 sps:$4 sm:$0xff]   ;;  %v11612_v48 = vld [vmem:[#allocation5 + $0xce4] ss:$16 sps:$4 sm:$0xff]  }
 0x1ba   :  { %7775 = vmatprep.subr.bf16.mxu0 %v11520_v49  ;;  %8554 = vmatprep.subr.bf16.mxu1 %v11523_v50  ;;  %v11615_v49 = vld [vmem:[#allocation5 + $0xcec] ss:$16 sps:$4 sm:$0xff]   ;;  %v11610_v50 = vld [vmem:[#allocation5 + $0xce0] ss:$16 sps:$4 sm:$0xff]  }
 0x1bd   :  { %7776 = vmatpush1.bf16.msra.mxu0 %v11518_v51  ;;  %8555 = vmatpush1.bf16.msra.mxu1 %v11521_v52  ;;  %v11613_v51 = vld [vmem:[#allocation5 + $0xce8] ss:$16 sps:$4 sm:$0xff]   ;;  %v11618_v52 = vld [vmem:[#allocation5 + $0xd04] ss:$16 sps:$4 sm:$0xff]  }
 0x1be   :  { %7777 = vmatprep.subr.bf16.mxu0 %v11526_v53  ;;  %8556 = vmatprep.subr.bf16.mxu1 %v11529_v54  ;;  %v11621_v53 = vld [vmem:[#allocation5 + $0xd0c] ss:$16 sps:$4 sm:$0xff]   ;;  %v11616_v54 = vld [vmem:[#allocation5 + $0xd00] ss:$16 sps:$4 sm:$0xff]  }
 0x1c1   :  { %7778 = vmatpush1.bf16.msra.mxu0 %v11524_v55  ;;  %8557 = vmatpush1.bf16.msra.mxu1 %v11527_v56  ;;  %v11619_v55 = vld [vmem:[#allocation5 + $0xd08] ss:$16 sps:$4 sm:$0xff]   ;;  %v11624_v56 = vld [vmem:[#allocation5 + $0xd24] ss:$16 sps:$4 sm:$0xff]  }
 0x1c2   :  { %7779 = vmatprep.subr.bf16.mxu0 %v11532_v57  ;;  %8558 = vmatprep.subr.bf16.mxu1 %v11535_v58  ;;  %v11627_v57 = vld [vmem:[#allocation5 + $0xd2c] ss:$16 sps:$4 sm:$0xff]   ;;  %v11622_v58 = vld [vmem:[#allocation5 + $0xd20] ss:$16 sps:$4 sm:$0xff]  }
 0x1c5   :  { %7780 = vmatpush1.bf16.msra.mxu0 %v11530_v59  ;;  %8559 = vmatpush1.bf16.msra.mxu1 %v11533_v60  ;;  %v11625_v59 = vld [vmem:[#allocation5 + $0xd28] ss:$16 sps:$4 sm:$0xff]   ;;  %v11630_v60 = vld [vmem:[#allocation5 + $0xd44] ss:$16 sps:$4 sm:$0xff]  }
 0x1c6   :  { %7781 = vmatprep.subr.bf16.mxu0 %v11538_v61  ;;  %8560 = vmatprep.subr.bf16.mxu1 %v11541_v62  ;;  %v11633_v61 = vld [vmem:[#allocation5 + $0xd4c] ss:$16 sps:$4 sm:$0xff]   ;;  %v11628_v62 = vld [vmem:[#allocation5 + $0xd40] ss:$16 sps:$4 sm:$0xff]  }
 0x1c9   :  { %7782 = vmatpush1.bf16.msra.mxu0 %v11536_v63  ;;  %8561 = vmatpush1.bf16.msra.mxu1 %v11539_v0  ;;  %v11631_v63 = vld [vmem:[#allocation5 + $0xd48] ss:$16 sps:$4 sm:$0xff]   ;;  %v11636_v0 = vld [vmem:[#allocation5 + $0xd64] ss:$16 sps:$4 sm:$0xff]  }
 0x1ca   :  { %7783 = vmatprep.subr.bf16.mxu0 %v11544_v1  ;;  %8562 = vmatprep.subr.bf16.mxu1 %v11547_v2  ;;  %v11639_v1 = vld [vmem:[#allocation5 + $0xd6c] ss:$16 sps:$4 sm:$0xff]   ;;  %v11634_v2 = vld [vmem:[#allocation5 + $0xd60] ss:$16 sps:$4 sm:$0xff]  }
 0x1cd   :  { %7784 = vmatpush1.bf16.msra.mxu0 %v11542_v3  ;;  %8563 = vmatpush1.bf16.msra.mxu1 %v11545_v4  ;;  %v11637_v3 = vld [vmem:[#allocation5 + $0xd68] ss:$16 sps:$4 sm:$0xff]   ;;  %v11642_v4 = vld [vmem:[#allocation5 + $0xd84] ss:$16 sps:$4 sm:$0xff]  }
 0x1ce   :  { %7785 = vmatprep.subr.bf16.mxu0 %v11550_v5  ;;  %8564 = vmatprep.subr.bf16.mxu1 %v11553_v6  ;;  %v11645_v5 = vld [vmem:[#allocation5 + $0xd8c] ss:$16 sps:$4 sm:$0xff]   ;;  %v11640_v6 = vld [vmem:[#allocation5 + $0xd80] ss:$16 sps:$4 sm:$0xff]  }
 0x1d1   :  { %7786 = vmatpush1.bf16.msra.mxu0 %v11548_v7  ;;  %8565 = vmatpush1.bf16.msra.mxu1 %v11551_v8  ;;  %v11643_v7 = vld [vmem:[#allocation5 + $0xd88] ss:$16 sps:$4 sm:$0xff]   ;;  %v11648_v8 = vld [vmem:[#allocation5 + $0xda4] ss:$16 sps:$4 sm:$0xff]  }
 0x1d2   :  { %7787 = vmatprep.subr.bf16.mxu0 %v11556_v9  ;;  %8566 = vmatprep.subr.bf16.mxu1 %v11559_v10  ;;  %v11651_v9 = vld [vmem:[#allocation5 + $0xdac] ss:$16 sps:$4 sm:$0xff]   ;;  %v11646_v10 = vld [vmem:[#allocation5 + $0xda0] ss:$16 sps:$4 sm:$0xff]  }
 0x1d5   :  { %7788 = vmatpush1.bf16.msra.mxu0 %v11554_v12  ;;  %8567 = vmatpush1.bf16.msra.mxu1 %v11557_v13  ;;  %v11649_v12 = vld [vmem:[#allocation5 + $0xda8] ss:$16 sps:$4 sm:$0xff]   ;;  %v11654_v13 = vld [vmem:[#allocation5 + $0xdc4] ss:$16 sps:$4 sm:$0xff]  }
 0x1d6   :  { %7789 = vmatprep.subr.bf16.mxu0 %v11562_v15  ;;  %8568 = vmatprep.subr.bf16.mxu1 %v11565_v16  ;;  %v11657_v15 = vld [vmem:[#allocation5 + $0xdcc] ss:$16 sps:$4 sm:$0xff]   ;;  %v11652_v16 = vld [vmem:[#allocation5 + $0xdc0] ss:$16 sps:$4 sm:$0xff]  }
 0x1d9   :  { %7790 = vmatpush1.bf16.msra.mxu0 %v11560_v18  ;;  %8569 = vmatpush1.bf16.msra.mxu1 %v11563_v20  ;;  %v11655_v18 = vld [vmem:[#allocation5 + $0xdc8] ss:$16 sps:$4 sm:$0xff]   ;;  %v11660_v20 = vld [vmem:[#allocation5 + $0xde4] ss:$16 sps:$4 sm:$0xff]  }
 0x1da   :  { %7800 = vmatprep.subr.bf16.mxu0 %v11570_v11  ;;  %8579 = vmatprep.subr.bf16.mxu1 %v11573_v21  ;;  %v11663_v11 = vld [vmem:[#allocation5 + $0xdec] ss:$16 sps:$4 sm:$0xff]   ;;  %v11658_v21 = vld [vmem:[#allocation5 + $0xde0] ss:$16 sps:$4 sm:$0xff]  }
 0x1dc   :  { %7792 = vmatmul.mubr.bf16.vlgmr.msra.gmra.mrb[0].mxu0 %v9501_v14  ;;  %8571 = vmatmul.mubr.bf16.vlgmr.msra.gmra.mrb[0].mxu1 %v9501_v14  ;;  %v11661_v14 = vld [vmem:[#allocation5 + $0xde8] ss:$16 sps:$4 sm:$0xff]  }
 0x1dd   :  { %7801 = vmatpush1.bf16.msra.mxu0 %v11568_v23  ;;  %8580 = vmatpush1.bf16.msra.mxu1 %v11571_v24  ;;  %v11668_v23 = vld [vmem:[#allocation5 + $0xe04] ss:$16 sps:$4 sm:$0xff]   ;;  %v11671_v24 = vld [vmem:[#allocation5 + $0xe0c] ss:$16 sps:$4 sm:$0xff]  }
 0x1de   :  { %7802 = vmatprep.subr.bf16.mxu0 %v11576_v25  ;;  %8581 = vmatprep.subr.bf16.mxu1 %v11579_v17  ;;  %v13152_v25 = vld [vmem:[#allocation2 + $0x38] sm:$0xff]  ;;  %v9503_v17 = vcombine.low %v13146_v22, %v13146_v22 }
 0x1df   :  { %7832 = vmatprep.mubr.bf16.mxu0 %v9504_v26  ;;  %8611 = vmatprep.mubr.bf16.mxu1 %v9504_v26  ;;  %v11666_v26 = vld [vmem:[#allocation5 + $0xe00] ss:$16 sps:$4 sm:$0xff]   ;;  %v11680_v22 = vld [vmem:[#allocation5 + $0xe44] ss:$16 sps:$4 sm:$0xff]  }
 0x1e1   :  { %7803 = vmatpush1.bf16.msra.mxu0 %v11574_v27  ;;  %8582 = vmatpush1.bf16.msra.mxu1 %v11577_v28  ;;  %v11669_v27 = vld [vmem:[#allocation5 + $0xe08] ss:$16 sps:$4 sm:$0xff]   ;;  %v11674_v28 = vld [vmem:[#allocation5 + $0xe24] ss:$16 sps:$4 sm:$0xff]  }
 0x1e2   :  { %7804 = vmatprep.subr.bf16.mxu0 %v11582_v19  ;;  %8583 = vmatprep.subr.bf16.mxu1 %v11585_v29  ;;  %v11677_v19 = vld [vmem:[#allocation5 + $0xe2c] ss:$16 sps:$4 sm:$0xff]   ;;  %v9506_v29 = vcombine.high %v13152_v25, %v13152_v25 }
 0x1e5   :  { %7805 = vmatpush1.bf16.msra.mxu0 %v11580_v30  ;;  %8584 = vmatpush1.bf16.msra.mxu1 %v11583_v31  ;;  %v11672_v30 = vld [vmem:[#allocation5 + $0xe20] ss:$16 sps:$4 sm:$0xff]   ;;  %v11675_v31 = vld [vmem:[#allocation5 + $0xe28] ss:$16 sps:$4 sm:$0xff]  }
 0x1e6   :  { %7806 = vmatprep.subr.bf16.mxu0 %v11588_v32  ;;  %8585 = vmatprep.subr.bf16.mxu1 %v11591_v33  ;;  %v11683_v32 = vld [vmem:[#allocation5 + $0xe4c] ss:$16 sps:$4 sm:$0xff]   ;;  %v11678_v33 = vld [vmem:[#allocation5 + $0xe40] ss:$16 sps:$4 sm:$0xff]  }
 0x1e9   :  { %7807 = vmatpush1.bf16.msra.mxu0 %v11586_v34  ;;  %8586 = vmatpush1.bf16.msra.mxu1 %v11589_v35  ;;  %v11681_v34 = vld [vmem:[#allocation5 + $0xe48] ss:$16 sps:$4 sm:$0xff]   ;;  %v11686_v35 = vld [vmem:[#allocation5 + $0xe64] ss:$16 sps:$4 sm:$0xff]  }
 0x1ea   :  { %7808 = vmatprep.subr.bf16.mxu0 %v11594_v36  ;;  %8587 = vmatprep.subr.bf16.mxu1 %v11597_v37  ;;  %v11689_v36 = vld [vmem:[#allocation5 + $0xe6c] ss:$16 sps:$4 sm:$0xff]   ;;  %v11684_v37 = vld [vmem:[#allocation5 + $0xe60] ss:$16 sps:$4 sm:$0xff]  }
 0x1ed   :  { %7809 = vmatpush1.bf16.msra.mxu0 %v11592_v38  ;;  %8588 = vmatpush1.bf16.msra.mxu1 %v11595_v39  ;;  %v11687_v38 = vld [vmem:[#allocation5 + $0xe68] ss:$16 sps:$4 sm:$0xff]   ;;  %v11692_v39 = vld [vmem:[#allocation5 + $0xe84] ss:$16 sps:$4 sm:$0xff]  }
 0x1ee   :  { %7810 = vmatprep.subr.bf16.mxu0 %v11600_v40  ;;  %8589 = vmatprep.subr.bf16.mxu1 %v11603_v41  ;;  %v11695_v40 = vld [vmem:[#allocation5 + $0xe8c] ss:$16 sps:$4 sm:$0xff]   ;;  %v11690_v41 = vld [vmem:[#allocation5 + $0xe80] ss:$16 sps:$4 sm:$0xff]  }
 0x1f1   :  { %7811 = vmatpush1.bf16.msra.mxu0 %v11598_v42  ;;  %8590 = vmatpush1.bf16.msra.mxu1 %v11601_v43  ;;  %v11693_v42 = vld [vmem:[#allocation5 + $0xe88] ss:$16 sps:$4 sm:$0xff]   ;;  %v11698_v43 = vld [vmem:[#allocation5 + $0xea4] ss:$16 sps:$4 sm:$0xff]  }
 0x1f2   :  { %7812 = vmatprep.subr.bf16.mxu0 %v11606_v44  ;;  %8591 = vmatprep.subr.bf16.mxu1 %v11609_v45  ;;  %v11701_v44 = vld [vmem:[#allocation5 + $0xeac] ss:$16 sps:$4 sm:$0xff]   ;;  %v11696_v45 = vld [vmem:[#allocation5 + $0xea0] ss:$16 sps:$4 sm:$0xff]  }
 0x1f5   :  { %7813 = vmatpush1.bf16.msra.mxu0 %v11604_v46  ;;  %8592 = vmatpush1.bf16.msra.mxu1 %v11607_v47  ;;  %v11699_v46 = vld [vmem:[#allocation5 + $0xea8] ss:$16 sps:$4 sm:$0xff]   ;;  %v11704_v47 = vld [vmem:[#allocation5 + $0xec4] ss:$16 sps:$4 sm:$0xff]  }
 0x1f6   :  { %7814 = vmatprep.subr.bf16.mxu0 %v11612_v48  ;;  %8593 = vmatprep.subr.bf16.mxu1 %v11615_v49  ;;  %v11707_v48 = vld [vmem:[#allocation5 + $0xecc] ss:$16 sps:$4 sm:$0xff]   ;;  %v11702_v49 = vld [vmem:[#allocation5 + $0xec0] ss:$16 sps:$4 sm:$0xff]  }
 0x1f9   :  { %7815 = vmatpush1.bf16.msra.mxu0 %v11610_v50  ;;  %8594 = vmatpush1.bf16.msra.mxu1 %v11613_v51  ;;  %v11705_v50 = vld [vmem:[#allocation5 + $0xec8] ss:$16 sps:$4 sm:$0xff]   ;;  %v11710_v51 = vld [vmem:[#allocation5 + $0xee4] ss:$16 sps:$4 sm:$0xff]  }
 0x1fa   :  { %7816 = vmatprep.subr.bf16.mxu0 %v11618_v52  ;;  %8595 = vmatprep.subr.bf16.mxu1 %v11621_v53  ;;  %v11713_v52 = vld [vmem:[#allocation5 + $0xeec] ss:$16 sps:$4 sm:$0xff]   ;;  %v11708_v53 = vld [vmem:[#allocation5 + $0xee0] ss:$16 sps:$4 sm:$0xff]  }
 0x1fd   :  { %7817 = vmatpush1.bf16.msra.mxu0 %v11616_v54  ;;  %8596 = vmatpush1.bf16.msra.mxu1 %v11619_v55  ;;  %v11711_v54 = vld [vmem:[#allocation5 + $0xee8] ss:$16 sps:$4 sm:$0xff]   ;;  %v11716_v55 = vld [vmem:[#allocation5 + $0xf04] ss:$16 sps:$4 sm:$0xff]  }
 0x1fe   :  { %7818 = vmatprep.subr.bf16.mxu0 %v11624_v56  ;;  %8597 = vmatprep.subr.bf16.mxu1 %v11627_v57  ;;  %v11719_v56 = vld [vmem:[#allocation5 + $0xf0c] ss:$16 sps:$4 sm:$0xff]   ;;  %v11714_v57 = vld [vmem:[#allocation5 + $0xf00] ss:$16 sps:$4 sm:$0xff]  }
 0x201   :  { %7819 = vmatpush1.bf16.msra.mxu0 %v11622_v58  ;;  %8598 = vmatpush1.bf16.msra.mxu1 %v11625_v59  ;;  %v11717_v58 = vld [vmem:[#allocation5 + $0xf08] ss:$16 sps:$4 sm:$0xff]   ;;  %v11722_v59 = vld [vmem:[#allocation5 + $0xf24] ss:$16 sps:$4 sm:$0xff]  }
 0x202   :  { %7820 = vmatprep.subr.bf16.mxu0 %v11630_v60  ;;  %8599 = vmatprep.subr.bf16.mxu1 %v11633_v61  ;;  %v11725_v60 = vld [vmem:[#allocation5 + $0xf2c] ss:$16 sps:$4 sm:$0xff]   ;;  %v11720_v61 = vld [vmem:[#allocation5 + $0xf20] ss:$16 sps:$4 sm:$0xff]  }
 0x205   :  { %7821 = vmatpush1.bf16.msra.mxu0 %v11628_v62  ;;  %8600 = vmatpush1.bf16.msra.mxu1 %v11631_v63  ;;  %v11723_v62 = vld [vmem:[#allocation5 + $0xf28] ss:$16 sps:$4 sm:$0xff]   ;;  %v11728_v63 = vld [vmem:[#allocation5 + $0xf44] ss:$16 sps:$4 sm:$0xff]  }
 0x206   :  { %7822 = vmatprep.subr.bf16.mxu0 %v11636_v0  ;;  %8601 = vmatprep.subr.bf16.mxu1 %v11639_v1  ;;  %v11731_v0 = vld [vmem:[#allocation5 + $0xf4c] ss:$16 sps:$4 sm:$0xff]   ;;  %v11726_v1 = vld [vmem:[#allocation5 + $0xf40] ss:$16 sps:$4 sm:$0xff]  }
 0x209   :  { %7823 = vmatpush1.bf16.msra.mxu0 %v11634_v2  ;;  %8602 = vmatpush1.bf16.msra.mxu1 %v11637_v3  ;;  %v11729_v2 = vld [vmem:[#allocation5 + $0xf48] ss:$16 sps:$4 sm:$0xff]   ;;  %v11734_v3 = vld [vmem:[#allocation5 + $0xf64] ss:$16 sps:$4 sm:$0xff]  }
 0x20a   :  { %7824 = vmatprep.subr.bf16.mxu0 %v11642_v4  ;;  %8603 = vmatprep.subr.bf16.mxu1 %v11645_v5  ;;  %v11737_v4 = vld [vmem:[#allocation5 + $0xf6c] ss:$16 sps:$4 sm:$0xff]   ;;  %v11732_v5 = vld [vmem:[#allocation5 + $0xf60] ss:$16 sps:$4 sm:$0xff]  }
 0x20d   :  { %7825 = vmatpush1.bf16.msra.mxu0 %v11640_v6  ;;  %8604 = vmatpush1.bf16.msra.mxu1 %v11643_v7  ;;  %v11735_v6 = vld [vmem:[#allocation5 + $0xf68] ss:$16 sps:$4 sm:$0xff]   ;;  %v11740_v7 = vld [vmem:[#allocation5 + $0xf84] ss:$16 sps:$4 sm:$0xff]  }
 0x20e   :  { %7826 = vmatprep.subr.bf16.mxu0 %v11648_v8  ;;  %8605 = vmatprep.subr.bf16.mxu1 %v11651_v9  ;;  %v11743_v8 = vld [vmem:[#allocation5 + $0xf8c] ss:$16 sps:$4 sm:$0xff]   ;;  %v11738_v9 = vld [vmem:[#allocation5 + $0xf80] ss:$16 sps:$4 sm:$0xff]  }
 0x211   :  { %7827 = vmatpush1.bf16.msra.mxu0 %v11646_v10  ;;  %8606 = vmatpush1.bf16.msra.mxu1 %v11649_v12  ;;  %v11741_v10 = vld [vmem:[#allocation5 + $0xf88] ss:$16 sps:$4 sm:$0xff]   ;;  %v11746_v12 = vld [vmem:[#allocation5 + $0xfa4] ss:$16 sps:$4 sm:$0xff]  }
 0x212   :  { %7828 = vmatprep.subr.bf16.mxu0 %v11654_v13  ;;  %8607 = vmatprep.subr.bf16.mxu1 %v11657_v15  ;;  %v11749_v13 = vld [vmem:[#allocation5 + $0xfac] ss:$16 sps:$4 sm:$0xff]   ;;  %v11744_v15 = vld [vmem:[#allocation5 + $0xfa0] ss:$16 sps:$4 sm:$0xff]  }
 0x215   :  { %7829 = vmatpush1.bf16.msra.mxu0 %v11652_v16  ;;  %8608 = vmatpush1.bf16.msra.mxu1 %v11655_v18  ;;  %v11747_v16 = vld [vmem:[#allocation5 + $0xfa8] ss:$16 sps:$4 sm:$0xff]   ;;  %v11752_v18 = vld [vmem:[#allocation5 + $0xfc4] ss:$16 sps:$4 sm:$0xff]  }
 0x216   :  { %7830 = vmatprep.subr.bf16.mxu0 %v11660_v20  ;;  %8609 = vmatprep.subr.bf16.mxu1 %v11663_v11  ;;  %v11755_v20 = vld [vmem:[#allocation5 + $0xfcc] ss:$16 sps:$4 sm:$0xff]   ;;  %v11750_v11 = vld [vmem:[#allocation5 + $0xfc0] ss:$16 sps:$4 sm:$0xff]  }
 0x219   :  { %7831 = vmatpush1.bf16.msra.mxu0 %v11658_v21  ;;  %8610 = vmatpush1.bf16.msra.mxu1 %v11661_v14  ;;  %v11753_v21 = vld [vmem:[#allocation5 + $0xfc8] ss:$16 sps:$4 sm:$0xff]   ;;  %v11758_v14 = vld [vmem:[#allocation5 + $0xfe4] ss:$16 sps:$4 sm:$0xff]  }
 0x21a   :  { %7841 = vmatprep.subr.bf16.mxu0 %v11668_v23  ;;  %8620 = vmatprep.subr.bf16.mxu1 %v11671_v24  ;;  %v11761_v23 = vld [vmem:[#allocation5 + $0xfec] ss:$16 sps:$4 sm:$0xff]   ;;  %v11756_v24 = vld [vmem:[#allocation5 + $0xfe0] ss:$16 sps:$4 sm:$0xff]  }
 0x21c   :  { %7833 = vmatmul.mubr.bf16.vlgmr.msra.gmra.mrb[0].mxu0 %v9503_v17  ;;  %8612 = vmatmul.mubr.bf16.vlgmr.msra.gmra.mrb[0].mxu1 %v9503_v17  ;;  %v11759_v17 = vld [vmem:[#allocation5 + $0xfe8] ss:$16 sps:$4 sm:$0xff]  }
 0x21d   :  { %7842 = vmatpush1.bf16.msra.mxu0 %v11666_v26  ;;  %8621 = vmatpush1.bf16.msra.mxu1 %v11669_v27  ;;  %v11766_v26 = vld [vmem:[#allocation5 + $0x1004] ss:$16 sps:$4 sm:$0xff]   ;;  %v11769_v27 = vld [vmem:[#allocation5 + $0x100c] ss:$16 sps:$4 sm:$0xff]  }
 0x21e   :  { %7843 = vmatprep.subr.bf16.mxu0 %v11674_v28  ;;  %8622 = vmatprep.subr.bf16.mxu1 %v11677_v19  ;;  %v13158_v28 = vld [vmem:[#allocation2 + $0x40] sm:$0xff]  ;;  %v9505_v19 = vcombine.low %v13152_v25, %v13152_v25  ;;  %v11778_v25 = vld [vmem:[#allocation5 + $0x1044] ss:$16 sps:$4 sm:$0xff]  }
 0x21f   :  { %7873 = vmatprep.mubr.bf16.mxu0 %v9506_v29  ;;  %8652 = vmatprep.mubr.bf16.mxu1 %v9506_v29  ;;  %v11764_v29 = vld [vmem:[#allocation5 + $0x1000] ss:$16 sps:$4 sm:$0xff]  }
 0x221   :  { %7844 = vmatpush1.bf16.msra.mxu0 %v11672_v30  ;;  %8623 = vmatpush1.bf16.msra.mxu1 %v11675_v31  ;;  %v11767_v30 = vld [vmem:[#allocation5 + $0x1008] ss:$16 sps:$4 sm:$0xff]   ;;  %v11772_v31 = vld [vmem:[#allocation5 + $0x1024] ss:$16 sps:$4 sm:$0xff]  }
 0x222   :  { %7845 = vmatprep.subr.bf16.mxu0 %v11680_v22  ;;  %8624 = vmatprep.subr.bf16.mxu1 %v11683_v32  ;;  %v11775_v22 = vld [vmem:[#allocation5 + $0x102c] ss:$16 sps:$4 sm:$0xff]   ;;  %v9508_v32 = vcombine.high %v13158_v28, %v13158_v28 }
 0x225   :  { %7846 = vmatpush1.bf16.msra.mxu0 %v11678_v33  ;;  %8625 = vmatpush1.bf16.msra.mxu1 %v11681_v34  ;;  %v11770_v33 = vld [vmem:[#allocation5 + $0x1020] ss:$16 sps:$4 sm:$0xff]   ;;  %v11773_v34 = vld [vmem:[#allocation5 + $0x1028] ss:$16 sps:$4 sm:$0xff]  }
 0x226   :  { %7847 = vmatprep.subr.bf16.mxu0 %v11686_v35  ;;  %8626 = vmatprep.subr.bf16.mxu1 %v11689_v36  ;;  %v11781_v35 = vld [vmem:[#allocation5 + $0x104c] ss:$16 sps:$4 sm:$0xff]   ;;  %v11776_v36 = vld [vmem:[#allocation5 + $0x1040] ss:$16 sps:$4 sm:$0xff]  }
 0x229   :  { %7848 = vmatpush1.bf16.msra.mxu0 %v11684_v37  ;;  %8627 = vmatpush1.bf16.msra.mxu1 %v11687_v38  ;;  %v11779_v37 = vld [vmem:[#allocation5 + $0x1048] ss:$16 sps:$4 sm:$0xff]   ;;  %v11784_v38 = vld [vmem:[#allocation5 + $0x1064] ss:$16 sps:$4 sm:$0xff]  }
 0x22a   :  { %7849 = vmatprep.subr.bf16.mxu0 %v11692_v39  ;;  %8628 = vmatprep.subr.bf16.mxu1 %v11695_v40  ;;  %v11787_v39 = vld [vmem:[#allocation5 + $0x106c] ss:$16 sps:$4 sm:$0xff]   ;;  %v11782_v40 = vld [vmem:[#allocation5 + $0x1060] ss:$16 sps:$4 sm:$0xff]  }
 0x22d   :  { %7850 = vmatpush1.bf16.msra.mxu0 %v11690_v41  ;;  %8629 = vmatpush1.bf16.msra.mxu1 %v11693_v42  ;;  %v11785_v41 = vld [vmem:[#allocation5 + $0x1068] ss:$16 sps:$4 sm:$0xff]   ;;  %v11790_v42 = vld [vmem:[#allocation5 + $0x1084] ss:$16 sps:$4 sm:$0xff]  }
 0x22e   :  { %7851 = vmatprep.subr.bf16.mxu0 %v11698_v43  ;;  %8630 = vmatprep.subr.bf16.mxu1 %v11701_v44  ;;  %v11793_v43 = vld [vmem:[#allocation5 + $0x108c] ss:$16 sps:$4 sm:$0xff]   ;;  %v11788_v44 = vld [vmem:[#allocation5 + $0x1080] ss:$16 sps:$4 sm:$0xff]  }
 0x231   :  { %7852 = vmatpush1.bf16.msra.mxu0 %v11696_v45  ;;  %8631 = vmatpush1.bf16.msra.mxu1 %v11699_v46  ;;  %v11791_v45 = vld [vmem:[#allocation5 + $0x1088] ss:$16 sps:$4 sm:$0xff]   ;;  %v11796_v46 = vld [vmem:[#allocation5 + $0x10a4] ss:$16 sps:$4 sm:$0xff]  }
 0x232   :  { %7853 = vmatprep.subr.bf16.mxu0 %v11704_v47  ;;  %8632 = vmatprep.subr.bf16.mxu1 %v11707_v48  ;;  %v11799_v47 = vld [vmem:[#allocation5 + $0x10ac] ss:$16 sps:$4 sm:$0xff]   ;;  %v11794_v48 = vld [vmem:[#allocation5 + $0x10a0] ss:$16 sps:$4 sm:$0xff]  }
 0x235   :  { %7854 = vmatpush1.bf16.msra.mxu0 %v11702_v49  ;;  %8633 = vmatpush1.bf16.msra.mxu1 %v11705_v50  ;;  %v11797_v49 = vld [vmem:[#allocation5 + $0x10a8] ss:$16 sps:$4 sm:$0xff]   ;;  %v11802_v50 = vld [vmem:[#allocation5 + $0x10c4] ss:$16 sps:$4 sm:$0xff]  }
 0x236   :  { %7855 = vmatprep.subr.bf16.mxu0 %v11710_v51  ;;  %8634 = vmatprep.subr.bf16.mxu1 %v11713_v52  ;;  %v11805_v51 = vld [vmem:[#allocation5 + $0x10cc] ss:$16 sps:$4 sm:$0xff]   ;;  %v11800_v52 = vld [vmem:[#allocation5 + $0x10c0] ss:$16 sps:$4 sm:$0xff]  }
 0x239   :  { %7856 = vmatpush1.bf16.msra.mxu0 %v11708_v53  ;;  %8635 = vmatpush1.bf16.msra.mxu1 %v11711_v54  ;;  %v11803_v53 = vld [vmem:[#allocation5 + $0x10c8] ss:$16 sps:$4 sm:$0xff]   ;;  %v11808_v54 = vld [vmem:[#allocation5 + $0x10e4] ss:$16 sps:$4 sm:$0xff]  }
 0x23a   :  { %7857 = vmatprep.subr.bf16.mxu0 %v11716_v55  ;;  %8636 = vmatprep.subr.bf16.mxu1 %v11719_v56  ;;  %v11811_v55 = vld [vmem:[#allocation5 + $0x10ec] ss:$16 sps:$4 sm:$0xff]   ;;  %v11806_v56 = vld [vmem:[#allocation5 + $0x10e0] ss:$16 sps:$4 sm:$0xff]  }
 0x23d   :  { %7858 = vmatpush1.bf16.msra.mxu0 %v11714_v57  ;;  %8637 = vmatpush1.bf16.msra.mxu1 %v11717_v58  ;;  %v11809_v57 = vld [vmem:[#allocation5 + $0x10e8] ss:$16 sps:$4 sm:$0xff]   ;;  %v11814_v58 = vld [vmem:[#allocation5 + $0x1104] ss:$16 sps:$4 sm:$0xff]  }
 0x23e   :  { %7859 = vmatprep.subr.bf16.mxu0 %v11722_v59  ;;  %8638 = vmatprep.subr.bf16.mxu1 %v11725_v60  ;;  %v11817_v59 = vld [vmem:[#allocation5 + $0x110c] ss:$16 sps:$4 sm:$0xff]   ;;  %v11812_v60 = vld [vmem:[#allocation5 + $0x1100] ss:$16 sps:$4 sm:$0xff]  }
 0x241   :  { %7860 = vmatpush1.bf16.msra.mxu0 %v11720_v61  ;;  %8639 = vmatpush1.bf16.msra.mxu1 %v11723_v62  ;;  %v11815_v61 = vld [vmem:[#allocation5 + $0x1108] ss:$16 sps:$4 sm:$0xff]   ;;  %v11820_v62 = vld [vmem:[#allocation5 + $0x1124] ss:$16 sps:$4 sm:$0xff]  }
 0x242   :  { %7861 = vmatprep.subr.bf16.mxu0 %v11728_v63  ;;  %8640 = vmatprep.subr.bf16.mxu1 %v11731_v0  ;;  %v11823_v63 = vld [vmem:[#allocation5 + $0x112c] ss:$16 sps:$4 sm:$0xff]   ;;  %v11818_v0 = vld [vmem:[#allocation5 + $0x1120] ss:$16 sps:$4 sm:$0xff]  }
 0x245   :  { %7862 = vmatpush1.bf16.msra.mxu0 %v11726_v1  ;;  %8641 = vmatpush1.bf16.msra.mxu1 %v11729_v2  ;;  %v11821_v1 = vld [vmem:[#allocation5 + $0x1128] ss:$16 sps:$4 sm:$0xff]   ;;  %v11826_v2 = vld [vmem:[#allocation5 + $0x1144] ss:$16 sps:$4 sm:$0xff]  }
 0x246   :  { %7863 = vmatprep.subr.bf16.mxu0 %v11734_v3  ;;  %8642 = vmatprep.subr.bf16.mxu1 %v11737_v4  ;;  %v11829_v3 = vld [vmem:[#allocation5 + $0x114c] ss:$16 sps:$4 sm:$0xff]   ;;  %v11824_v4 = vld [vmem:[#allocation5 + $0x1140] ss:$16 sps:$4 sm:$0xff]  }
 0x249   :  { %7864 = vmatpush1.bf16.msra.mxu0 %v11732_v5  ;;  %8643 = vmatpush1.bf16.msra.mxu1 %v11735_v6  ;;  %v11827_v5 = vld [vmem:[#allocation5 + $0x1148] ss:$16 sps:$4 sm:$0xff]   ;;  %v11832_v6 = vld [vmem:[#allocation5 + $0x1164] ss:$16 sps:$4 sm:$0xff]  }
 0x24a   :  { %7865 = vmatprep.subr.bf16.mxu0 %v11740_v7  ;;  %8644 = vmatprep.subr.bf16.mxu1 %v11743_v8  ;;  %v11835_v7 = vld [vmem:[#allocation5 + $0x116c] ss:$16 sps:$4 sm:$0xff]   ;;  %v11830_v8 = vld [vmem:[#allocation5 + $0x1160] ss:$16 sps:$4 sm:$0xff]  }
 0x24d   :  { %7866 = vmatpush1.bf16.msra.mxu0 %v11738_v9  ;;  %8645 = vmatpush1.bf16.msra.mxu1 %v11741_v10  ;;  %v11833_v9 = vld [vmem:[#allocation5 + $0x1168] ss:$16 sps:$4 sm:$0xff]   ;;  %v11838_v10 = vld [vmem:[#allocation5 + $0x1184] ss:$16 sps:$4 sm:$0xff]  }
 0x24e   :  { %7867 = vmatprep.subr.bf16.mxu0 %v11746_v12  ;;  %8646 = vmatprep.subr.bf16.mxu1 %v11749_v13  ;;  %v11841_v12 = vld [vmem:[#allocation5 + $0x118c] ss:$16 sps:$4 sm:$0xff]   ;;  %v11836_v13 = vld [vmem:[#allocation5 + $0x1180] ss:$16 sps:$4 sm:$0xff]  }
 0x251   :  { %7868 = vmatpush1.bf16.msra.mxu0 %v11744_v15  ;;  %8647 = vmatpush1.bf16.msra.mxu1 %v11747_v16  ;;  %v11839_v15 = vld [vmem:[#allocation5 + $0x1188] ss:$16 sps:$4 sm:$0xff]   ;;  %v11844_v16 = vld [vmem:[#allocation5 + $0x11a4] ss:$16 sps:$4 sm:$0xff]  }
 0x252   :  { %7869 = vmatprep.subr.bf16.mxu0 %v11752_v18  ;;  %8648 = vmatprep.subr.bf16.mxu1 %v11755_v20  ;;  %v11847_v18 = vld [vmem:[#allocation5 + $0x11ac] ss:$16 sps:$4 sm:$0xff]   ;;  %v11842_v20 = vld [vmem:[#allocation5 + $0x11a0] ss:$16 sps:$4 sm:$0xff]  }
 0x255   :  { %7870 = vmatpush1.bf16.msra.mxu0 %v11750_v11  ;;  %8649 = vmatpush1.bf16.msra.mxu1 %v11753_v21  ;;  %v11845_v11 = vld [vmem:[#allocation5 + $0x11a8] ss:$16 sps:$4 sm:$0xff]   ;;  %v11850_v21 = vld [vmem:[#allocation5 + $0x11c4] ss:$16 sps:$4 sm:$0xff]  }
 0x256   :  { %7871 = vmatprep.subr.bf16.mxu0 %v11758_v14  ;;  %8650 = vmatprep.subr.bf16.mxu1 %v11761_v23  ;;  %v11853_v14 = vld [vmem:[#allocation5 + $0x11cc] ss:$16 sps:$4 sm:$0xff]   ;;  %v11848_v23 = vld [vmem:[#allocation5 + $0x11c0] ss:$16 sps:$4 sm:$0xff]  }
 0x259   :  { %7872 = vmatpush1.bf16.msra.mxu0 %v11756_v24  ;;  %8651 = vmatpush1.bf16.msra.mxu1 %v11759_v17  ;;  %v11851_v24 = vld [vmem:[#allocation5 + $0x11c8] ss:$16 sps:$4 sm:$0xff]   ;;  %v11856_v17 = vld [vmem:[#allocation5 + $0x11e4] ss:$16 sps:$4 sm:$0xff]  }
 0x25a   :  { %7882 = vmatprep.subr.bf16.mxu0 %v11766_v26  ;;  %8661 = vmatprep.subr.bf16.mxu1 %v11769_v27  ;;  %v11859_v26 = vld [vmem:[#allocation5 + $0x11ec] ss:$16 sps:$4 sm:$0xff]   ;;  %v11854_v27 = vld [vmem:[#allocation5 + $0x11e0] ss:$16 sps:$4 sm:$0xff]  }
 0x25c   :  { %7874 = vmatmul.mubr.bf16.vlgmr.msra.gmra.mrb[0].mxu0 %v9505_v19  ;;  %8653 = vmatmul.mubr.bf16.vlgmr.msra.gmra.mrb[0].mxu1 %v9505_v19  ;;  %v11857_v19 = vld [vmem:[#allocation5 + $0x11e8] ss:$16 sps:$4 sm:$0xff]  }
 0x25d   :  { %7883 = vmatpush1.bf16.msra.mxu0 %v11764_v29  ;;  %8662 = vmatpush1.bf16.msra.mxu1 %v11767_v30  ;;  %v11864_v29 = vld [vmem:[#allocation5 + $0x1204] ss:$16 sps:$4 sm:$0xff]   ;;  %v11867_v30 = vld [vmem:[#allocation5 + $0x120c] ss:$16 sps:$4 sm:$0xff]  }
 0x25e   :  { %7884 = vmatprep.subr.bf16.mxu0 %v11772_v31  ;;  %8663 = vmatprep.subr.bf16.mxu1 %v11775_v22  ;;  %v13164_v31 = vld [vmem:[#allocation2 + $0x48] sm:$0xff]  ;;  %v9507_v22 = vcombine.low %v13158_v28, %v13158_v28 }
 0x25f   :  { %7914 = vmatprep.mubr.bf16.mxu0 %v9508_v32  ;;  %8693 = vmatprep.mubr.bf16.mxu1 %v9508_v32  ;;  %v11862_v32 = vld [vmem:[#allocation5 + $0x1200] ss:$16 sps:$4 sm:$0xff]   ;;  %v11876_v28 = vld [vmem:[#allocation5 + $0x1244] ss:$16 sps:$4 sm:$0xff]  }
 0x261   :  { %7885 = vmatpush1.bf16.msra.mxu0 %v11770_v33  ;;  %8664 = vmatpush1.bf16.msra.mxu1 %v11773_v34  ;;  %v11865_v33 = vld [vmem:[#allocation5 + $0x1208] ss:$16 sps:$4 sm:$0xff]   ;;  %v11870_v34 = vld [vmem:[#allocation5 + $0x1224] ss:$16 sps:$4 sm:$0xff]  }
 0x262   :  { %7886 = vmatprep.subr.bf16.mxu0 %v11778_v25  ;;  %8665 = vmatprep.subr.bf16.mxu1 %v11781_v35  ;;  %v11873_v25 = vld [vmem:[#allocation5 + $0x122c] ss:$16 sps:$4 sm:$0xff]   ;;  %v9510_v35 = vcombine.high %v13164_v31, %v13164_v31 }
 0x265   :  { %7887 = vmatpush1.bf16.msra.mxu0 %v11776_v36  ;;  %8666 = vmatpush1.bf16.msra.mxu1 %v11779_v37  ;;  %v11868_v36 = vld [vmem:[#allocation5 + $0x1220] ss:$16 sps:$4 sm:$0xff]   ;;  %v11871_v37 = vld [vmem:[#allocation5 + $0x1228] ss:$16 sps:$4 sm:$0xff]  }
 0x266   :  { %7888 = vmatprep.subr.bf16.mxu0 %v11784_v38  ;;  %8667 = vmatprep.subr.bf16.mxu1 %v11787_v39  ;;  %v11879_v38 = vld [vmem:[#allocation5 + $0x124c] ss:$16 sps:$4 sm:$0xff]   ;;  %v11874_v39 = vld [vmem:[#allocation5 + $0x1240] ss:$16 sps:$4 sm:$0xff]  }
 0x269   :  { %7889 = vmatpush1.bf16.msra.mxu0 %v11782_v40  ;;  %8668 = vmatpush1.bf16.msra.mxu1 %v11785_v41  ;;  %v11877_v40 = vld [vmem:[#allocation5 + $0x1248] ss:$16 sps:$4 sm:$0xff]   ;;  %v11882_v41 = vld [vmem:[#allocation5 + $0x1264] ss:$16 sps:$4 sm:$0xff]  }
 0x26a   :  { %7890 = vmatprep.subr.bf16.mxu0 %v11790_v42  ;;  %8669 = vmatprep.subr.bf16.mxu1 %v11793_v43  ;;  %v11885_v42 = vld [vmem:[#allocation5 + $0x126c] ss:$16 sps:$4 sm:$0xff]   ;;  %v11880_v43 = vld [vmem:[#allocation5 + $0x1260] ss:$16 sps:$4 sm:$0xff]  }
 0x26d   :  { %7891 = vmatpush1.bf16.msra.mxu0 %v11788_v44  ;;  %8670 = vmatpush1.bf16.msra.mxu1 %v11791_v45  ;;  %v11883_v44 = vld [vmem:[#allocation5 + $0x1268] ss:$16 sps:$4 sm:$0xff]   ;;  %v11888_v45 = vld [vmem:[#allocation5 + $0x1284] ss:$16 sps:$4 sm:$0xff]  }
 0x26e   :  { %7892 = vmatprep.subr.bf16.mxu0 %v11796_v46  ;;  %8671 = vmatprep.subr.bf16.mxu1 %v11799_v47  ;;  %v11891_v46 = vld [vmem:[#allocation5 + $0x128c] ss:$16 sps:$4 sm:$0xff]   ;;  %v11886_v47 = vld [vmem:[#allocation5 + $0x1280] ss:$16 sps:$4 sm:$0xff]  }
 0x271   :  { %7893 = vmatpush1.bf16.msra.mxu0 %v11794_v48  ;;  %8672 = vmatpush1.bf16.msra.mxu1 %v11797_v49  ;;  %v11889_v48 = vld [vmem:[#allocation5 + $0x1288] ss:$16 sps:$4 sm:$0xff]   ;;  %v11894_v49 = vld [vmem:[#allocation5 + $0x12a4] ss:$16 sps:$4 sm:$0xff]  }
 0x272   :  { %7894 = vmatprep.subr.bf16.mxu0 %v11802_v50  ;;  %8673 = vmatprep.subr.bf16.mxu1 %v11805_v51  ;;  %v11897_v50 = vld [vmem:[#allocation5 + $0x12ac] ss:$16 sps:$4 sm:$0xff]   ;;  %v11892_v51 = vld [vmem:[#allocation5 + $0x12a0] ss:$16 sps:$4 sm:$0xff]  }
 0x275   :  { %7895 = vmatpush1.bf16.msra.mxu0 %v11800_v52  ;;  %8674 = vmatpush1.bf16.msra.mxu1 %v11803_v53  ;;  %v11895_v52 = vld [vmem:[#allocation5 + $0x12a8] ss:$16 sps:$4 sm:$0xff]   ;;  %v11900_v53 = vld [vmem:[#allocation5 + $0x12c4] ss:$16 sps:$4 sm:$0xff]  }
 0x276   :  { %7896 = vmatprep.subr.bf16.mxu0 %v11808_v54  ;;  %8675 = vmatprep.subr.bf16.mxu1 %v11811_v55  ;;  %v11903_v54 = vld [vmem:[#allocation5 + $0x12cc] ss:$16 sps:$4 sm:$0xff]   ;;  %v11898_v55 = vld [vmem:[#allocation5 + $0x12c0] ss:$16 sps:$4 sm:$0xff]  }
 0x279   :  { %7897 = vmatpush1.bf16.msra.mxu0 %v11806_v56  ;;  %8676 = vmatpush1.bf16.msra.mxu1 %v11809_v57  ;;  %v11901_v56 = vld [vmem:[#allocation5 + $0x12c8] ss:$16 sps:$4 sm:$0xff]   ;;  %v11906_v57 = vld [vmem:[#allocation5 + $0x12e4] ss:$16 sps:$4 sm:$0xff]  }
 0x27a   :  { %7898 = vmatprep.subr.bf16.mxu0 %v11814_v58  ;;  %8677 = vmatprep.subr.bf16.mxu1 %v11817_v59  ;;  %v11909_v58 = vld [vmem:[#allocation5 + $0x12ec] ss:$16 sps:$4 sm:$0xff]   ;;  %v11904_v59 = vld [vmem:[#allocation5 + $0x12e0] ss:$16 sps:$4 sm:$0xff]  }
 0x27d   :  { %7899 = vmatpush1.bf16.msra.mxu0 %v11812_v60  ;;  %8678 = vmatpush1.bf16.msra.mxu1 %v11815_v61  ;;  %v11907_v60 = vld [vmem:[#allocation5 + $0x12e8] ss:$16 sps:$4 sm:$0xff]   ;;  %v11912_v61 = vld [vmem:[#allocation5 + $0x1304] ss:$16 sps:$4 sm:$0xff]  }
 0x27e   :  { %7900 = vmatprep.subr.bf16.mxu0 %v11820_v62  ;;  %8679 = vmatprep.subr.bf16.mxu1 %v11823_v63  ;;  %v11915_v62 = vld [vmem:[#allocation5 + $0x130c] ss:$16 sps:$4 sm:$0xff]   ;;  %v11910_v63 = vld [vmem:[#allocation5 + $0x1300] ss:$16 sps:$4 sm:$0xff]  }
 0x281   :  { %7901 = vmatpush1.bf16.msra.mxu0 %v11818_v0  ;;  %8680 = vmatpush1.bf16.msra.mxu1 %v11821_v1  ;;  %v11913_v0 = vld [vmem:[#allocation5 + $0x1308] ss:$16 sps:$4 sm:$0xff]   ;;  %v11918_v1 = vld [vmem:[#allocation5 + $0x1324] ss:$16 sps:$4 sm:$0xff]  }
 0x282   :  { %7902 = vmatprep.subr.bf16.mxu0 %v11826_v2  ;;  %8681 = vmatprep.subr.bf16.mxu1 %v11829_v3  ;;  %v11921_v2 = vld [vmem:[#allocation5 + $0x132c] ss:$16 sps:$4 sm:$0xff]   ;;  %v11916_v3 = vld [vmem:[#allocation5 + $0x1320] ss:$16 sps:$4 sm:$0xff]  }
 0x285   :  { %7903 = vmatpush1.bf16.msra.mxu0 %v11824_v4  ;;  %8682 = vmatpush1.bf16.msra.mxu1 %v11827_v5  ;;  %v11919_v4 = vld [vmem:[#allocation5 + $0x1328] ss:$16 sps:$4 sm:$0xff]   ;;  %v11924_v5 = vld [vmem:[#allocation5 + $0x1344] ss:$16 sps:$4 sm:$0xff]  }
 0x286   :  { %7904 = vmatprep.subr.bf16.mxu0 %v11832_v6  ;;  %8683 = vmatprep.subr.bf16.mxu1 %v11835_v7  ;;  %v11927_v6 = vld [vmem:[#allocation5 + $0x134c] ss:$16 sps:$4 sm:$0xff]   ;;  %v11922_v7 = vld [vmem:[#allocation5 + $0x1340] ss:$16 sps:$4 sm:$0xff]  }
 0x289   :  { %7905 = vmatpush1.bf16.msra.mxu0 %v11830_v8  ;;  %8684 = vmatpush1.bf16.msra.mxu1 %v11833_v9  ;;  %v11925_v8 = vld [vmem:[#allocation5 + $0x1348] ss:$16 sps:$4 sm:$0xff]   ;;  %v11930_v9 = vld [vmem:[#allocation5 + $0x1364] ss:$16 sps:$4 sm:$0xff]  }
 0x28a   :  { %7906 = vmatprep.subr.bf16.mxu0 %v11838_v10  ;;  %8685 = vmatprep.subr.bf16.mxu1 %v11841_v12  ;;  %v11933_v10 = vld [vmem:[#allocation5 + $0x136c] ss:$16 sps:$4 sm:$0xff]   ;;  %v11928_v12 = vld [vmem:[#allocation5 + $0x1360] ss:$16 sps:$4 sm:$0xff]  }
 0x28d   :  { %7907 = vmatpush1.bf16.msra.mxu0 %v11836_v13  ;;  %8686 = vmatpush1.bf16.msra.mxu1 %v11839_v15  ;;  %v11931_v13 = vld [vmem:[#allocation5 + $0x1368] ss:$16 sps:$4 sm:$0xff]   ;;  %v11936_v15 = vld [vmem:[#allocation5 + $0x1384] ss:$16 sps:$4 sm:$0xff]  }
 0x28e   :  { %7908 = vmatprep.subr.bf16.mxu0 %v11844_v16  ;;  %8687 = vmatprep.subr.bf16.mxu1 %v11847_v18  ;;  %v11939_v16 = vld [vmem:[#allocation5 + $0x138c] ss:$16 sps:$4 sm:$0xff]   ;;  %v11934_v18 = vld [vmem:[#allocation5 + $0x1380] ss:$16 sps:$4 sm:$0xff]  }
 0x291   :  { %7909 = vmatpush1.bf16.msra.mxu0 %v11842_v20  ;;  %8688 = vmatpush1.bf16.msra.mxu1 %v11845_v11  ;;  %v11937_v20 = vld [vmem:[#allocation5 + $0x1388] ss:$16 sps:$4 sm:$0xff]   ;;  %v11942_v11 = vld [vmem:[#allocation5 + $0x13a4] ss:$16 sps:$4 sm:$0xff]  }
 0x292   :  { %7910 = vmatprep.subr.bf16.mxu0 %v11850_v21  ;;  %8689 = vmatprep.subr.bf16.mxu1 %v11853_v14  ;;  %v11945_v21 = vld [vmem:[#allocation5 + $0x13ac] ss:$16 sps:$4 sm:$0xff]   ;;  %v11940_v14 = vld [vmem:[#allocation5 + $0x13a0] ss:$16 sps:$4 sm:$0xff]  }
 0x295   :  { %7911 = vmatpush1.bf16.msra.mxu0 %v11848_v23  ;;  %8690 = vmatpush1.bf16.msra.mxu1 %v11851_v24  ;;  %v11943_v23 = vld [vmem:[#allocation5 + $0x13a8] ss:$16 sps:$4 sm:$0xff]   ;;  %v11948_v24 = vld [vmem:[#allocation5 + $0x13c4] ss:$16 sps:$4 sm:$0xff]  }
 0x296   :  { %7912 = vmatprep.subr.bf16.mxu0 %v11856_v17  ;;  %8691 = vmatprep.subr.bf16.mxu1 %v11859_v26  ;;  %v11951_v17 = vld [vmem:[#allocation5 + $0x13cc] ss:$16 sps:$4 sm:$0xff]   ;;  %v11946_v26 = vld [vmem:[#allocation5 + $0x13c0] ss:$16 sps:$4 sm:$0xff]  }
 0x299   :  { %7913 = vmatpush1.bf16.msra.mxu0 %v11854_v27  ;;  %8692 = vmatpush1.bf16.msra.mxu1 %v11857_v19  ;;  %v11949_v27 = vld [vmem:[#allocation5 + $0x13c8] ss:$16 sps:$4 sm:$0xff]   ;;  %v11954_v19 = vld [vmem:[#allocation5 + $0x13e4] ss:$16 sps:$4 sm:$0xff]  }
 0x29a   :  { %7923 = vmatprep.subr.bf16.mxu0 %v11864_v29  ;;  %8702 = vmatprep.subr.bf16.mxu1 %v11867_v30  ;;  %v11957_v29 = vld [vmem:[#allocation5 + $0x13ec] ss:$16 sps:$4 sm:$0xff]   ;;  %v11952_v30 = vld [vmem:[#allocation5 + $0x13e0] ss:$16 sps:$4 sm:$0xff]  }
 0x29c   :  { %7915 = vmatmul.mubr.bf16.vlgmr.msra.gmra.mrb[0].mxu0 %v9507_v22  ;;  %8694 = vmatmul.mubr.bf16.vlgmr.msra.gmra.mrb[0].mxu1 %v9507_v22  ;;  %v11955_v22 = vld [vmem:[#allocation5 + $0x13e8] ss:$16 sps:$4 sm:$0xff]  }
 0x29d   :  { %7924 = vmatpush1.bf16.msra.mxu0 %v11862_v32  ;;  %8703 = vmatpush1.bf16.msra.mxu1 %v11865_v33  ;;  %v11962_v32 = vld [vmem:[#allocation5 + $0x1404] ss:$16 sps:$4 sm:$0xff]   ;;  %v11965_v33 = vld [vmem:[#allocation5 + $0x140c] ss:$16 sps:$4 sm:$0xff]  }
 0x29e   :  { %7925 = vmatprep.subr.bf16.mxu0 %v11870_v34  ;;  %8704 = vmatprep.subr.bf16.mxu1 %v11873_v25  ;;  %v13170_v34 = vld [vmem:[#allocation2 + $0x50] sm:$0xff]  ;;  %v9509_v25 = vcombine.low %v13164_v31, %v13164_v31  ;;  %v11974_v31 = vld [vmem:[#allocation5 + $0x1444] ss:$16 sps:$4 sm:$0xff]  }
 0x29f   :  { %7955 = vmatprep.mubr.bf16.mxu0 %v9510_v35  ;;  %8734 = vmatprep.mubr.bf16.mxu1 %v9510_v35  ;;  %v11960_v35 = vld [vmem:[#allocation5 + $0x1400] ss:$16 sps:$4 sm:$0xff]  }
 0x2a1   :  { %7926 = vmatpush1.bf16.msra.mxu0 %v11868_v36  ;;  %8705 = vmatpush1.bf16.msra.mxu1 %v11871_v37  ;;  %v11963_v36 = vld [vmem:[#allocation5 + $0x1408] ss:$16 sps:$4 sm:$0xff]   ;;  %v11968_v37 = vld [vmem:[#allocation5 + $0x1424] ss:$16 sps:$4 sm:$0xff]  }
 0x2a2   :  { %7927 = vmatprep.subr.bf16.mxu0 %v11876_v28  ;;  %8706 = vmatprep.subr.bf16.mxu1 %v11879_v38  ;;  %v11971_v28 = vld [vmem:[#allocation5 + $0x142c] ss:$16 sps:$4 sm:$0xff]   ;;  %v9512_v38 = vcombine.high %v13170_v34, %v13170_v34 }
 0x2a5   :  { %7928 = vmatpush1.bf16.msra.mxu0 %v11874_v39  ;;  %8707 = vmatpush1.bf16.msra.mxu1 %v11877_v40  ;;  %v11966_v39 = vld [vmem:[#allocation5 + $0x1420] ss:$16 sps:$4 sm:$0xff]   ;;  %v11969_v40 = vld [vmem:[#allocation5 + $0x1428] ss:$16 sps:$4 sm:$0xff]  }
 0x2a6   :  { %7929 = vmatprep.subr.bf16.mxu0 %v11882_v41  ;;  %8708 = vmatprep.subr.bf16.mxu1 %v11885_v42  ;;  %v11977_v41 = vld [vmem:[#allocation5 + $0x144c] ss:$16 sps:$4 sm:$0xff]   ;;  %v11972_v42 = vld [vmem:[#allocation5 + $0x1440] ss:$16 sps:$4 sm:$0xff]  }
 0x2a9   :  { %7930 = vmatpush1.bf16.msra.mxu0 %v11880_v43  ;;  %8709 = vmatpush1.bf16.msra.mxu1 %v11883_v44  ;;  %v11975_v43 = vld [vmem:[#allocation5 + $0x1448] ss:$16 sps:$4 sm:$0xff]   ;;  %v11980_v44 = vld [vmem:[#allocation5 + $0x1464] ss:$16 sps:$4 sm:$0xff]  }
 0x2aa   :  { %7931 = vmatprep.subr.bf16.mxu0 %v11888_v45  ;;  %8710 = vmatprep.subr.bf16.mxu1 %v11891_v46  ;;  %v11983_v45 = vld [vmem:[#allocation5 + $0x146c] ss:$16 sps:$4 sm:$0xff]   ;;  %v11978_v46 = vld [vmem:[#allocation5 + $0x1460] ss:$16 sps:$4 sm:$0xff]  }
 0x2ad   :  { %7932 = vmatpush1.bf16.msra.mxu0 %v11886_v47  ;;  %8711 = vmatpush1.bf16.msra.mxu1 %v11889_v48  ;;  %v11981_v47 = vld [vmem:[#allocation5 + $0x1468] ss:$16 sps:$4 sm:$0xff]   ;;  %v11986_v48 = vld [vmem:[#allocation5 + $0x1484] ss:$16 sps:$4 sm:$0xff]  }
 0x2ae   :  { %7933 = vmatprep.subr.bf16.mxu0 %v11894_v49  ;;  %8712 = vmatprep.subr.bf16.mxu1 %v11897_v50  ;;  %v11989_v49 = vld [vmem:[#allocation5 + $0x148c] ss:$16 sps:$4 sm:$0xff]   ;;  %v11984_v50 = vld [vmem:[#allocation5 + $0x1480] ss:$16 sps:$4 sm:$0xff]  }
 0x2b1   :  { %7934 = vmatpush1.bf16.msra.mxu0 %v11892_v51  ;;  %8713 = vmatpush1.bf16.msra.mxu1 %v11895_v52  ;;  %v11987_v51 = vld [vmem:[#allocation5 + $0x1488] ss:$16 sps:$4 sm:$0xff]   ;;  %v11992_v52 = vld [vmem:[#allocation5 + $0x14a4] ss:$16 sps:$4 sm:$0xff]  }
 0x2b2   :  { %7935 = vmatprep.subr.bf16.mxu0 %v11900_v53  ;;  %8714 = vmatprep.subr.bf16.mxu1 %v11903_v54  ;;  %v11995_v53 = vld [vmem:[#allocation5 + $0x14ac] ss:$16 sps:$4 sm:$0xff]   ;;  %v11990_v54 = vld [vmem:[#allocation5 + $0x14a0] ss:$16 sps:$4 sm:$0xff]  }
 0x2b5   :  { %7936 = vmatpush1.bf16.msra.mxu0 %v11898_v55  ;;  %8715 = vmatpush1.bf16.msra.mxu1 %v11901_v56  ;;  %v11993_v55 = vld [vmem:[#allocation5 + $0x14a8] ss:$16 sps:$4 sm:$0xff]   ;;  %v11998_v56 = vld [vmem:[#allocation5 + $0x14c4] ss:$16 sps:$4 sm:$0xff]  }
 0x2b6   :  { %7937 = vmatprep.subr.bf16.mxu0 %v11906_v57  ;;  %8716 = vmatprep.subr.bf16.mxu1 %v11909_v58  ;;  %v12001_v57 = vld [vmem:[#allocation5 + $0x14cc] ss:$16 sps:$4 sm:$0xff]   ;;  %v11996_v58 = vld [vmem:[#allocation5 + $0x14c0] ss:$16 sps:$4 sm:$0xff]  }
 0x2b9   :  { %7938 = vmatpush1.bf16.msra.mxu0 %v11904_v59  ;;  %8717 = vmatpush1.bf16.msra.mxu1 %v11907_v60  ;;  %v11999_v59 = vld [vmem:[#allocation5 + $0x14c8] ss:$16 sps:$4 sm:$0xff]   ;;  %v12004_v60 = vld [vmem:[#allocation5 + $0x14e4] ss:$16 sps:$4 sm:$0xff]  }
 0x2ba   :  { %7939 = vmatprep.subr.bf16.mxu0 %v11912_v61  ;;  %8718 = vmatprep.subr.bf16.mxu1 %v11915_v62  ;;  %v12007_v61 = vld [vmem:[#allocation5 + $0x14ec] ss:$16 sps:$4 sm:$0xff]   ;;  %v12002_v62 = vld [vmem:[#allocation5 + $0x14e0] ss:$16 sps:$4 sm:$0xff]  }
 0x2bd   :  { %7940 = vmatpush1.bf16.msra.mxu0 %v11910_v63  ;;  %8719 = vmatpush1.bf16.msra.mxu1 %v11913_v0  ;;  %v12005_v63 = vld [vmem:[#allocation5 + $0x14e8] ss:$16 sps:$4 sm:$0xff]   ;;  %v12010_v0 = vld [vmem:[#allocation5 + $0x1504] ss:$16 sps:$4 sm:$0xff]  }
 0x2be   :  { %7941 = vmatprep.subr.bf16.mxu0 %v11918_v1  ;;  %8720 = vmatprep.subr.bf16.mxu1 %v11921_v2  ;;  %v12013_v1 = vld [vmem:[#allocation5 + $0x150c] ss:$16 sps:$4 sm:$0xff]   ;;  %v12008_v2 = vld [vmem:[#allocation5 + $0x1500] ss:$16 sps:$4 sm:$0xff]  }
 0x2c1   :  { %7942 = vmatpush1.bf16.msra.mxu0 %v11916_v3  ;;  %8721 = vmatpush1.bf16.msra.mxu1 %v11919_v4  ;;  %v12011_v3 = vld [vmem:[#allocation5 + $0x1508] ss:$16 sps:$4 sm:$0xff]   ;;  %v12016_v4 = vld [vmem:[#allocation5 + $0x1524] ss:$16 sps:$4 sm:$0xff]  }
 0x2c2   :  { %7943 = vmatprep.subr.bf16.mxu0 %v11924_v5  ;;  %8722 = vmatprep.subr.bf16.mxu1 %v11927_v6  ;;  %v12019_v5 = vld [vmem:[#allocation5 + $0x152c] ss:$16 sps:$4 sm:$0xff]   ;;  %v12014_v6 = vld [vmem:[#allocation5 + $0x1520] ss:$16 sps:$4 sm:$0xff]  }
 0x2c5   :  { %7944 = vmatpush1.bf16.msra.mxu0 %v11922_v7  ;;  %8723 = vmatpush1.bf16.msra.mxu1 %v11925_v8  ;;  %v12017_v7 = vld [vmem:[#allocation5 + $0x1528] ss:$16 sps:$4 sm:$0xff]   ;;  %v12022_v8 = vld [vmem:[#allocation5 + $0x1544] ss:$16 sps:$4 sm:$0xff]  }
 0x2c6   :  { %7945 = vmatprep.subr.bf16.mxu0 %v11930_v9  ;;  %8724 = vmatprep.subr.bf16.mxu1 %v11933_v10  ;;  %v12025_v9 = vld [vmem:[#allocation5 + $0x154c] ss:$16 sps:$4 sm:$0xff]   ;;  %v12020_v10 = vld [vmem:[#allocation5 + $0x1540] ss:$16 sps:$4 sm:$0xff]  }
 0x2c9   :  { %7946 = vmatpush1.bf16.msra.mxu0 %v11928_v12  ;;  %8725 = vmatpush1.bf16.msra.mxu1 %v11931_v13  ;;  %v12023_v12 = vld [vmem:[#allocation5 + $0x1548] ss:$16 sps:$4 sm:$0xff]   ;;  %v12028_v13 = vld [vmem:[#allocation5 + $0x1564] ss:$16 sps:$4 sm:$0xff]  }
 0x2ca   :  { %7947 = vmatprep.subr.bf16.mxu0 %v11936_v15  ;;  %8726 = vmatprep.subr.bf16.mxu1 %v11939_v16  ;;  %v12031_v15 = vld [vmem:[#allocation5 + $0x156c] ss:$16 sps:$4 sm:$0xff]   ;;  %v12026_v16 = vld [vmem:[#allocation5 + $0x1560] ss:$16 sps:$4 sm:$0xff]  }
 0x2cd   :  { %7948 = vmatpush1.bf16.msra.mxu0 %v11934_v18  ;;  %8727 = vmatpush1.bf16.msra.mxu1 %v11937_v20  ;;  %v12029_v18 = vld [vmem:[#allocation5 + $0x1568] ss:$16 sps:$4 sm:$0xff]   ;;  %v12034_v20 = vld [vmem:[#allocation5 + $0x1584] ss:$16 sps:$4 sm:$0xff]  }
 0x2ce   :  { %7949 = vmatprep.subr.bf16.mxu0 %v11942_v11  ;;  %8728 = vmatprep.subr.bf16.mxu1 %v11945_v21  ;;  %v12037_v11 = vld [vmem:[#allocation5 + $0x158c] ss:$16 sps:$4 sm:$0xff]   ;;  %v12032_v21 = vld [vmem:[#allocation5 + $0x1580] ss:$16 sps:$4 sm:$0xff]  }
 0x2d1   :  { %7950 = vmatpush1.bf16.msra.mxu0 %v11940_v14  ;;  %8729 = vmatpush1.bf16.msra.mxu1 %v11943_v23  ;;  %v12035_v14 = vld [vmem:[#allocation5 + $0x1588] ss:$16 sps:$4 sm:$0xff]   ;;  %v12040_v23 = vld [vmem:[#allocation5 + $0x15a4] ss:$16 sps:$4 sm:$0xff]  }
 0x2d2   :  { %7951 = vmatprep.subr.bf16.mxu0 %v11948_v24  ;;  %8730 = vmatprep.subr.bf16.mxu1 %v11951_v17  ;;  %v12043_v24 = vld [vmem:[#allocation5 + $0x15ac] ss:$16 sps:$4 sm:$0xff]   ;;  %v12038_v17 = vld [vmem:[#allocation5 + $0x15a0] ss:$16 sps:$4 sm:$0xff]  }
 0x2d5   :  { %7952 = vmatpush1.bf16.msra.mxu0 %v11946_v26  ;;  %8731 = vmatpush1.bf16.msra.mxu1 %v11949_v27  ;;  %v12041_v26 = vld [vmem:[#allocation5 + $0x15a8] ss:$16 sps:$4 sm:$0xff]   ;;  %v12046_v27 = vld [vmem:[#allocation5 + $0x15c4] ss:$16 sps:$4 sm:$0xff]  }
 0x2d6   :  { %7953 = vmatprep.subr.bf16.mxu0 %v11954_v19  ;;  %8732 = vmatprep.subr.bf16.mxu1 %v11957_v29  ;;  %v12049_v19 = vld [vmem:[#allocation5 + $0x15cc] ss:$16 sps:$4 sm:$0xff]   ;;  %v12044_v29 = vld [vmem:[#allocation5 + $0x15c0] ss:$16 sps:$4 sm:$0xff]  }
 0x2d9   :  { %7954 = vmatpush1.bf16.msra.mxu0 %v11952_v30  ;;  %8733 = vmatpush1.bf16.msra.mxu1 %v11955_v22  ;;  %v12047_v30 = vld [vmem:[#allocation5 + $0x15c8] ss:$16 sps:$4 sm:$0xff]   ;;  %v12052_v22 = vld [vmem:[#allocation5 + $0x15e4] ss:$16 sps:$4 sm:$0xff]  }
 0x2da   :  { %7964 = vmatprep.subr.bf16.mxu0 %v11962_v32  ;;  %8743 = vmatprep.subr.bf16.mxu1 %v11965_v33  ;;  %v12055_v32 = vld [vmem:[#allocation5 + $0x15ec] ss:$16 sps:$4 sm:$0xff]   ;;  %v12050_v33 = vld [vmem:[#allocation5 + $0x15e0] ss:$16 sps:$4 sm:$0xff]  }
 0x2dc   :  { %7956 = vmatmul.mubr.bf16.vlgmr.msra.gmra.mrb[0].mxu0 %v9509_v25  ;;  %8735 = vmatmul.mubr.bf16.vlgmr.msra.gmra.mrb[0].mxu1 %v9509_v25  ;;  %v12053_v25 = vld [vmem:[#allocation5 + $0x15e8] ss:$16 sps:$4 sm:$0xff]  }
 0x2dd   :  { %7965 = vmatpush1.bf16.msra.mxu0 %v11960_v35  ;;  %8744 = vmatpush1.bf16.msra.mxu1 %v11963_v36  ;;  %v12060_v35 = vld [vmem:[#allocation5 + $0x1604] ss:$16 sps:$4 sm:$0xff]   ;;  %v12063_v36 = vld [vmem:[#allocation5 + $0x160c] ss:$16 sps:$4 sm:$0xff]  }
 0x2de   :  { %7966 = vmatprep.subr.bf16.mxu0 %v11968_v37  ;;  %8745 = vmatprep.subr.bf16.mxu1 %v11971_v28  ;;  %v13176_v37 = vld [vmem:[#allocation2 + $0x58] sm:$0xff]  ;;  %v9511_v28 = vcombine.low %v13170_v34, %v13170_v34 }
 0x2df   :  { %7996 = vmatprep.mubr.bf16.mxu0 %v9512_v38  ;;  %8775 = vmatprep.mubr.bf16.mxu1 %v9512_v38  ;;  %v12058_v38 = vld [vmem:[#allocation5 + $0x1600] ss:$16 sps:$4 sm:$0xff]   ;;  %v12072_v34 = vld [vmem:[#allocation5 + $0x1644] ss:$16 sps:$4 sm:$0xff]  }
 0x2e1   :  { %7967 = vmatpush1.bf16.msra.mxu0 %v11966_v39  ;;  %8746 = vmatpush1.bf16.msra.mxu1 %v11969_v40  ;;  %v12061_v39 = vld [vmem:[#allocation5 + $0x1608] ss:$16 sps:$4 sm:$0xff]   ;;  %v12066_v40 = vld [vmem:[#allocation5 + $0x1624] ss:$16 sps:$4 sm:$0xff]  }
 0x2e2   :  { %7968 = vmatprep.subr.bf16.mxu0 %v11974_v31  ;;  %8747 = vmatprep.subr.bf16.mxu1 %v11977_v41  ;;  %v12069_v31 = vld [vmem:[#allocation5 + $0x162c] ss:$16 sps:$4 sm:$0xff]   ;;  %v9514_v41 = vcombine.high %v13176_v37, %v13176_v37 }
 0x2e5   :  { %7969 = vmatpush1.bf16.msra.mxu0 %v11972_v42  ;;  %8748 = vmatpush1.bf16.msra.mxu1 %v11975_v43  ;;  %v12064_v42 = vld [vmem:[#allocation5 + $0x1620] ss:$16 sps:$4 sm:$0xff]   ;;  %v12067_v43 = vld [vmem:[#allocation5 + $0x1628] ss:$16 sps:$4 sm:$0xff]  }
 0x2e6   :  { %7970 = vmatprep.subr.bf16.mxu0 %v11980_v44  ;;  %8749 = vmatprep.subr.bf16.mxu1 %v11983_v45  ;;  %v12075_v44 = vld [vmem:[#allocation5 + $0x164c] ss:$16 sps:$4 sm:$0xff]   ;;  %v12070_v45 = vld [vmem:[#allocation5 + $0x1640] ss:$16 sps:$4 sm:$0xff]  }
 0x2e9   :  { %7971 = vmatpush1.bf16.msra.mxu0 %v11978_v46  ;;  %8750 = vmatpush1.bf16.msra.mxu1 %v11981_v47  ;;  %v12073_v46 = vld [vmem:[#allocation5 + $0x1648] ss:$16 sps:$4 sm:$0xff]   ;;  %v12078_v47 = vld [vmem:[#allocation5 + $0x1664] ss:$16 sps:$4 sm:$0xff]  }
 0x2ea   :  { %7972 = vmatprep.subr.bf16.mxu0 %v11986_v48  ;;  %8751 = vmatprep.subr.bf16.mxu1 %v11989_v49  ;;  %v12081_v48 = vld [vmem:[#allocation5 + $0x166c] ss:$16 sps:$4 sm:$0xff]   ;;  %v12076_v49 = vld [vmem:[#allocation5 + $0x1660] ss:$16 sps:$4 sm:$0xff]  }
 0x2ed   :  { %7973 = vmatpush1.bf16.msra.mxu0 %v11984_v50  ;;  %8752 = vmatpush1.bf16.msra.mxu1 %v11987_v51  ;;  %v12079_v50 = vld [vmem:[#allocation5 + $0x1668] ss:$16 sps:$4 sm:$0xff]   ;;  %v12084_v51 = vld [vmem:[#allocation5 + $0x1684] ss:$16 sps:$4 sm:$0xff]  }
 0x2ee   :  { %7974 = vmatprep.subr.bf16.mxu0 %v11992_v52  ;;  %8753 = vmatprep.subr.bf16.mxu1 %v11995_v53  ;;  %v12087_v52 = vld [vmem:[#allocation5 + $0x168c] ss:$16 sps:$4 sm:$0xff]   ;;  %v12082_v53 = vld [vmem:[#allocation5 + $0x1680] ss:$16 sps:$4 sm:$0xff]  }
 0x2f1   :  { %7975 = vmatpush1.bf16.msra.mxu0 %v11990_v54  ;;  %8754 = vmatpush1.bf16.msra.mxu1 %v11993_v55  ;;  %v12085_v54 = vld [vmem:[#allocation5 + $0x1688] ss:$16 sps:$4 sm:$0xff]   ;;  %v12090_v55 = vld [vmem:[#allocation5 + $0x16a4] ss:$16 sps:$4 sm:$0xff]  }
 0x2f2   :  { %7976 = vmatprep.subr.bf16.mxu0 %v11998_v56  ;;  %8755 = vmatprep.subr.bf16.mxu1 %v12001_v57  ;;  %v12093_v56 = vld [vmem:[#allocation5 + $0x16ac] ss:$16 sps:$4 sm:$0xff]   ;;  %v12088_v57 = vld [vmem:[#allocation5 + $0x16a0] ss:$16 sps:$4 sm:$0xff]  }
 0x2f5   :  { %7977 = vmatpush1.bf16.msra.mxu0 %v11996_v58  ;;  %8756 = vmatpush1.bf16.msra.mxu1 %v11999_v59  ;;  %v12091_v58 = vld [vmem:[#allocation5 + $0x16a8] ss:$16 sps:$4 sm:$0xff]   ;;  %v12096_v59 = vld [vmem:[#allocation5 + $0x16c4] ss:$16 sps:$4 sm:$0xff]  }
 0x2f6   :  { %7978 = vmatprep.subr.bf16.mxu0 %v12004_v60  ;;  %8757 = vmatprep.subr.bf16.mxu1 %v12007_v61  ;;  %v12099_v60 = vld [vmem:[#allocation5 + $0x16cc] ss:$16 sps:$4 sm:$0xff]   ;;  %v12094_v61 = vld [vmem:[#allocation5 + $0x16c0] ss:$16 sps:$4 sm:$0xff]  }
 0x2f9   :  { %7979 = vmatpush1.bf16.msra.mxu0 %v12002_v62  ;;  %8758 = vmatpush1.bf16.msra.mxu1 %v12005_v63  ;;  %v12097_v62 = vld [vmem:[#allocation5 + $0x16c8] ss:$16 sps:$4 sm:$0xff]   ;;  %v12102_v63 = vld [vmem:[#allocation5 + $0x16e4] ss:$16 sps:$4 sm:$0xff]  }
 0x2fa   :  { %7980 = vmatprep.subr.bf16.mxu0 %v12010_v0  ;;  %8759 = vmatprep.subr.bf16.mxu1 %v12013_v1  ;;  %v12105_v0 = vld [vmem:[#allocation5 + $0x16ec] ss:$16 sps:$4 sm:$0xff]   ;;  %v12100_v1 = vld [vmem:[#allocation5 + $0x16e0] ss:$16 sps:$4 sm:$0xff]  }
 0x2fd   :  { %7981 = vmatpush1.bf16.msra.mxu0 %v12008_v2  ;;  %8760 = vmatpush1.bf16.msra.mxu1 %v12011_v3  ;;  %v12103_v2 = vld [vmem:[#allocation5 + $0x16e8] ss:$16 sps:$4 sm:$0xff]   ;;  %v12108_v3 = vld [vmem:[#allocation5 + $0x1704] ss:$16 sps:$4 sm:$0xff]  }
 0x2fe   :  { %7982 = vmatprep.subr.bf16.mxu0 %v12016_v4  ;;  %8761 = vmatprep.subr.bf16.mxu1 %v12019_v5  ;;  %v12111_v4 = vld [vmem:[#allocation5 + $0x170c] ss:$16 sps:$4 sm:$0xff]   ;;  %v12106_v5 = vld [vmem:[#allocation5 + $0x1700] ss:$16 sps:$4 sm:$0xff]  }
 0x301   :  { %7983 = vmatpush1.bf16.msra.mxu0 %v12014_v6  ;;  %8762 = vmatpush1.bf16.msra.mxu1 %v12017_v7  ;;  %v12109_v6 = vld [vmem:[#allocation5 + $0x1708] ss:$16 sps:$4 sm:$0xff]   ;;  %v12114_v7 = vld [vmem:[#allocation5 + $0x1724] ss:$16 sps:$4 sm:$0xff]  }
 0x302   :  { %7984 = vmatprep.subr.bf16.mxu0 %v12022_v8  ;;  %8763 = vmatprep.subr.bf16.mxu1 %v12025_v9  ;;  %v12117_v8 = vld [vmem:[#allocation5 + $0x172c] ss:$16 sps:$4 sm:$0xff]   ;;  %v12112_v9 = vld [vmem:[#allocation5 + $0x1720] ss:$16 sps:$4 sm:$0xff]  }
 0x305   :  { %7985 = vmatpush1.bf16.msra.mxu0 %v12020_v10  ;;  %8764 = vmatpush1.bf16.msra.mxu1 %v12023_v12  ;;  %v12115_v10 = vld [vmem:[#allocation5 + $0x1728] ss:$16 sps:$4 sm:$0xff]   ;;  %v12120_v12 = vld [vmem:[#allocation5 + $0x1744] ss:$16 sps:$4 sm:$0xff]  }
 0x306   :  { %7986 = vmatprep.subr.bf16.mxu0 %v12028_v13  ;;  %8765 = vmatprep.subr.bf16.mxu1 %v12031_v15  ;;  %v12123_v13 = vld [vmem:[#allocation5 + $0x174c] ss:$16 sps:$4 sm:$0xff]   ;;  %v12118_v15 = vld [vmem:[#allocation5 + $0x1740] ss:$16 sps:$4 sm:$0xff]  }
 0x309   :  { %7987 = vmatpush1.bf16.msra.mxu0 %v12026_v16  ;;  %8766 = vmatpush1.bf16.msra.mxu1 %v12029_v18  ;;  %v12121_v16 = vld [vmem:[#allocation5 + $0x1748] ss:$16 sps:$4 sm:$0xff]   ;;  %v12126_v18 = vld [vmem:[#allocation5 + $0x1764] ss:$16 sps:$4 sm:$0xff]  }
 0x30a   :  { %7988 = vmatprep.subr.bf16.mxu0 %v12034_v20  ;;  %8767 = vmatprep.subr.bf16.mxu1 %v12037_v11  ;;  %v12129_v20 = vld [vmem:[#allocation5 + $0x176c] ss:$16 sps:$4 sm:$0xff]   ;;  %v12124_v11 = vld [vmem:[#allocation5 + $0x1760] ss:$16 sps:$4 sm:$0xff]  }
 0x30d   :  { %7989 = vmatpush1.bf16.msra.mxu0 %v12032_v21  ;;  %8768 = vmatpush1.bf16.msra.mxu1 %v12035_v14  ;;  %v12127_v21 = vld [vmem:[#allocation5 + $0x1768] ss:$16 sps:$4 sm:$0xff]   ;;  %v12132_v14 = vld [vmem:[#allocation5 + $0x1784] ss:$16 sps:$4 sm:$0xff]  }
 0x30e   :  { %7990 = vmatprep.subr.bf16.mxu0 %v12040_v23  ;;  %8769 = vmatprep.subr.bf16.mxu1 %v12043_v24  ;;  %v12135_v23 = vld [vmem:[#allocation5 + $0x178c] ss:$16 sps:$4 sm:$0xff]   ;;  %v12130_v24 = vld [vmem:[#allocation5 + $0x1780] ss:$16 sps:$4 sm:$0xff]  }
 0x311   :  { %7991 = vmatpush1.bf16.msra.mxu0 %v12038_v17  ;;  %8770 = vmatpush1.bf16.msra.mxu1 %v12041_v26  ;;  %v12133_v17 = vld [vmem:[#allocation5 + $0x1788] ss:$16 sps:$4 sm:$0xff]   ;;  %v12138_v26 = vld [vmem:[#allocation5 + $0x17a4] ss:$16 sps:$4 sm:$0xff]  }
 0x312   :  { %7992 = vmatprep.subr.bf16.mxu0 %v12046_v27  ;;  %8771 = vmatprep.subr.bf16.mxu1 %v12049_v19  ;;  %v12141_v27 = vld [vmem:[#allocation5 + $0x17ac] ss:$16 sps:$4 sm:$0xff]   ;;  %v12136_v19 = vld [vmem:[#allocation5 + $0x17a0] ss:$16 sps:$4 sm:$0xff]  }
 0x315   :  { %7993 = vmatpush1.bf16.msra.mxu0 %v12044_v29  ;;  %8772 = vmatpush1.bf16.msra.mxu1 %v12047_v30  ;;  %v12139_v29 = vld [vmem:[#allocation5 + $0x17a8] ss:$16 sps:$4 sm:$0xff]   ;;  %v12144_v30 = vld [vmem:[#allocation5 + $0x17c4] ss:$16 sps:$4 sm:$0xff]  }
 0x316   :  { %7994 = vmatprep.subr.bf16.mxu0 %v12052_v22  ;;  %8773 = vmatprep.subr.bf16.mxu1 %v12055_v32  ;;  %v12147_v22 = vld [vmem:[#allocation5 + $0x17cc] ss:$16 sps:$4 sm:$0xff]   ;;  %v12142_v32 = vld [vmem:[#allocation5 + $0x17c0] ss:$16 sps:$4 sm:$0xff]  }
 0x319   :  { %7995 = vmatpush1.bf16.msra.mxu0 %v12050_v33  ;;  %8774 = vmatpush1.bf16.msra.mxu1 %v12053_v25  ;;  %v12145_v33 = vld [vmem:[#allocation5 + $0x17c8] ss:$16 sps:$4 sm:$0xff]   ;;  %v12150_v25 = vld [vmem:[#allocation5 + $0x17e4] ss:$16 sps:$4 sm:$0xff]  }
 0x31a   :  { %8005 = vmatprep.subr.bf16.mxu0 %v12060_v35  ;;  %8784 = vmatprep.subr.bf16.mxu1 %v12063_v36  ;;  %v12153_v35 = vld [vmem:[#allocation5 + $0x17ec] ss:$16 sps:$4 sm:$0xff]   ;;  %v12148_v36 = vld [vmem:[#allocation5 + $0x17e0] ss:$16 sps:$4 sm:$0xff]  }
 0x31c   :  { %7997 = vmatmul.mubr.bf16.vlgmr.msra.gmra.mrb[0].mxu0 %v9511_v28  ;;  %8776 = vmatmul.mubr.bf16.vlgmr.msra.gmra.mrb[0].mxu1 %v9511_v28  ;;  %v12151_v28 = vld [vmem:[#allocation5 + $0x17e8] ss:$16 sps:$4 sm:$0xff]  }
 0x31d   :  { %8006 = vmatpush1.bf16.msra.mxu0 %v12058_v38  ;;  %8785 = vmatpush1.bf16.msra.mxu1 %v12061_v39  ;;  %v12158_v38 = vld [vmem:[#allocation5 + $0x1804] ss:$16 sps:$4 sm:$0xff]   ;;  %v12161_v39 = vld [vmem:[#allocation5 + $0x180c] ss:$16 sps:$4 sm:$0xff]  }
 0x31e   :  { %8007 = vmatprep.subr.bf16.mxu0 %v12066_v40  ;;  %8786 = vmatprep.subr.bf16.mxu1 %v12069_v31  ;;  %v9513_v40 = vcombine.low %v13176_v37, %v13176_v37  ;;  %v13184_v31 = vld [vmem:[#allocation2 + $0x60] sm:$0xff]  ;;  %v12170_v37 = vld [vmem:[#allocation5 + $0x1844] ss:$16 sps:$4 sm:$0xff]  }
 0x31f   :  { %8037 = vmatprep.mubr.bf16.mxu0 %v9514_v41  ;;  %8816 = vmatprep.mubr.bf16.mxu1 %v9514_v41  ;;  %v12156_v41 = vld [vmem:[#allocation5 + $0x1800] ss:$16 sps:$4 sm:$0xff]  }
 0x321   :  { %8008 = vmatpush1.bf16.msra.mxu0 %v12064_v42  ;;  %8787 = vmatpush1.bf16.msra.mxu1 %v12067_v43  ;;  %v12159_v42 = vld [vmem:[#allocation5 + $0x1808] ss:$16 sps:$4 sm:$0xff]   ;;  %v12164_v43 = vld [vmem:[#allocation5 + $0x1824] ss:$16 sps:$4 sm:$0xff]  }
 0x322   :  { %8009 = vmatprep.subr.bf16.mxu0 %v12072_v34  ;;  %8788 = vmatprep.subr.bf16.mxu1 %v12075_v44  ;;  %v12167_v34 = vld [vmem:[#allocation5 + $0x182c] ss:$16 sps:$4 sm:$0xff]   ;;  %v9516_v44 = vcombine.high %v13184_v31, %v13184_v31 }
 0x325   :  { %8010 = vmatpush1.bf16.msra.mxu0 %v12070_v45  ;;  %8789 = vmatpush1.bf16.msra.mxu1 %v12073_v46  ;;  %v12162_v45 = vld [vmem:[#allocation5 + $0x1820] ss:$16 sps:$4 sm:$0xff]   ;;  %v12165_v46 = vld [vmem:[#allocation5 + $0x1828] ss:$16 sps:$4 sm:$0xff]  }
 0x326   :  { %8011 = vmatprep.subr.bf16.mxu0 %v12078_v47  ;;  %8790 = vmatprep.subr.bf16.mxu1 %v12081_v48  ;;  %v12173_v47 = vld [vmem:[#allocation5 + $0x184c] ss:$16 sps:$4 sm:$0xff]   ;;  %v12168_v48 = vld [vmem:[#allocation5 + $0x1840] ss:$16 sps:$4 sm:$0xff]  }
 0x329   :  { %8012 = vmatpush1.bf16.msra.mxu0 %v12076_v49  ;;  %8791 = vmatpush1.bf16.msra.mxu1 %v12079_v50  ;;  %v12171_v49 = vld [vmem:[#allocation5 + $0x1848] ss:$16 sps:$4 sm:$0xff]   ;;  %v12176_v50 = vld [vmem:[#allocation5 + $0x1864] ss:$16 sps:$4 sm:$0xff]  }
 0x32a   :  { %8013 = vmatprep.subr.bf16.mxu0 %v12084_v51  ;;  %8792 = vmatprep.subr.bf16.mxu1 %v12087_v52  ;;  %v12179_v51 = vld [vmem:[#allocation5 + $0x186c] ss:$16 sps:$4 sm:$0xff]   ;;  %v12174_v52 = vld [vmem:[#allocation5 + $0x1860] ss:$16 sps:$4 sm:$0xff]  }
 0x32d   :  { %8014 = vmatpush1.bf16.msra.mxu0 %v12082_v53  ;;  %8793 = vmatpush1.bf16.msra.mxu1 %v12085_v54  ;;  %v12177_v53 = vld [vmem:[#allocation5 + $0x1868] ss:$16 sps:$4 sm:$0xff]   ;;  %v12182_v54 = vld [vmem:[#allocation5 + $0x1884] ss:$16 sps:$4 sm:$0xff]  }
 0x32e   :  { %8015 = vmatprep.subr.bf16.mxu0 %v12090_v55  ;;  %8794 = vmatprep.subr.bf16.mxu1 %v12093_v56  ;;  %v12185_v55 = vld [vmem:[#allocation5 + $0x188c] ss:$16 sps:$4 sm:$0xff]   ;;  %v12180_v56 = vld [vmem:[#allocation5 + $0x1880] ss:$16 sps:$4 sm:$0xff]  }
 0x331   :  { %8016 = vmatpush1.bf16.msra.mxu0 %v12088_v57  ;;  %8795 = vmatpush1.bf16.msra.mxu1 %v12091_v58  ;;  %v12183_v57 = vld [vmem:[#allocation5 + $0x1888] ss:$16 sps:$4 sm:$0xff]   ;;  %v12188_v58 = vld [vmem:[#allocation5 + $0x18a4] ss:$16 sps:$4 sm:$0xff]  }
 0x332   :  { %8017 = vmatprep.subr.bf16.mxu0 %v12096_v59  ;;  %8796 = vmatprep.subr.bf16.mxu1 %v12099_v60  ;;  %v12191_v59 = vld [vmem:[#allocation5 + $0x18ac] ss:$16 sps:$4 sm:$0xff]   ;;  %v12186_v60 = vld [vmem:[#allocation5 + $0x18a0] ss:$16 sps:$4 sm:$0xff]  }
 0x335   :  { %8018 = vmatpush1.bf16.msra.mxu0 %v12094_v61  ;;  %8797 = vmatpush1.bf16.msra.mxu1 %v12097_v62  ;;  %v12189_v61 = vld [vmem:[#allocation5 + $0x18a8] ss:$16 sps:$4 sm:$0xff]   ;;  %v12194_v62 = vld [vmem:[#allocation5 + $0x18c4] ss:$16 sps:$4 sm:$0xff]  }
 0x336   :  { %8019 = vmatprep.subr.bf16.mxu0 %v12102_v63  ;;  %8798 = vmatprep.subr.bf16.mxu1 %v12105_v0  ;;  %v12197_v63 = vld [vmem:[#allocation5 + $0x18cc] ss:$16 sps:$4 sm:$0xff]   ;;  %v12192_v0 = vld [vmem:[#allocation5 + $0x18c0] ss:$16 sps:$4 sm:$0xff]  }
 0x339   :  { %8020 = vmatpush1.bf16.msra.mxu0 %v12100_v1  ;;  %8799 = vmatpush1.bf16.msra.mxu1 %v12103_v2  ;;  %v12195_v1 = vld [vmem:[#allocation5 + $0x18c8] ss:$16 sps:$4 sm:$0xff]   ;;  %v12200_v2 = vld [vmem:[#allocation5 + $0x18e4] ss:$16 sps:$4 sm:$0xff]  }
 0x33a   :  { %8021 = vmatprep.subr.bf16.mxu0 %v12108_v3  ;;  %8800 = vmatprep.subr.bf16.mxu1 %v12111_v4  ;;  %v12203_v3 = vld [vmem:[#allocation5 + $0x18ec] ss:$16 sps:$4 sm:$0xff]   ;;  %v12198_v4 = vld [vmem:[#allocation5 + $0x18e0] ss:$16 sps:$4 sm:$0xff]  }
 0x33d   :  { %8022 = vmatpush1.bf16.msra.mxu0 %v12106_v5  ;;  %8801 = vmatpush1.bf16.msra.mxu1 %v12109_v6  ;;  %v12201_v5 = vld [vmem:[#allocation5 + $0x18e8] ss:$16 sps:$4 sm:$0xff]   ;;  %v12206_v6 = vld [vmem:[#allocation5 + $0x1904] ss:$16 sps:$4 sm:$0xff]  }
 0x33e   :  { %8023 = vmatprep.subr.bf16.mxu0 %v12114_v7  ;;  %8802 = vmatprep.subr.bf16.mxu1 %v12117_v8  ;;  %v12209_v7 = vld [vmem:[#allocation5 + $0x190c] ss:$16 sps:$4 sm:$0xff]   ;;  %v12204_v8 = vld [vmem:[#allocation5 + $0x1900] ss:$16 sps:$4 sm:$0xff]  }
 0x341   :  { %8024 = vmatpush1.bf16.msra.mxu0 %v12112_v9  ;;  %8803 = vmatpush1.bf16.msra.mxu1 %v12115_v10  ;;  %v12207_v9 = vld [vmem:[#allocation5 + $0x1908] ss:$16 sps:$4 sm:$0xff]   ;;  %v12212_v10 = vld [vmem:[#allocation5 + $0x1924] ss:$16 sps:$4 sm:$0xff]  }
 0x342   :  { %8025 = vmatprep.subr.bf16.mxu0 %v12120_v12  ;;  %8804 = vmatprep.subr.bf16.mxu1 %v12123_v13  ;;  %v12215_v12 = vld [vmem:[#allocation5 + $0x192c] ss:$16 sps:$4 sm:$0xff]   ;;  %v12210_v13 = vld [vmem:[#allocation5 + $0x1920] ss:$16 sps:$4 sm:$0xff]  }
 0x345   :  { %8026 = vmatpush1.bf16.msra.mxu0 %v12118_v15  ;;  %8805 = vmatpush1.bf16.msra.mxu1 %v12121_v16  ;;  %v12213_v15 = vld [vmem:[#allocation5 + $0x1928] ss:$16 sps:$4 sm:$0xff]   ;;  %v12218_v16 = vld [vmem:[#allocation5 + $0x1944] ss:$16 sps:$4 sm:$0xff]  }
 0x346   :  { %8027 = vmatprep.subr.bf16.mxu0 %v12126_v18  ;;  %8806 = vmatprep.subr.bf16.mxu1 %v12129_v20  ;;  %v12221_v18 = vld [vmem:[#allocation5 + $0x194c] ss:$16 sps:$4 sm:$0xff]   ;;  %v12216_v20 = vld [vmem:[#allocation5 + $0x1940] ss:$16 sps:$4 sm:$0xff]  }
 0x349   :  { %8028 = vmatpush1.bf16.msra.mxu0 %v12124_v11  ;;  %8807 = vmatpush1.bf16.msra.mxu1 %v12127_v21  ;;  %v12219_v11 = vld [vmem:[#allocation5 + $0x1948] ss:$16 sps:$4 sm:$0xff]   ;;  %v12224_v21 = vld [vmem:[#allocation5 + $0x1964] ss:$16 sps:$4 sm:$0xff]  }
 0x34a   :  { %8029 = vmatprep.subr.bf16.mxu0 %v12132_v14  ;;  %8808 = vmatprep.subr.bf16.mxu1 %v12135_v23  ;;  %v12227_v14 = vld [vmem:[#allocation5 + $0x196c] ss:$16 sps:$4 sm:$0xff]   ;;  %v12222_v23 = vld [vmem:[#allocation5 + $0x1960] ss:$16 sps:$4 sm:$0xff]  }
 0x34d   :  { %8030 = vmatpush1.bf16.msra.mxu0 %v12130_v24  ;;  %8809 = vmatpush1.bf16.msra.mxu1 %v12133_v17  ;;  %v12225_v24 = vld [vmem:[#allocation5 + $0x1968] ss:$16 sps:$4 sm:$0xff]   ;;  %v12230_v17 = vld [vmem:[#allocation5 + $0x1984] ss:$16 sps:$4 sm:$0xff]  }
 0x34e   :  { %8031 = vmatprep.subr.bf16.mxu0 %v12138_v26  ;;  %8810 = vmatprep.subr.bf16.mxu1 %v12141_v27  ;;  %v12233_v26 = vld [vmem:[#allocation5 + $0x198c] ss:$16 sps:$4 sm:$0xff]   ;;  %v12228_v27 = vld [vmem:[#allocation5 + $0x1980] ss:$16 sps:$4 sm:$0xff]  }
 0x351   :  { %8032 = vmatpush1.bf16.msra.mxu0 %v12136_v19  ;;  %8811 = vmatpush1.bf16.msra.mxu1 %v12139_v29  ;;  %v12231_v19 = vld [vmem:[#allocation5 + $0x1988] ss:$16 sps:$4 sm:$0xff]   ;;  %v12236_v29 = vld [vmem:[#allocation5 + $0x19a4] ss:$16 sps:$4 sm:$0xff]  }
 0x352   :  { %8033 = vmatprep.subr.bf16.mxu0 %v12144_v30  ;;  %8812 = vmatprep.subr.bf16.mxu1 %v12147_v22  ;;  %v12239_v30 = vld [vmem:[#allocation5 + $0x19ac] ss:$16 sps:$4 sm:$0xff]   ;;  %v12234_v22 = vld [vmem:[#allocation5 + $0x19a0] ss:$16 sps:$4 sm:$0xff]  }
 0x355   :  { %8034 = vmatpush1.bf16.msra.mxu0 %v12142_v32  ;;  %8813 = vmatpush1.bf16.msra.mxu1 %v12145_v33  ;;  %v12237_v32 = vld [vmem:[#allocation5 + $0x19a8] ss:$16 sps:$4 sm:$0xff]   ;;  %v12242_v33 = vld [vmem:[#allocation5 + $0x19c4] ss:$16 sps:$4 sm:$0xff]  }
 0x356   :  { %8035 = vmatprep.subr.bf16.mxu0 %v12150_v25  ;;  %8814 = vmatprep.subr.bf16.mxu1 %v12153_v35  ;;  %v12245_v25 = vld [vmem:[#allocation5 + $0x19cc] ss:$16 sps:$4 sm:$0xff]   ;;  %v12240_v35 = vld [vmem:[#allocation5 + $0x19c0] ss:$16 sps:$4 sm:$0xff]  }
 0x359   :  { %8036 = vmatpush1.bf16.msra.mxu0 %v12148_v36  ;;  %8815 = vmatpush1.bf16.msra.mxu1 %v12151_v28  ;;  %v12243_v36 = vld [vmem:[#allocation5 + $0x19c8] ss:$16 sps:$4 sm:$0xff]   ;;  %v12248_v28 = vld [vmem:[#allocation5 + $0x19e4] ss:$16 sps:$4 sm:$0xff]  }
 0x35a   :  { %8046 = vmatprep.subr.bf16.mxu0 %v12158_v38  ;;  %8825 = vmatprep.subr.bf16.mxu1 %v12161_v39  ;;  %v12251_v38 = vld [vmem:[#allocation5 + $0x19ec] ss:$16 sps:$4 sm:$0xff]   ;;  %v12246_v39 = vld [vmem:[#allocation5 + $0x19e0] ss:$16 sps:$4 sm:$0xff]  }
 0x35c   :  { %8038 = vmatmul.mubr.bf16.vlgmr.msra.gmra.mrb[0].mxu0 %v9513_v40  ;;  %8817 = vmatmul.mubr.bf16.vlgmr.msra.gmra.mrb[0].mxu1 %v9513_v40  ;;  %v12249_v40 = vld [vmem:[#allocation5 + $0x19e8] ss:$16 sps:$4 sm:$0xff]  }
 0x35d   :  { %8047 = vmatpush1.bf16.msra.mxu0 %v12156_v41  ;;  %8826 = vmatpush1.bf16.msra.mxu1 %v12159_v42  ;;  %v12256_v41 = vld [vmem:[#allocation5 + $0x1a04] ss:$16 sps:$4 sm:$0xff]   ;;  %v12259_v42 = vld [vmem:[#allocation5 + $0x1a0c] ss:$16 sps:$4 sm:$0xff]  }
 0x35e   :  { %8048 = vmatprep.subr.bf16.mxu0 %v12164_v43  ;;  %8827 = vmatprep.subr.bf16.mxu1 %v12167_v34  ;;  %v9515_v43 = vcombine.low %v13184_v31, %v13184_v31  ;;  %v13190_v34 = vld [vmem:[#allocation2 + $0x68] sm:$0xff] }
 0x35f   :  { %8078 = vmatprep.mubr.bf16.mxu0 %v9516_v44  ;;  %8857 = vmatprep.mubr.bf16.mxu1 %v9516_v44  ;;  %v12254_v44 = vld [vmem:[#allocation5 + $0x1a00] ss:$16 sps:$4 sm:$0xff]   ;;  %v12268_v31 = vld [vmem:[#allocation5 + $0x1a44] ss:$16 sps:$4 sm:$0xff]  }
 0x361   :  { %8049 = vmatpush1.bf16.msra.mxu0 %v12162_v45  ;;  %8828 = vmatpush1.bf16.msra.mxu1 %v12165_v46  ;;  %v12257_v45 = vld [vmem:[#allocation5 + $0x1a08] ss:$16 sps:$4 sm:$0xff]   ;;  %v12262_v46 = vld [vmem:[#allocation5 + $0x1a24] ss:$16 sps:$4 sm:$0xff]  }
 0x362   :  { %8050 = vmatprep.subr.bf16.mxu0 %v12170_v37  ;;  %8829 = vmatprep.subr.bf16.mxu1 %v12173_v47  ;;  %v12265_v37 = vld [vmem:[#allocation5 + $0x1a2c] ss:$16 sps:$4 sm:$0xff]   ;;  %v9518_v47 = vcombine.high %v13190_v34, %v13190_v34 }
 0x365   :  { %8051 = vmatpush1.bf16.msra.mxu0 %v12168_v48  ;;  %8830 = vmatpush1.bf16.msra.mxu1 %v12171_v49  ;;  %v12260_v48 = vld [vmem:[#allocation5 + $0x1a20] ss:$16 sps:$4 sm:$0xff]   ;;  %v12263_v49 = vld [vmem:[#allocation5 + $0x1a28] ss:$16 sps:$4 sm:$0xff]  }
 0x366   :  { %8052 = vmatprep.subr.bf16.mxu0 %v12176_v50  ;;  %8831 = vmatprep.subr.bf16.mxu1 %v12179_v51  ;;  %v12271_v50 = vld [vmem:[#allocation5 + $0x1a4c] ss:$16 sps:$4 sm:$0xff]   ;;  %v12266_v51 = vld [vmem:[#allocation5 + $0x1a40] ss:$16 sps:$4 sm:$0xff]  }
 0x369   :  { %8053 = vmatpush1.bf16.msra.mxu0 %v12174_v52  ;;  %8832 = vmatpush1.bf16.msra.mxu1 %v12177_v53  ;;  %v12269_v52 = vld [vmem:[#allocation5 + $0x1a48] ss:$16 sps:$4 sm:$0xff]   ;;  %v12274_v53 = vld [vmem:[#allocation5 + $0x1a64] ss:$16 sps:$4 sm:$0xff]  }
 0x36a   :  { %8054 = vmatprep.subr.bf16.mxu0 %v12182_v54  ;;  %8833 = vmatprep.subr.bf16.mxu1 %v12185_v55  ;;  %v12277_v54 = vld [vmem:[#allocation5 + $0x1a6c] ss:$16 sps:$4 sm:$0xff]   ;;  %v12272_v55 = vld [vmem:[#allocation5 + $0x1a60] ss:$16 sps:$4 sm:$0xff]  }
 0x36d   :  { %8055 = vmatpush1.bf16.msra.mxu0 %v12180_v56  ;;  %8834 = vmatpush1.bf16.msra.mxu1 %v12183_v57  ;;  %v12275_v56 = vld [vmem:[#allocation5 + $0x1a68] ss:$16 sps:$4 sm:$0xff]   ;;  %v12280_v57 = vld [vmem:[#allocation5 + $0x1a84] ss:$16 sps:$4 sm:$0xff]  }
 0x36e   :  { %8056 = vmatprep.subr.bf16.mxu0 %v12188_v58  ;;  %8835 = vmatprep.subr.bf16.mxu1 %v12191_v59  ;;  %v12283_v58 = vld [vmem:[#allocation5 + $0x1a8c] ss:$16 sps:$4 sm:$0xff]   ;;  %v12278_v59 = vld [vmem:[#allocation5 + $0x1a80] ss:$16 sps:$4 sm:$0xff]  }
 0x371   :  { %8057 = vmatpush1.bf16.msra.mxu0 %v12186_v60  ;;  %8836 = vmatpush1.bf16.msra.mxu1 %v12189_v61  ;;  %v12281_v60 = vld [vmem:[#allocation5 + $0x1a88] ss:$16 sps:$4 sm:$0xff]   ;;  %v12286_v61 = vld [vmem:[#allocation5 + $0x1aa4] ss:$16 sps:$4 sm:$0xff]  }
 0x372   :  { %8058 = vmatprep.subr.bf16.mxu0 %v12194_v62  ;;  %8837 = vmatprep.subr.bf16.mxu1 %v12197_v63  ;;  %v12289_v62 = vld [vmem:[#allocation5 + $0x1aac] ss:$16 sps:$4 sm:$0xff]   ;;  %v12284_v63 = vld [vmem:[#allocation5 + $0x1aa0] ss:$16 sps:$4 sm:$0xff]  }
 0x375   :  { %8059 = vmatpush1.bf16.msra.mxu0 %v12192_v0  ;;  %8838 = vmatpush1.bf16.msra.mxu1 %v12195_v1  ;;  %v12287_v0 = vld [vmem:[#allocation5 + $0x1aa8] ss:$16 sps:$4 sm:$0xff]   ;;  %v12292_v1 = vld [vmem:[#allocation5 + $0x1ac4] ss:$16 sps:$4 sm:$0xff]  }
 0x376   :  { %8060 = vmatprep.subr.bf16.mxu0 %v12200_v2  ;;  %8839 = vmatprep.subr.bf16.mxu1 %v12203_v3  ;;  %v12295_v2 = vld [vmem:[#allocation5 + $0x1acc] ss:$16 sps:$4 sm:$0xff]   ;;  %v12290_v3 = vld [vmem:[#allocation5 + $0x1ac0] ss:$16 sps:$4 sm:$0xff]  }
 0x379   :  { %8061 = vmatpush1.bf16.msra.mxu0 %v12198_v4  ;;  %8840 = vmatpush1.bf16.msra.mxu1 %v12201_v5  ;;  %v12293_v4 = vld [vmem:[#allocation5 + $0x1ac8] ss:$16 sps:$4 sm:$0xff]   ;;  %v12298_v5 = vld [vmem:[#allocation5 + $0x1ae4] ss:$16 sps:$4 sm:$0xff]  }
 0x37a   :  { %8062 = vmatprep.subr.bf16.mxu0 %v12206_v6  ;;  %8841 = vmatprep.subr.bf16.mxu1 %v12209_v7  ;;  %v12301_v6 = vld [vmem:[#allocation5 + $0x1aec] ss:$16 sps:$4 sm:$0xff]   ;;  %v12296_v7 = vld [vmem:[#allocation5 + $0x1ae0] ss:$16 sps:$4 sm:$0xff]  }
 0x37d   :  { %8063 = vmatpush1.bf16.msra.mxu0 %v12204_v8  ;;  %8842 = vmatpush1.bf16.msra.mxu1 %v12207_v9  ;;  %v12299_v8 = vld [vmem:[#allocation5 + $0x1ae8] ss:$16 sps:$4 sm:$0xff]   ;;  %v12304_v9 = vld [vmem:[#allocation5 + $0x1b04] ss:$16 sps:$4 sm:$0xff]  }
 0x37e   :  { %8064 = vmatprep.subr.bf16.mxu0 %v12212_v10  ;;  %8843 = vmatprep.subr.bf16.mxu1 %v12215_v12  ;;  %v12307_v10 = vld [vmem:[#allocation5 + $0x1b0c] ss:$16 sps:$4 sm:$0xff]   ;;  %v12302_v12 = vld [vmem:[#allocation5 + $0x1b00] ss:$16 sps:$4 sm:$0xff]  }
 0x381   :  { %8065 = vmatpush1.bf16.msra.mxu0 %v12210_v13  ;;  %8844 = vmatpush1.bf16.msra.mxu1 %v12213_v15  ;;  %v12305_v13 = vld [vmem:[#allocation5 + $0x1b08] ss:$16 sps:$4 sm:$0xff]   ;;  %v12310_v15 = vld [vmem:[#allocation5 + $0x1b24] ss:$16 sps:$4 sm:$0xff]  }
 0x382   :  { %8066 = vmatprep.subr.bf16.mxu0 %v12218_v16  ;;  %8845 = vmatprep.subr.bf16.mxu1 %v12221_v18  ;;  %v12313_v16 = vld [vmem:[#allocation5 + $0x1b2c] ss:$16 sps:$4 sm:$0xff]   ;;  %v12308_v18 = vld [vmem:[#allocation5 + $0x1b20] ss:$16 sps:$4 sm:$0xff]  }
 0x385   :  { %8067 = vmatpush1.bf16.msra.mxu0 %v12216_v20  ;;  %8846 = vmatpush1.bf16.msra.mxu1 %v12219_v11  ;;  %v12311_v20 = vld [vmem:[#allocation5 + $0x1b28] ss:$16 sps:$4 sm:$0xff]   ;;  %v12316_v11 = vld [vmem:[#allocation5 + $0x1b44] ss:$16 sps:$4 sm:$0xff]  }
 0x386   :  { %8068 = vmatprep.subr.bf16.mxu0 %v12224_v21  ;;  %8847 = vmatprep.subr.bf16.mxu1 %v12227_v14  ;;  %v12319_v21 = vld [vmem:[#allocation5 + $0x1b4c] ss:$16 sps:$4 sm:$0xff]   ;;  %v12314_v14 = vld [vmem:[#allocation5 + $0x1b40] ss:$16 sps:$4 sm:$0xff]  }
 0x389   :  { %8069 = vmatpush1.bf16.msra.mxu0 %v12222_v23  ;;  %8848 = vmatpush1.bf16.msra.mxu1 %v12225_v24  ;;  %v12317_v23 = vld [vmem:[#allocation5 + $0x1b48] ss:$16 sps:$4 sm:$0xff]   ;;  %v12322_v24 = vld [vmem:[#allocation5 + $0x1b64] ss:$16 sps:$4 sm:$0xff]  }
 0x38a   :  { %8070 = vmatprep.subr.bf16.mxu0 %v12230_v17  ;;  %8849 = vmatprep.subr.bf16.mxu1 %v12233_v26  ;;  %v12325_v17 = vld [vmem:[#allocation5 + $0x1b6c] ss:$16 sps:$4 sm:$0xff]   ;;  %v12320_v26 = vld [vmem:[#allocation5 + $0x1b60] ss:$16 sps:$4 sm:$0xff]  }
 0x38d   :  { %8071 = vmatpush1.bf16.msra.mxu0 %v12228_v27  ;;  %8850 = vmatpush1.bf16.msra.mxu1 %v12231_v19  ;;  %v12323_v27 = vld [vmem:[#allocation5 + $0x1b68] ss:$16 sps:$4 sm:$0xff]   ;;  %v12328_v19 = vld [vmem:[#allocation5 + $0x1b84] ss:$16 sps:$4 sm:$0xff]  }
 0x38e   :  { %8072 = vmatprep.subr.bf16.mxu0 %v12236_v29  ;;  %8851 = vmatprep.subr.bf16.mxu1 %v12239_v30  ;;  %v12331_v29 = vld [vmem:[#allocation5 + $0x1b8c] ss:$16 sps:$4 sm:$0xff]   ;;  %v12326_v30 = vld [vmem:[#allocation5 + $0x1b80] ss:$16 sps:$4 sm:$0xff]  }
 0x391   :  { %8073 = vmatpush1.bf16.msra.mxu0 %v12234_v22  ;;  %8852 = vmatpush1.bf16.msra.mxu1 %v12237_v32  ;;  %v12329_v22 = vld [vmem:[#allocation5 + $0x1b88] ss:$16 sps:$4 sm:$0xff]   ;;  %v12334_v32 = vld [vmem:[#allocation5 + $0x1ba4] ss:$16 sps:$4 sm:$0xff]  }
 0x392   :  { %8074 = vmatprep.subr.bf16.mxu0 %v12242_v33  ;;  %8853 = vmatprep.subr.bf16.mxu1 %v12245_v25  ;;  %v12337_v33 = vld [vmem:[#allocation5 + $0x1bac] ss:$16 sps:$4 sm:$0xff]   ;;  %v12332_v25 = vld [vmem:[#allocation5 + $0x1ba0] ss:$16 sps:$4 sm:$0xff]  }
 0x395   :  { %8075 = vmatpush1.bf16.msra.mxu0 %v12240_v35  ;;  %8854 = vmatpush1.bf16.msra.mxu1 %v12243_v36  ;;  %v12335_v35 = vld [vmem:[#allocation5 + $0x1ba8] ss:$16 sps:$4 sm:$0xff]   ;;  %v12340_v36 = vld [vmem:[#allocation5 + $0x1bc4] ss:$16 sps:$4 sm:$0xff]  }
 0x396   :  { %8076 = vmatprep.subr.bf16.mxu0 %v12248_v28  ;;  %8855 = vmatprep.subr.bf16.mxu1 %v12251_v38  ;;  %v12343_v28 = vld [vmem:[#allocation5 + $0x1bcc] ss:$16 sps:$4 sm:$0xff]   ;;  %v12338_v38 = vld [vmem:[#allocation5 + $0x1bc0] ss:$16 sps:$4 sm:$0xff]  }
 0x399   :  { %8077 = vmatpush1.bf16.msra.mxu0 %v12246_v39  ;;  %8856 = vmatpush1.bf16.msra.mxu1 %v12249_v40  ;;  %v12341_v39 = vld [vmem:[#allocation5 + $0x1bc8] ss:$16 sps:$4 sm:$0xff]   ;;  %v12346_v40 = vld [vmem:[#allocation5 + $0x1be4] ss:$16 sps:$4 sm:$0xff]  }
 0x39a   :  { %8087 = vmatprep.subr.bf16.mxu0 %v12256_v41  ;;  %8866 = vmatprep.subr.bf16.mxu1 %v12259_v42  ;;  %v12349_v41 = vld [vmem:[#allocation5 + $0x1bec] ss:$16 sps:$4 sm:$0xff]   ;;  %v12344_v42 = vld [vmem:[#allocation5 + $0x1be0] ss:$16 sps:$4 sm:$0xff]  }
 0x39c   :  { %8079 = vmatmul.mubr.bf16.vlgmr.msra.gmra.mrb[0].mxu0 %v9515_v43  ;;  %8858 = vmatmul.mubr.bf16.vlgmr.msra.gmra.mrb[0].mxu1 %v9515_v43  ;;  %v12347_v43 = vld [vmem:[#allocation5 + $0x1be8] ss:$16 sps:$4 sm:$0xff]  }
 0x39d   :  { %8088 = vmatpush1.bf16.msra.mxu0 %v12254_v44  ;;  %8867 = vmatpush1.bf16.msra.mxu1 %v12257_v45  ;;  %v12354_v44 = vld [vmem:[#allocation5 + $0x1c04] ss:$16 sps:$4 sm:$0xff]   ;;  %v12357_v45 = vld [vmem:[#allocation5 + $0x1c0c] ss:$16 sps:$4 sm:$0xff]  }
 0x39e   :  { %8089 = vmatprep.subr.bf16.mxu0 %v12262_v46  ;;  %8868 = vmatprep.subr.bf16.mxu1 %v12265_v37  ;;  %v9517_v46 = vcombine.low %v13190_v34, %v13190_v34  ;;  %v13196_v37 = vld [vmem:[#allocation2 + $0x70] sm:$0xff]  ;;  %v12366_v34 = vld [vmem:[#allocation5 + $0x1c44] ss:$16 sps:$4 sm:$0xff]  }
 0x39f   :  { %8119 = vmatprep.mubr.bf16.mxu0 %v9518_v47  ;;  %8898 = vmatprep.mubr.bf16.mxu1 %v9518_v47  ;;  %v12352_v47 = vld [vmem:[#allocation5 + $0x1c00] ss:$16 sps:$4 sm:$0xff]  }
 0x3a1   :  { %8090 = vmatpush1.bf16.msra.mxu0 %v12260_v48  ;;  %8869 = vmatpush1.bf16.msra.mxu1 %v12263_v49  ;;  %v12355_v48 = vld [vmem:[#allocation5 + $0x1c08] ss:$16 sps:$4 sm:$0xff]   ;;  %v12360_v49 = vld [vmem:[#allocation5 + $0x1c24] ss:$16 sps:$4 sm:$0xff]  }
 0x3a2   :  { %8091 = vmatprep.subr.bf16.mxu0 %v12268_v31  ;;  %8870 = vmatprep.subr.bf16.mxu1 %v12271_v50  ;;  %v12363_v31 = vld [vmem:[#allocation5 + $0x1c2c] ss:$16 sps:$4 sm:$0xff]   ;;  %v9520_v50 = vcombine.high %v13196_v37, %v13196_v37 }
 0x3a5   :  { %8092 = vmatpush1.bf16.msra.mxu0 %v12266_v51  ;;  %8871 = vmatpush1.bf16.msra.mxu1 %v12269_v52  ;;  %v12358_v51 = vld [vmem:[#allocation5 + $0x1c20] ss:$16 sps:$4 sm:$0xff]   ;;  %v12361_v52 = vld [vmem:[#allocation5 + $0x1c28] ss:$16 sps:$4 sm:$0xff]  }
 0x3a6   :  { %8093 = vmatprep.subr.bf16.mxu0 %v12274_v53  ;;  %8872 = vmatprep.subr.bf16.mxu1 %v12277_v54  ;;  %v12369_v53 = vld [vmem:[#allocation5 + $0x1c4c] ss:$16 sps:$4 sm:$0xff]   ;;  %v12364_v54 = vld [vmem:[#allocation5 + $0x1c40] ss:$16 sps:$4 sm:$0xff]  }
 0x3a9   :  { %8094 = vmatpush1.bf16.msra.mxu0 %v12272_v55  ;;  %8873 = vmatpush1.bf16.msra.mxu1 %v12275_v56  ;;  %v12367_v55 = vld [vmem:[#allocation5 + $0x1c48] ss:$16 sps:$4 sm:$0xff]   ;;  %v12372_v56 = vld [vmem:[#allocation5 + $0x1c64] ss:$16 sps:$4 sm:$0xff]  }
 0x3aa   :  { %8095 = vmatprep.subr.bf16.mxu0 %v12280_v57  ;;  %8874 = vmatprep.subr.bf16.mxu1 %v12283_v58  ;;  %v12375_v57 = vld [vmem:[#allocation5 + $0x1c6c] ss:$16 sps:$4 sm:$0xff]   ;;  %v12370_v58 = vld [vmem:[#allocation5 + $0x1c60] ss:$16 sps:$4 sm:$0xff]  }
 0x3ad   :  { %8096 = vmatpush1.bf16.msra.mxu0 %v12278_v59  ;;  %8875 = vmatpush1.bf16.msra.mxu1 %v12281_v60  ;;  %v12373_v59 = vld [vmem:[#allocation5 + $0x1c68] ss:$16 sps:$4 sm:$0xff]   ;;  %v12378_v60 = vld [vmem:[#allocation5 + $0x1c84] ss:$16 sps:$4 sm:$0xff]  }
 0x3ae   :  { %8097 = vmatprep.subr.bf16.mxu0 %v12286_v61  ;;  %8876 = vmatprep.subr.bf16.mxu1 %v12289_v62  ;;  %v12381_v61 = vld [vmem:[#allocation5 + $0x1c8c] ss:$16 sps:$4 sm:$0xff]   ;;  %v12376_v62 = vld [vmem:[#allocation5 + $0x1c80] ss:$16 sps:$4 sm:$0xff]  }
 0x3b1   :  { %8098 = vmatpush1.bf16.msra.mxu0 %v12284_v63  ;;  %8877 = vmatpush1.bf16.msra.mxu1 %v12287_v0  ;;  %v12379_v63 = vld [vmem:[#allocation5 + $0x1c88] ss:$16 sps:$4 sm:$0xff]   ;;  %v12384_v0 = vld [vmem:[#allocation5 + $0x1ca4] ss:$16 sps:$4 sm:$0xff]  }
 0x3b2   :  { %8099 = vmatprep.subr.bf16.mxu0 %v12292_v1  ;;  %8878 = vmatprep.subr.bf16.mxu1 %v12295_v2  ;;  %v12387_v1 = vld [vmem:[#allocation5 + $0x1cac] ss:$16 sps:$4 sm:$0xff]   ;;  %v12382_v2 = vld [vmem:[#allocation5 + $0x1ca0] ss:$16 sps:$4 sm:$0xff]  }
 0x3b5   :  { %8100 = vmatpush1.bf16.msra.mxu0 %v12290_v3  ;;  %8879 = vmatpush1.bf16.msra.mxu1 %v12293_v4  ;;  %v12385_v3 = vld [vmem:[#allocation5 + $0x1ca8] ss:$16 sps:$4 sm:$0xff]   ;;  %v12390_v4 = vld [vmem:[#allocation5 + $0x1cc4] ss:$16 sps:$4 sm:$0xff]  }
 0x3b6   :  { %8101 = vmatprep.subr.bf16.mxu0 %v12298_v5  ;;  %8880 = vmatprep.subr.bf16.mxu1 %v12301_v6  ;;  %v12393_v5 = vld [vmem:[#allocation5 + $0x1ccc] ss:$16 sps:$4 sm:$0xff]   ;;  %v12388_v6 = vld [vmem:[#allocation5 + $0x1cc0] ss:$16 sps:$4 sm:$0xff]  }
 0x3b9   :  { %8102 = vmatpush1.bf16.msra.mxu0 %v12296_v7  ;;  %8881 = vmatpush1.bf16.msra.mxu1 %v12299_v8  ;;  %v12391_v7 = vld [vmem:[#allocation5 + $0x1cc8] ss:$16 sps:$4 sm:$0xff]   ;;  %v12396_v8 = vld [vmem:[#allocation5 + $0x1ce4] ss:$16 sps:$4 sm:$0xff]  }
 0x3ba   :  { %8103 = vmatprep.subr.bf16.mxu0 %v12304_v9  ;;  %8882 = vmatprep.subr.bf16.mxu1 %v12307_v10  ;;  %v12399_v9 = vld [vmem:[#allocation5 + $0x1cec] ss:$16 sps:$4 sm:$0xff]   ;;  %v12394_v10 = vld [vmem:[#allocation5 + $0x1ce0] ss:$16 sps:$4 sm:$0xff]  }
 0x3bd   :  { %8104 = vmatpush1.bf16.msra.mxu0 %v12302_v12  ;;  %8883 = vmatpush1.bf16.msra.mxu1 %v12305_v13  ;;  %v12397_v12 = vld [vmem:[#allocation5 + $0x1ce8] ss:$16 sps:$4 sm:$0xff]   ;;  %v12402_v13 = vld [vmem:[#allocation5 + $0x1d04] ss:$16 sps:$4 sm:$0xff]  }
 0x3be   :  { %8105 = vmatprep.subr.bf16.mxu0 %v12310_v15  ;;  %8884 = vmatprep.subr.bf16.mxu1 %v12313_v16  ;;  %v12405_v15 = vld [vmem:[#allocation5 + $0x1d0c] ss:$16 sps:$4 sm:$0xff]   ;;  %v12400_v16 = vld [vmem:[#allocation5 + $0x1d00] ss:$16 sps:$4 sm:$0xff]  }
 0x3c1   :  { %8106 = vmatpush1.bf16.msra.mxu0 %v12308_v18  ;;  %8885 = vmatpush1.bf16.msra.mxu1 %v12311_v20  ;;  %v12403_v18 = vld [vmem:[#allocation5 + $0x1d08] ss:$16 sps:$4 sm:$0xff]   ;;  %v12408_v20 = vld [vmem:[#allocation5 + $0x1d24] ss:$16 sps:$4 sm:$0xff]  }
 0x3c2   :  { %8107 = vmatprep.subr.bf16.mxu0 %v12316_v11  ;;  %8886 = vmatprep.subr.bf16.mxu1 %v12319_v21  ;;  %v12411_v11 = vld [vmem:[#allocation5 + $0x1d2c] ss:$16 sps:$4 sm:$0xff]   ;;  %v12406_v21 = vld [vmem:[#allocation5 + $0x1d20] ss:$16 sps:$4 sm:$0xff]  }
 0x3c5   :  { %8108 = vmatpush1.bf16.msra.mxu0 %v12314_v14  ;;  %8887 = vmatpush1.bf16.msra.mxu1 %v12317_v23  ;;  %v12409_v14 = vld [vmem:[#allocation5 + $0x1d28] ss:$16 sps:$4 sm:$0xff]   ;;  %v12414_v23 = vld [vmem:[#allocation5 + $0x1d44] ss:$16 sps:$4 sm:$0xff]  }
 0x3c6   :  { %8109 = vmatprep.subr.bf16.mxu0 %v12322_v24  ;;  %8888 = vmatprep.subr.bf16.mxu1 %v12325_v17  ;;  %v12417_v24 = vld [vmem:[#allocation5 + $0x1d4c] ss:$16 sps:$4 sm:$0xff]   ;;  %v12412_v17 = vld [vmem:[#allocation5 + $0x1d40] ss:$16 sps:$4 sm:$0xff]  }
 0x3c9   :  { %8110 = vmatpush1.bf16.msra.mxu0 %v12320_v26  ;;  %8889 = vmatpush1.bf16.msra.mxu1 %v12323_v27  ;;  %v12415_v26 = vld [vmem:[#allocation5 + $0x1d48] ss:$16 sps:$4 sm:$0xff]   ;;  %v12420_v27 = vld [vmem:[#allocation5 + $0x1d64] ss:$16 sps:$4 sm:$0xff]  }
 0x3ca   :  { %8111 = vmatprep.subr.bf16.mxu0 %v12328_v19  ;;  %8890 = vmatprep.subr.bf16.mxu1 %v12331_v29  ;;  %v12423_v19 = vld [vmem:[#allocation5 + $0x1d6c] ss:$16 sps:$4 sm:$0xff]   ;;  %v12418_v29 = vld [vmem:[#allocation5 + $0x1d60] ss:$16 sps:$4 sm:$0xff]  }
 0x3cd   :  { %8112 = vmatpush1.bf16.msra.mxu0 %v12326_v30  ;;  %8891 = vmatpush1.bf16.msra.mxu1 %v12329_v22  ;;  %v12421_v30 = vld [vmem:[#allocation5 + $0x1d68] ss:$16 sps:$4 sm:$0xff]   ;;  %v12426_v22 = vld [vmem:[#allocation5 + $0x1d84] ss:$16 sps:$4 sm:$0xff]  }
 0x3ce   :  { %8113 = vmatprep.subr.bf16.mxu0 %v12334_v32  ;;  %8892 = vmatprep.subr.bf16.mxu1 %v12337_v33  ;;  %v12429_v32 = vld [vmem:[#allocation5 + $0x1d8c] ss:$16 sps:$4 sm:$0xff]   ;;  %v12424_v33 = vld [vmem:[#allocation5 + $0x1d80] ss:$16 sps:$4 sm:$0xff]  }
 0x3d1   :  { %8114 = vmatpush1.bf16.msra.mxu0 %v12332_v25  ;;  %8893 = vmatpush1.bf16.msra.mxu1 %v12335_v35  ;;  %v12427_v25 = vld [vmem:[#allocation5 + $0x1d88] ss:$16 sps:$4 sm:$0xff]   ;;  %v12432_v35 = vld [vmem:[#allocation5 + $0x1da4] ss:$16 sps:$4 sm:$0xff]  }
 0x3d2   :  { %8115 = vmatprep.subr.bf16.mxu0 %v12340_v36  ;;  %8894 = vmatprep.subr.bf16.mxu1 %v12343_v28  ;;  %v12435_v36 = vld [vmem:[#allocation5 + $0x1dac] ss:$16 sps:$4 sm:$0xff]   ;;  %v12430_v28 = vld [vmem:[#allocation5 + $0x1da0] ss:$16 sps:$4 sm:$0xff]  }
 0x3d5   :  { %8116 = vmatpush1.bf16.msra.mxu0 %v12338_v38  ;;  %8895 = vmatpush1.bf16.msra.mxu1 %v12341_v39  ;;  %v12433_v38 = vld [vmem:[#allocation5 + $0x1da8] ss:$16 sps:$4 sm:$0xff]   ;;  %v12438_v39 = vld [vmem:[#allocation5 + $0x1dc4] ss:$16 sps:$4 sm:$0xff]  }
 0x3d6   :  { %8117 = vmatprep.subr.bf16.mxu0 %v12346_v40  ;;  %8896 = vmatprep.subr.bf16.mxu1 %v12349_v41  ;;  %v12441_v40 = vld [vmem:[#allocation5 + $0x1dcc] ss:$16 sps:$4 sm:$0xff]   ;;  %v12436_v41 = vld [vmem:[#allocation5 + $0x1dc0] ss:$16 sps:$4 sm:$0xff]  }
 0x3d9   :  { %8118 = vmatpush1.bf16.msra.mxu0 %v12344_v42  ;;  %8897 = vmatpush1.bf16.msra.mxu1 %v12347_v43  ;;  %v12439_v42 = vld [vmem:[#allocation5 + $0x1dc8] ss:$16 sps:$4 sm:$0xff]   ;;  %v12444_v43 = vld [vmem:[#allocation5 + $0x1de4] ss:$16 sps:$4 sm:$0xff]  }
 0x3da   :  { %8128 = vmatprep.subr.bf16.mxu0 %v12354_v44  ;;  %8907 = vmatprep.subr.bf16.mxu1 %v12357_v45  ;;  %v12447_v44 = vld [vmem:[#allocation5 + $0x1dec] ss:$16 sps:$4 sm:$0xff]   ;;  %v12442_v45 = vld [vmem:[#allocation5 + $0x1de0] ss:$16 sps:$4 sm:$0xff]  }
 0x3dc   :  { %8120 = vmatmul.mubr.bf16.vlgmr.msra.gmra.mrb[0].mxu0 %v9517_v46  ;;  %8899 = vmatmul.mubr.bf16.vlgmr.msra.gmra.mrb[0].mxu1 %v9517_v46  ;;  %v12445_v46 = vld [vmem:[#allocation5 + $0x1de8] ss:$16 sps:$4 sm:$0xff]  }
 0x3dd   :  { %8129 = vmatpush1.bf16.msra.mxu0 %v12352_v47  ;;  %8908 = vmatpush1.bf16.msra.mxu1 %v12355_v48  ;;  %v12452_v47 = vld [vmem:[#allocation5 + $0x1e04] ss:$16 sps:$4 sm:$0xff]   ;;  %v12455_v48 = vld [vmem:[#allocation5 + $0x1e0c] ss:$16 sps:$4 sm:$0xff]  }
 0x3de   :  { %8130 = vmatprep.subr.bf16.mxu0 %v12360_v49  ;;  %8909 = vmatprep.subr.bf16.mxu1 %v12363_v31  ;;  %v9519_v49 = vcombine.low %v13196_v37, %v13196_v37  ;;  %v13202_v31 = vld [vmem:[#allocation2 + $0x78] sm:$0xff] }
 0x3df   :  { %8160 = vmatprep.mubr.bf16.mxu0 %v9520_v50  ;;  %8939 = vmatprep.mubr.bf16.mxu1 %v9520_v50  ;;  %v12450_v50 = vld [vmem:[#allocation5 + $0x1e00] ss:$16 sps:$4 sm:$0xff]   ;;  %v12464_v37 = vld [vmem:[#allocation5 + $0x1e44] ss:$16 sps:$4 sm:$0xff]  }
 0x3e1   :  { %8131 = vmatpush1.bf16.msra.mxu0 %v12358_v51  ;;  %8910 = vmatpush1.bf16.msra.mxu1 %v12361_v52  ;;  %v12453_v51 = vld [vmem:[#allocation5 + $0x1e08] ss:$16 sps:$4 sm:$0xff]   ;;  %v12458_v52 = vld [vmem:[#allocation5 + $0x1e24] ss:$16 sps:$4 sm:$0xff]  }
 0x3e2   :  { %8132 = vmatprep.subr.bf16.mxu0 %v12366_v34  ;;  %8911 = vmatprep.subr.bf16.mxu1 %v12369_v53  ;;  %v12461_v34 = vld [vmem:[#allocation5 + $0x1e2c] ss:$16 sps:$4 sm:$0xff]   ;;  %v9522_v53 = vcombine.high %v13202_v31, %v13202_v31 }
 0x3e5   :  { %8133 = vmatpush1.bf16.msra.mxu0 %v12364_v54  ;;  %8912 = vmatpush1.bf16.msra.mxu1 %v12367_v55  ;;  %v12456_v54 = vld [vmem:[#allocation5 + $0x1e20] ss:$16 sps:$4 sm:$0xff]   ;;  %v12459_v55 = vld [vmem:[#allocation5 + $0x1e28] ss:$16 sps:$4 sm:$0xff]  }
 0x3e6   :  { %8134 = vmatprep.subr.bf16.mxu0 %v12372_v56  ;;  %8913 = vmatprep.subr.bf16.mxu1 %v12375_v57  ;;  %v12467_v56 = vld [vmem:[#allocation5 + $0x1e4c] ss:$16 sps:$4 sm:$0xff]   ;;  %v12462_v57 = vld [vmem:[#allocation5 + $0x1e40] ss:$16 sps:$4 sm:$0xff]  }
 0x3e9   :  { %8135 = vmatpush1.bf16.msra.mxu0 %v12370_v58  ;;  %8914 = vmatpush1.bf16.msra.mxu1 %v12373_v59  ;;  %v12465_v58 = vld [vmem:[#allocation5 + $0x1e48] ss:$16 sps:$4 sm:$0xff]   ;;  %v12470_v59 = vld [vmem:[#allocation5 + $0x1e64] ss:$16 sps:$4 sm:$0xff]  }
 0x3ea   :  { %8136 = vmatprep.subr.bf16.mxu0 %v12378_v60  ;;  %8915 = vmatprep.subr.bf16.mxu1 %v12381_v61  ;;  %v12473_v60 = vld [vmem:[#allocation5 + $0x1e6c] ss:$16 sps:$4 sm:$0xff]   ;;  %v12468_v61 = vld [vmem:[#allocation5 + $0x1e60] ss:$16 sps:$4 sm:$0xff]  }
 0x3ed   :  { %8137 = vmatpush1.bf16.msra.mxu0 %v12376_v62  ;;  %8916 = vmatpush1.bf16.msra.mxu1 %v12379_v63  ;;  %v12471_v62 = vld [vmem:[#allocation5 + $0x1e68] ss:$16 sps:$4 sm:$0xff]   ;;  %v12476_v63 = vld [vmem:[#allocation5 + $0x1e84] ss:$16 sps:$4 sm:$0xff]  }
 0x3ee   :  { %8138 = vmatprep.subr.bf16.mxu0 %v12384_v0  ;;  %8917 = vmatprep.subr.bf16.mxu1 %v12387_v1  ;;  %v12479_v0 = vld [vmem:[#allocation5 + $0x1e8c] ss:$16 sps:$4 sm:$0xff]   ;;  %v12474_v1 = vld [vmem:[#allocation5 + $0x1e80] ss:$16 sps:$4 sm:$0xff]  }
 0x3f1   :  { %8139 = vmatpush1.bf16.msra.mxu0 %v12382_v2  ;;  %8918 = vmatpush1.bf16.msra.mxu1 %v12385_v3  ;;  %v12477_v2 = vld [vmem:[#allocation5 + $0x1e88] ss:$16 sps:$4 sm:$0xff]   ;;  %v12482_v3 = vld [vmem:[#allocation5 + $0x1ea4] ss:$16 sps:$4 sm:$0xff]  }
 0x3f2   :  { %8140 = vmatprep.subr.bf16.mxu0 %v12390_v4  ;;  %8919 = vmatprep.subr.bf16.mxu1 %v12393_v5  ;;  %v12485_v4 = vld [vmem:[#allocation5 + $0x1eac] ss:$16 sps:$4 sm:$0xff]   ;;  %v12480_v5 = vld [vmem:[#allocation5 + $0x1ea0] ss:$16 sps:$4 sm:$0xff]  }
 0x3f5   :  { %8141 = vmatpush1.bf16.msra.mxu0 %v12388_v6  ;;  %8920 = vmatpush1.bf16.msra.mxu1 %v12391_v7  ;;  %v12483_v6 = vld [vmem:[#allocation5 + $0x1ea8] ss:$16 sps:$4 sm:$0xff]   ;;  %v12488_v7 = vld [vmem:[#allocation5 + $0x1ec4] ss:$16 sps:$4 sm:$0xff]  }
 0x3f6   :  { %8142 = vmatprep.subr.bf16.mxu0 %v12396_v8  ;;  %8921 = vmatprep.subr.bf16.mxu1 %v12399_v9  ;;  %v12491_v8 = vld [vmem:[#allocation5 + $0x1ecc] ss:$16 sps:$4 sm:$0xff]   ;;  %v12486_v9 = vld [vmem:[#allocation5 + $0x1ec0] ss:$16 sps:$4 sm:$0xff]  }
 0x3f9   :  { %8143 = vmatpush1.bf16.msra.mxu0 %v12394_v10  ;;  %8922 = vmatpush1.bf16.msra.mxu1 %v12397_v12  ;;  %v12489_v10 = vld [vmem:[#allocation5 + $0x1ec8] ss:$16 sps:$4 sm:$0xff]   ;;  %v12494_v12 = vld [vmem:[#allocation5 + $0x1ee4] ss:$16 sps:$4 sm:$0xff]  }
 0x3fa   :  { %8144 = vmatprep.subr.bf16.mxu0 %v12402_v13  ;;  %8923 = vmatprep.subr.bf16.mxu1 %v12405_v15  ;;  %v12497_v13 = vld [vmem:[#allocation5 + $0x1eec] ss:$16 sps:$4 sm:$0xff]   ;;  %v12492_v15 = vld [vmem:[#allocation5 + $0x1ee0] ss:$16 sps:$4 sm:$0xff]  }
 0x3fd   :  { %8145 = vmatpush1.bf16.msra.mxu0 %v12400_v16  ;;  %8924 = vmatpush1.bf16.msra.mxu1 %v12403_v18  ;;  %v12495_v16 = vld [vmem:[#allocation5 + $0x1ee8] ss:$16 sps:$4 sm:$0xff]   ;;  %v12500_v18 = vld [vmem:[#allocation5 + $0x1f04] ss:$16 sps:$4 sm:$0xff]  }
 0x3fe   :  { %8146 = vmatprep.subr.bf16.mxu0 %v12408_v20  ;;  %8925 = vmatprep.subr.bf16.mxu1 %v12411_v11  ;;  %v12503_v20 = vld [vmem:[#allocation5 + $0x1f0c] ss:$16 sps:$4 sm:$0xff]   ;;  %v12498_v11 = vld [vmem:[#allocation5 + $0x1f00] ss:$16 sps:$4 sm:$0xff]  }
 0x401   :  { %8147 = vmatpush1.bf16.msra.mxu0 %v12406_v21  ;;  %8926 = vmatpush1.bf16.msra.mxu1 %v12409_v14  ;;  %v12501_v21 = vld [vmem:[#allocation5 + $0x1f08] ss:$16 sps:$4 sm:$0xff]   ;;  %v12506_v14 = vld [vmem:[#allocation5 + $0x1f24] ss:$16 sps:$4 sm:$0xff]  }
 0x402   :  { %8148 = vmatprep.subr.bf16.mxu0 %v12414_v23  ;;  %8927 = vmatprep.subr.bf16.mxu1 %v12417_v24  ;;  %v12509_v23 = vld [vmem:[#allocation5 + $0x1f2c] ss:$16 sps:$4 sm:$0xff]   ;;  %v12504_v24 = vld [vmem:[#allocation5 + $0x1f20] ss:$16 sps:$4 sm:$0xff]  }
 0x405   :  { %8149 = vmatpush1.bf16.msra.mxu0 %v12412_v17  ;;  %8928 = vmatpush1.bf16.msra.mxu1 %v12415_v26  ;;  %v12507_v17 = vld [vmem:[#allocation5 + $0x1f28] ss:$16 sps:$4 sm:$0xff]   ;;  %v12512_v26 = vld [vmem:[#allocation5 + $0x1f44] ss:$16 sps:$4 sm:$0xff]  }
 0x406   :  { %8150 = vmatprep.subr.bf16.mxu0 %v12420_v27  ;;  %8929 = vmatprep.subr.bf16.mxu1 %v12423_v19  ;;  %v12515_v27 = vld [vmem:[#allocation5 + $0x1f4c] ss:$16 sps:$4 sm:$0xff]   ;;  %v12510_v19 = vld [vmem:[#allocation5 + $0x1f40] ss:$16 sps:$4 sm:$0xff]  }
 0x409   :  { %8151 = vmatpush1.bf16.msra.mxu0 %v12418_v29  ;;  %8930 = vmatpush1.bf16.msra.mxu1 %v12421_v30  ;;  %v12513_v29 = vld [vmem:[#allocation5 + $0x1f48] ss:$16 sps:$4 sm:$0xff]   ;;  %v12518_v30 = vld [vmem:[#allocation5 + $0x1f64] ss:$16 sps:$4 sm:$0xff]  }
 0x40a   :  { %8152 = vmatprep.subr.bf16.mxu0 %v12426_v22  ;;  %8931 = vmatprep.subr.bf16.mxu1 %v12429_v32  ;;  %v12521_v22 = vld [vmem:[#allocation5 + $0x1f6c] ss:$16 sps:$4 sm:$0xff]   ;;  %v12516_v32 = vld [vmem:[#allocation5 + $0x1f60] ss:$16 sps:$4 sm:$0xff]  }
 0x40d   :  { %8153 = vmatpush1.bf16.msra.mxu0 %v12424_v33  ;;  %8932 = vmatpush1.bf16.msra.mxu1 %v12427_v25  ;;  %v12519_v33 = vld [vmem:[#allocation5 + $0x1f68] ss:$16 sps:$4 sm:$0xff]   ;;  %v12524_v25 = vld [vmem:[#allocation5 + $0x1f84] ss:$16 sps:$4 sm:$0xff]  }
 0x40e   :  { %8154 = vmatprep.subr.bf16.mxu0 %v12432_v35  ;;  %8933 = vmatprep.subr.bf16.mxu1 %v12435_v36  ;;  %v12527_v35 = vld [vmem:[#allocation5 + $0x1f8c] ss:$16 sps:$4 sm:$0xff]   ;;  %v12522_v36 = vld [vmem:[#allocation5 + $0x1f80] ss:$16 sps:$4 sm:$0xff]  }
 0x411   :  { %8155 = vmatpush1.bf16.msra.mxu0 %v12430_v28  ;;  %8934 = vmatpush1.bf16.msra.mxu1 %v12433_v38  ;;  %v12525_v28 = vld [vmem:[#allocation5 + $0x1f88] ss:$16 sps:$4 sm:$0xff]   ;;  %v12530_v38 = vld [vmem:[#allocation5 + $0x1fa4] ss:$16 sps:$4 sm:$0xff]  }
 0x412   :  { %8156 = vmatprep.subr.bf16.mxu0 %v12438_v39  ;;  %8935 = vmatprep.subr.bf16.mxu1 %v12441_v40  ;;  %v12533_v39 = vld [vmem:[#allocation5 + $0x1fac] ss:$16 sps:$4 sm:$0xff]   ;;  %v12528_v40 = vld [vmem:[#allocation5 + $0x1fa0] ss:$16 sps:$4 sm:$0xff]  }
 0x415   :  { %8157 = vmatpush1.bf16.msra.mxu0 %v12436_v41  ;;  %8936 = vmatpush1.bf16.msra.mxu1 %v12439_v42  ;;  %v12531_v41 = vld [vmem:[#allocation5 + $0x1fa8] ss:$16 sps:$4 sm:$0xff]   ;;  %v12536_v42 = vld [vmem:[#allocation5 + $0x1fc4] ss:$16 sps:$4 sm:$0xff]  }
 0x416   :  { %8158 = vmatprep.subr.bf16.mxu0 %v12444_v43  ;;  %8937 = vmatprep.subr.bf16.mxu1 %v12447_v44  ;;  %v12539_v43 = vld [vmem:[#allocation5 + $0x1fcc] ss:$16 sps:$4 sm:$0xff]   ;;  %v12534_v44 = vld [vmem:[#allocation5 + $0x1fc0] ss:$16 sps:$4 sm:$0xff]  }
 0x419   :  { %8159 = vmatpush1.bf16.msra.mxu0 %v12442_v45  ;;  %8938 = vmatpush1.bf16.msra.mxu1 %v12445_v46  ;;  %v12537_v45 = vld [vmem:[#allocation5 + $0x1fc8] ss:$16 sps:$4 sm:$0xff]   ;;  %v12542_v46 = vld [vmem:[#allocation5 + $0x1fe4] ss:$16 sps:$4 sm:$0xff]  }
 0x41a   :  { %8169 = vmatprep.subr.bf16.mxu0 %v12452_v47  ;;  %8948 = vmatprep.subr.bf16.mxu1 %v12455_v48  ;;  %v12545_v47 = vld [vmem:[#allocation5 + $0x1fec] ss:$16 sps:$4 sm:$0xff]   ;;  %v12540_v48 = vld [vmem:[#allocation5 + $0x1fe0] ss:$16 sps:$4 sm:$0xff]  }
 0x41c   :  { %8161 = vmatmul.mubr.bf16.vlgmr.msra.gmra.mrb[0].mxu0 %v9519_v49  ;;  %8940 = vmatmul.mubr.bf16.vlgmr.msra.gmra.mrb[0].mxu1 %v9519_v49  ;;  %v12543_v49 = vld [vmem:[#allocation5 + $0x1fe8] ss:$16 sps:$4 sm:$0xff]  }
 0x41d   :  { %8170 = vmatpush1.bf16.msra.mxu0 %v12450_v50  ;;  %8949 = vmatpush1.bf16.msra.mxu1 %v12453_v51  ;;  %v12550_v50 = vld [vmem:[#allocation5 + $0x2004] ss:$16 sps:$4 sm:$0xff]   ;;  %v12553_v51 = vld [vmem:[#allocation5 + $0x200c] ss:$16 sps:$4 sm:$0xff]  }
 0x41e   :  { %8171 = vmatprep.subr.bf16.mxu0 %v12458_v52  ;;  %8950 = vmatprep.subr.bf16.mxu1 %v12461_v34  ;;  %v9521_v52 = vcombine.low %v13202_v31, %v13202_v31  ;;  %v13208_v34 = vld [vmem:[#allocation2 + $0x80] sm:$0xff]  ;;  %v12562_v31 = vld [vmem:[#allocation5 + $0x2044] ss:$16 sps:$4 sm:$0xff]  }
 0x41f   :  { %8201 = vmatprep.mubr.bf16.mxu0 %v9522_v53  ;;  %8980 = vmatprep.mubr.bf16.mxu1 %v9522_v53  ;;  %v12548_v53 = vld [vmem:[#allocation5 + $0x2000] ss:$16 sps:$4 sm:$0xff]  }
 0x421   :  { %8172 = vmatpush1.bf16.msra.mxu0 %v12456_v54  ;;  %8951 = vmatpush1.bf16.msra.mxu1 %v12459_v55  ;;  %v12551_v54 = vld [vmem:[#allocation5 + $0x2008] ss:$16 sps:$4 sm:$0xff]   ;;  %v12556_v55 = vld [vmem:[#allocation5 + $0x2024] ss:$16 sps:$4 sm:$0xff]  }
 0x422   :  { %8173 = vmatprep.subr.bf16.mxu0 %v12464_v37  ;;  %8952 = vmatprep.subr.bf16.mxu1 %v12467_v56  ;;  %v12559_v37 = vld [vmem:[#allocation5 + $0x202c] ss:$16 sps:$4 sm:$0xff]   ;;  %v9524_v56 = vcombine.high %v13208_v34, %v13208_v34 }
 0x425   :  { %8174 = vmatpush1.bf16.msra.mxu0 %v12462_v57  ;;  %8953 = vmatpush1.bf16.msra.mxu1 %v12465_v58  ;;  %v12554_v57 = vld [vmem:[#allocation5 + $0x2020] ss:$16 sps:$4 sm:$0xff]   ;;  %v12557_v58 = vld [vmem:[#allocation5 + $0x2028] ss:$16 sps:$4 sm:$0xff]  }
 0x426   :  { %8175 = vmatprep.subr.bf16.mxu0 %v12470_v59  ;;  %8954 = vmatprep.subr.bf16.mxu1 %v12473_v60  ;;  %v12565_v59 = vld [vmem:[#allocation5 + $0x204c] ss:$16 sps:$4 sm:$0xff]   ;;  %v12560_v60 = vld [vmem:[#allocation5 + $0x2040] ss:$16 sps:$4 sm:$0xff]  }
 0x429   :  { %8176 = vmatpush1.bf16.msra.mxu0 %v12468_v61  ;;  %8955 = vmatpush1.bf16.msra.mxu1 %v12471_v62  ;;  %v12563_v61 = vld [vmem:[#allocation5 + $0x2048] ss:$16 sps:$4 sm:$0xff]   ;;  %v12568_v62 = vld [vmem:[#allocation5 + $0x2064] ss:$16 sps:$4 sm:$0xff]  }
 0x42a   :  { %8177 = vmatprep.subr.bf16.mxu0 %v12476_v63  ;;  %8956 = vmatprep.subr.bf16.mxu1 %v12479_v0  ;;  %v12571_v63 = vld [vmem:[#allocation5 + $0x206c] ss:$16 sps:$4 sm:$0xff]   ;;  %v12566_v0 = vld [vmem:[#allocation5 + $0x2060] ss:$16 sps:$4 sm:$0xff]  }
 0x42d   :  { %8178 = vmatpush1.bf16.msra.mxu0 %v12474_v1  ;;  %8957 = vmatpush1.bf16.msra.mxu1 %v12477_v2  ;;  %v12569_v1 = vld [vmem:[#allocation5 + $0x2068] ss:$16 sps:$4 sm:$0xff]   ;;  %v12574_v2 = vld [vmem:[#allocation5 + $0x2084] ss:$16 sps:$4 sm:$0xff]  }
 0x42e   :  { %8179 = vmatprep.subr.bf16.mxu0 %v12482_v3  ;;  %8958 = vmatprep.subr.bf16.mxu1 %v12485_v4  ;;  %v12577_v3 = vld [vmem:[#allocation5 + $0x208c] ss:$16 sps:$4 sm:$0xff]   ;;  %v12572_v4 = vld [vmem:[#allocation5 + $0x2080] ss:$16 sps:$4 sm:$0xff]  }
 0x431   :  { %8180 = vmatpush1.bf16.msra.mxu0 %v12480_v5  ;;  %8959 = vmatpush1.bf16.msra.mxu1 %v12483_v6  ;;  %v12575_v5 = vld [vmem:[#allocation5 + $0x2088] ss:$16 sps:$4 sm:$0xff]   ;;  %v12580_v6 = vld [vmem:[#allocation5 + $0x20a4] ss:$16 sps:$4 sm:$0xff]  }
 0x432   :  { %8181 = vmatprep.subr.bf16.mxu0 %v12488_v7  ;;  %8960 = vmatprep.subr.bf16.mxu1 %v12491_v8  ;;  %v12583_v7 = vld [vmem:[#allocation5 + $0x20ac] ss:$16 sps:$4 sm:$0xff]   ;;  %v12578_v8 = vld [vmem:[#allocation5 + $0x20a0] ss:$16 sps:$4 sm:$0xff]  }
 0x435   :  { %8182 = vmatpush1.bf16.msra.mxu0 %v12486_v9  ;;  %8961 = vmatpush1.bf16.msra.mxu1 %v12489_v10  ;;  %v12581_v9 = vld [vmem:[#allocation5 + $0x20a8] ss:$16 sps:$4 sm:$0xff]   ;;  %v12586_v10 = vld [vmem:[#allocation5 + $0x20c4] ss:$16 sps:$4 sm:$0xff]  }
 0x436   :  { %8183 = vmatprep.subr.bf16.mxu0 %v12494_v12  ;;  %8962 = vmatprep.subr.bf16.mxu1 %v12497_v13  ;;  %v12589_v12 = vld [vmem:[#allocation5 + $0x20cc] ss:$16 sps:$4 sm:$0xff]   ;;  %v12584_v13 = vld [vmem:[#allocation5 + $0x20c0] ss:$16 sps:$4 sm:$0xff]  }
 0x439   :  { %8184 = vmatpush1.bf16.msra.mxu0 %v12492_v15  ;;  %8963 = vmatpush1.bf16.msra.mxu1 %v12495_v16  ;;  %v12587_v15 = vld [vmem:[#allocation5 + $0x20c8] ss:$16 sps:$4 sm:$0xff]   ;;  %v12592_v16 = vld [vmem:[#allocation5 + $0x20e4] ss:$16 sps:$4 sm:$0xff]  }
 0x43a   :  { %8185 = vmatprep.subr.bf16.mxu0 %v12500_v18  ;;  %8964 = vmatprep.subr.bf16.mxu1 %v12503_v20  ;;  %v12595_v18 = vld [vmem:[#allocation5 + $0x20ec] ss:$16 sps:$4 sm:$0xff]   ;;  %v12590_v20 = vld [vmem:[#allocation5 + $0x20e0] ss:$16 sps:$4 sm:$0xff]  }
 0x43d   :  { %8186 = vmatpush1.bf16.msra.mxu0 %v12498_v11  ;;  %8965 = vmatpush1.bf16.msra.mxu1 %v12501_v21  ;;  %v12593_v11 = vld [vmem:[#allocation5 + $0x20e8] ss:$16 sps:$4 sm:$0xff]   ;;  %v12598_v21 = vld [vmem:[#allocation5 + $0x2104] ss:$16 sps:$4 sm:$0xff]  }
 0x43e   :  { %8187 = vmatprep.subr.bf16.mxu0 %v12506_v14  ;;  %8966 = vmatprep.subr.bf16.mxu1 %v12509_v23  ;;  %v12601_v14 = vld [vmem:[#allocation5 + $0x210c] ss:$16 sps:$4 sm:$0xff]   ;;  %v12596_v23 = vld [vmem:[#allocation5 + $0x2100] ss:$16 sps:$4 sm:$0xff]  }
 0x441   :  { %8188 = vmatpush1.bf16.msra.mxu0 %v12504_v24  ;;  %8967 = vmatpush1.bf16.msra.mxu1 %v12507_v17  ;;  %v12599_v24 = vld [vmem:[#allocation5 + $0x2108] ss:$16 sps:$4 sm:$0xff]   ;;  %v12604_v17 = vld [vmem:[#allocation5 + $0x2124] ss:$16 sps:$4 sm:$0xff]  }
 0x442   :  { %8189 = vmatprep.subr.bf16.mxu0 %v12512_v26  ;;  %8968 = vmatprep.subr.bf16.mxu1 %v12515_v27  ;;  %v12607_v26 = vld [vmem:[#allocation5 + $0x212c] ss:$16 sps:$4 sm:$0xff]   ;;  %v12602_v27 = vld [vmem:[#allocation5 + $0x2120] ss:$16 sps:$4 sm:$0xff]  }
 0x445   :  { %8190 = vmatpush1.bf16.msra.mxu0 %v12510_v19  ;;  %8969 = vmatpush1.bf16.msra.mxu1 %v12513_v29  ;;  %v12605_v19 = vld [vmem:[#allocation5 + $0x2128] ss:$16 sps:$4 sm:$0xff]   ;;  %v12610_v29 = vld [vmem:[#allocation5 + $0x2144] ss:$16 sps:$4 sm:$0xff]  }
 0x446   :  { %8191 = vmatprep.subr.bf16.mxu0 %v12518_v30  ;;  %8970 = vmatprep.subr.bf16.mxu1 %v12521_v22  ;;  %v12613_v30 = vld [vmem:[#allocation5 + $0x214c] ss:$16 sps:$4 sm:$0xff]   ;;  %v12608_v22 = vld [vmem:[#allocation5 + $0x2140] ss:$16 sps:$4 sm:$0xff]  }
 0x449   :  { %8192 = vmatpush1.bf16.msra.mxu0 %v12516_v32  ;;  %8971 = vmatpush1.bf16.msra.mxu1 %v12519_v33  ;;  %v12611_v32 = vld [vmem:[#allocation5 + $0x2148] ss:$16 sps:$4 sm:$0xff]   ;;  %v12616_v33 = vld [vmem:[#allocation5 + $0x2164] ss:$16 sps:$4 sm:$0xff]  }
 0x44a   :  { %8193 = vmatprep.subr.bf16.mxu0 %v12524_v25  ;;  %8972 = vmatprep.subr.bf16.mxu1 %v12527_v35  ;;  %v12619_v25 = vld [vmem:[#allocation5 + $0x216c] ss:$16 sps:$4 sm:$0xff]   ;;  %v12614_v35 = vld [vmem:[#allocation5 + $0x2160] ss:$16 sps:$4 sm:$0xff]  }
 0x44d   :  { %8194 = vmatpush1.bf16.msra.mxu0 %v12522_v36  ;;  %8973 = vmatpush1.bf16.msra.mxu1 %v12525_v28  ;;  %v12617_v36 = vld [vmem:[#allocation5 + $0x2168] ss:$16 sps:$4 sm:$0xff]   ;;  %v12622_v28 = vld [vmem:[#allocation5 + $0x2184] ss:$16 sps:$4 sm:$0xff]  }
 0x44e   :  { %8195 = vmatprep.subr.bf16.mxu0 %v12530_v38  ;;  %8974 = vmatprep.subr.bf16.mxu1 %v12533_v39  ;;  %v12625_v38 = vld [vmem:[#allocation5 + $0x218c] ss:$16 sps:$4 sm:$0xff]   ;;  %v12620_v39 = vld [vmem:[#allocation5 + $0x2180] ss:$16 sps:$4 sm:$0xff]  }
 0x451   :  { %8196 = vmatpush1.bf16.msra.mxu0 %v12528_v40  ;;  %8975 = vmatpush1.bf16.msra.mxu1 %v12531_v41  ;;  %v12623_v40 = vld [vmem:[#allocation5 + $0x2188] ss:$16 sps:$4 sm:$0xff]   ;;  %v12628_v41 = vld [vmem:[#allocation5 + $0x21a4] ss:$16 sps:$4 sm:$0xff]  }
 0x452   :  { %8197 = vmatprep.subr.bf16.mxu0 %v12536_v42  ;;  %8976 = vmatprep.subr.bf16.mxu1 %v12539_v43  ;;  %v12631_v42 = vld [vmem:[#allocation5 + $0x21ac] ss:$16 sps:$4 sm:$0xff]   ;;  %v12626_v43 = vld [vmem:[#allocation5 + $0x21a0] ss:$16 sps:$4 sm:$0xff]  }
 0x455   :  { %8198 = vmatpush1.bf16.msra.mxu0 %v12534_v44  ;;  %8977 = vmatpush1.bf16.msra.mxu1 %v12537_v45  ;;  %v12629_v44 = vld [vmem:[#allocation5 + $0x21a8] ss:$16 sps:$4 sm:$0xff]   ;;  %v12634_v45 = vld [vmem:[#allocation5 + $0x21c4] ss:$16 sps:$4 sm:$0xff]  }
 0x456   :  { %8199 = vmatprep.subr.bf16.mxu0 %v12542_v46  ;;  %8978 = vmatprep.subr.bf16.mxu1 %v12545_v47  ;;  %v12637_v46 = vld [vmem:[#allocation5 + $0x21cc] ss:$16 sps:$4 sm:$0xff]   ;;  %v12632_v47 = vld [vmem:[#allocation5 + $0x21c0] ss:$16 sps:$4 sm:$0xff]  }
 0x459   :  { %8200 = vmatpush1.bf16.msra.mxu0 %v12540_v48  ;;  %8979 = vmatpush1.bf16.msra.mxu1 %v12543_v49  ;;  %v12635_v48 = vld [vmem:[#allocation5 + $0x21c8] ss:$16 sps:$4 sm:$0xff]   ;;  %v12640_v49 = vld [vmem:[#allocation5 + $0x21e4] ss:$16 sps:$4 sm:$0xff]  }
 0x45a   :  { %8210 = vmatprep.subr.bf16.mxu0 %v12550_v50  ;;  %8989 = vmatprep.subr.bf16.mxu1 %v12553_v51  ;;  %v12643_v50 = vld [vmem:[#allocation5 + $0x21ec] ss:$16 sps:$4 sm:$0xff]   ;;  %v12638_v51 = vld [vmem:[#allocation5 + $0x21e0] ss:$16 sps:$4 sm:$0xff]  }
 0x45c   :  { %8202 = vmatmul.mubr.bf16.vlgmr.msra.gmra.mrb[0].mxu0 %v9521_v52  ;;  %8981 = vmatmul.mubr.bf16.vlgmr.msra.gmra.mrb[0].mxu1 %v9521_v52  ;;  %v12641_v52 = vld [vmem:[#allocation5 + $0x21e8] ss:$16 sps:$4 sm:$0xff]  }
 0x45d   :  { %8211 = vmatpush1.bf16.msra.mxu0 %v12548_v53  ;;  %8990 = vmatpush1.bf16.msra.mxu1 %v12551_v54  ;;  %v12648_v53 = vld [vmem:[#allocation5 + $0x2204] ss:$16 sps:$4 sm:$0xff]   ;;  %v12651_v54 = vld [vmem:[#allocation5 + $0x220c] ss:$16 sps:$4 sm:$0xff]  }
 0x45e   :  { %8212 = vmatprep.subr.bf16.mxu0 %v12556_v55  ;;  %8991 = vmatprep.subr.bf16.mxu1 %v12559_v37  ;;  %v9523_v55 = vcombine.low %v13208_v34, %v13208_v34  ;;  %v13214_v37 = vld [vmem:[#allocation2 + $0x88] sm:$0xff] }
 0x45f   :  { %8242 = vmatprep.mubr.bf16.mxu0 %v9524_v56  ;;  %9021 = vmatprep.mubr.bf16.mxu1 %v9524_v56  ;;  %v12646_v56 = vld [vmem:[#allocation5 + $0x2200] ss:$16 sps:$4 sm:$0xff]   ;;  %v12660_v34 = vld [vmem:[#allocation5 + $0x2244] ss:$16 sps:$4 sm:$0xff]  }
 0x461   :  { %8213 = vmatpush1.bf16.msra.mxu0 %v12554_v57  ;;  %8992 = vmatpush1.bf16.msra.mxu1 %v12557_v58  ;;  %v12649_v57 = vld [vmem:[#allocation5 + $0x2208] ss:$16 sps:$4 sm:$0xff]   ;;  %v12654_v58 = vld [vmem:[#allocation5 + $0x2224] ss:$16 sps:$4 sm:$0xff]  }
 0x462   :  { %8214 = vmatprep.subr.bf16.mxu0 %v12562_v31  ;;  %8993 = vmatprep.subr.bf16.mxu1 %v12565_v59  ;;  %v12657_v31 = vld [vmem:[#allocation5 + $0x222c] ss:$16 sps:$4 sm:$0xff]   ;;  %v9526_v59 = vcombine.high %v13214_v37, %v13214_v37 }
 0x465   :  { %8215 = vmatpush1.bf16.msra.mxu0 %v12560_v60  ;;  %8994 = vmatpush1.bf16.msra.mxu1 %v12563_v61  ;;  %v12652_v60 = vld [vmem:[#allocation5 + $0x2220] ss:$16 sps:$4 sm:$0xff]   ;;  %v12655_v61 = vld [vmem:[#allocation5 + $0x2228] ss:$16 sps:$4 sm:$0xff]  }
 0x466   :  { %8216 = vmatprep.subr.bf16.mxu0 %v12568_v62  ;;  %8995 = vmatprep.subr.bf16.mxu1 %v12571_v63  ;;  %v12663_v62 = vld [vmem:[#allocation5 + $0x224c] ss:$16 sps:$4 sm:$0xff]   ;;  %v12658_v63 = vld [vmem:[#allocation5 + $0x2240] ss:$16 sps:$4 sm:$0xff]  }
 0x469   :  { %8217 = vmatpush1.bf16.msra.mxu0 %v12566_v0  ;;  %8996 = vmatpush1.bf16.msra.mxu1 %v12569_v1  ;;  %v12661_v0 = vld [vmem:[#allocation5 + $0x2248] ss:$16 sps:$4 sm:$0xff]   ;;  %v12666_v1 = vld [vmem:[#allocation5 + $0x2264] ss:$16 sps:$4 sm:$0xff]  }
 0x46a   :  { %8218 = vmatprep.subr.bf16.mxu0 %v12574_v2  ;;  %8997 = vmatprep.subr.bf16.mxu1 %v12577_v3  ;;  %v12669_v2 = vld [vmem:[#allocation5 + $0x226c] ss:$16 sps:$4 sm:$0xff]   ;;  %v12664_v3 = vld [vmem:[#allocation5 + $0x2260] ss:$16 sps:$4 sm:$0xff]  }
 0x46d   :  { %8219 = vmatpush1.bf16.msra.mxu0 %v12572_v4  ;;  %8998 = vmatpush1.bf16.msra.mxu1 %v12575_v5  ;;  %v12667_v4 = vld [vmem:[#allocation5 + $0x2268] ss:$16 sps:$4 sm:$0xff]   ;;  %v12672_v5 = vld [vmem:[#allocation5 + $0x2284] ss:$16 sps:$4 sm:$0xff]  }
 0x46e   :  { %8220 = vmatprep.subr.bf16.mxu0 %v12580_v6  ;;  %8999 = vmatprep.subr.bf16.mxu1 %v12583_v7  ;;  %v12675_v6 = vld [vmem:[#allocation5 + $0x228c] ss:$16 sps:$4 sm:$0xff]   ;;  %v12670_v7 = vld [vmem:[#allocation5 + $0x2280] ss:$16 sps:$4 sm:$0xff]  }
 0x471   :  { %8221 = vmatpush1.bf16.msra.mxu0 %v12578_v8  ;;  %9000 = vmatpush1.bf16.msra.mxu1 %v12581_v9  ;;  %v12673_v8 = vld [vmem:[#allocation5 + $0x2288] ss:$16 sps:$4 sm:$0xff]   ;;  %v12678_v9 = vld [vmem:[#allocation5 + $0x22a4] ss:$16 sps:$4 sm:$0xff]  }
 0x472   :  { %8222 = vmatprep.subr.bf16.mxu0 %v12586_v10  ;;  %9001 = vmatprep.subr.bf16.mxu1 %v12589_v12  ;;  %v12681_v10 = vld [vmem:[#allocation5 + $0x22ac] ss:$16 sps:$4 sm:$0xff]   ;;  %v12676_v12 = vld [vmem:[#allocation5 + $0x22a0] ss:$16 sps:$4 sm:$0xff]  }
 0x475   :  { %8223 = vmatpush1.bf16.msra.mxu0 %v12584_v13  ;;  %9002 = vmatpush1.bf16.msra.mxu1 %v12587_v15  ;;  %v12679_v13 = vld [vmem:[#allocation5 + $0x22a8] ss:$16 sps:$4 sm:$0xff]   ;;  %v12684_v15 = vld [vmem:[#allocation5 + $0x22c4] ss:$16 sps:$4 sm:$0xff]  }
 0x476   :  { %8224 = vmatprep.subr.bf16.mxu0 %v12592_v16  ;;  %9003 = vmatprep.subr.bf16.mxu1 %v12595_v18  ;;  %v12687_v16 = vld [vmem:[#allocation5 + $0x22cc] ss:$16 sps:$4 sm:$0xff]   ;;  %v12682_v18 = vld [vmem:[#allocation5 + $0x22c0] ss:$16 sps:$4 sm:$0xff]  }
 0x479   :  { %8225 = vmatpush1.bf16.msra.mxu0 %v12590_v20  ;;  %9004 = vmatpush1.bf16.msra.mxu1 %v12593_v11  ;;  %v12685_v20 = vld [vmem:[#allocation5 + $0x22c8] ss:$16 sps:$4 sm:$0xff]   ;;  %v12690_v11 = vld [vmem:[#allocation5 + $0x22e4] ss:$16 sps:$4 sm:$0xff]  }
 0x47a   :  { %8226 = vmatprep.subr.bf16.mxu0 %v12598_v21  ;;  %9005 = vmatprep.subr.bf16.mxu1 %v12601_v14  ;;  %v12693_v21 = vld [vmem:[#allocation5 + $0x22ec] ss:$16 sps:$4 sm:$0xff]   ;;  %v12688_v14 = vld [vmem:[#allocation5 + $0x22e0] ss:$16 sps:$4 sm:$0xff]  }
 0x47d   :  { %8227 = vmatpush1.bf16.msra.mxu0 %v12596_v23  ;;  %9006 = vmatpush1.bf16.msra.mxu1 %v12599_v24  ;;  %v12691_v23 = vld [vmem:[#allocation5 + $0x22e8] ss:$16 sps:$4 sm:$0xff]   ;;  %v12696_v24 = vld [vmem:[#allocation5 + $0x2304] ss:$16 sps:$4 sm:$0xff]  }
 0x47e   :  { %8228 = vmatprep.subr.bf16.mxu0 %v12604_v17  ;;  %9007 = vmatprep.subr.bf16.mxu1 %v12607_v26  ;;  %v12699_v17 = vld [vmem:[#allocation5 + $0x230c] ss:$16 sps:$4 sm:$0xff]   ;;  %v12694_v26 = vld [vmem:[#allocation5 + $0x2300] ss:$16 sps:$4 sm:$0xff]  }
 0x481   :  { %8229 = vmatpush1.bf16.msra.mxu0 %v12602_v27  ;;  %9008 = vmatpush1.bf16.msra.mxu1 %v12605_v19  ;;  %v12697_v27 = vld [vmem:[#allocation5 + $0x2308] ss:$16 sps:$4 sm:$0xff]   ;;  %v12702_v19 = vld [vmem:[#allocation5 + $0x2324] ss:$16 sps:$4 sm:$0xff]  }
 0x482   :  { %8230 = vmatprep.subr.bf16.mxu0 %v12610_v29  ;;  %9009 = vmatprep.subr.bf16.mxu1 %v12613_v30  ;;  %v12705_v29 = vld [vmem:[#allocation5 + $0x232c] ss:$16 sps:$4 sm:$0xff]   ;;  %v12700_v30 = vld [vmem:[#allocation5 + $0x2320] ss:$16 sps:$4 sm:$0xff]  }
 0x485   :  { %8231 = vmatpush1.bf16.msra.mxu0 %v12608_v22  ;;  %9010 = vmatpush1.bf16.msra.mxu1 %v12611_v32  ;;  %v12703_v22 = vld [vmem:[#allocation5 + $0x2328] ss:$16 sps:$4 sm:$0xff]   ;;  %v12708_v32 = vld [vmem:[#allocation5 + $0x2344] ss:$16 sps:$4 sm:$0xff]  }
 0x486   :  { %8232 = vmatprep.subr.bf16.mxu0 %v12616_v33  ;;  %9011 = vmatprep.subr.bf16.mxu1 %v12619_v25  ;;  %v12711_v33 = vld [vmem:[#allocation5 + $0x234c] ss:$16 sps:$4 sm:$0xff]   ;;  %v12706_v25 = vld [vmem:[#allocation5 + $0x2340] ss:$16 sps:$4 sm:$0xff]  }
 0x489   :  { %8233 = vmatpush1.bf16.msra.mxu0 %v12614_v35  ;;  %9012 = vmatpush1.bf16.msra.mxu1 %v12617_v36  ;;  %v12709_v35 = vld [vmem:[#allocation5 + $0x2348] ss:$16 sps:$4 sm:$0xff]   ;;  %v12714_v36 = vld [vmem:[#allocation5 + $0x2364] ss:$16 sps:$4 sm:$0xff]  }
 0x48a   :  { %8234 = vmatprep.subr.bf16.mxu0 %v12622_v28  ;;  %9013 = vmatprep.subr.bf16.mxu1 %v12625_v38  ;;  %v12717_v28 = vld [vmem:[#allocation5 + $0x236c] ss:$16 sps:$4 sm:$0xff]   ;;  %v12712_v38 = vld [vmem:[#allocation5 + $0x2360] ss:$16 sps:$4 sm:$0xff]  }
 0x48d   :  { %8235 = vmatpush1.bf16.msra.mxu0 %v12620_v39  ;;  %9014 = vmatpush1.bf16.msra.mxu1 %v12623_v40  ;;  %v12715_v39 = vld [vmem:[#allocation5 + $0x2368] ss:$16 sps:$4 sm:$0xff]   ;;  %v12720_v40 = vld [vmem:[#allocation5 + $0x2384] ss:$16 sps:$4 sm:$0xff]  }
 0x48e   :  { %8236 = vmatprep.subr.bf16.mxu0 %v12628_v41  ;;  %9015 = vmatprep.subr.bf16.mxu1 %v12631_v42  ;;  %v12723_v41 = vld [vmem:[#allocation5 + $0x238c] ss:$16 sps:$4 sm:$0xff]   ;;  %v12718_v42 = vld [vmem:[#allocation5 + $0x2380] ss:$16 sps:$4 sm:$0xff]  }
 0x491   :  { %8237 = vmatpush1.bf16.msra.mxu0 %v12626_v43  ;;  %9016 = vmatpush1.bf16.msra.mxu1 %v12629_v44  ;;  %v12721_v43 = vld [vmem:[#allocation5 + $0x2388] ss:$16 sps:$4 sm:$0xff]   ;;  %v12726_v44 = vld [vmem:[#allocation5 + $0x23a4] ss:$16 sps:$4 sm:$0xff]  }
 0x492   :  { %8238 = vmatprep.subr.bf16.mxu0 %v12634_v45  ;;  %9017 = vmatprep.subr.bf16.mxu1 %v12637_v46  ;;  %v12729_v45 = vld [vmem:[#allocation5 + $0x23ac] ss:$16 sps:$4 sm:$0xff]   ;;  %v12724_v46 = vld [vmem:[#allocation5 + $0x23a0] ss:$16 sps:$4 sm:$0xff]  }
 0x495   :  { %8239 = vmatpush1.bf16.msra.mxu0 %v12632_v47  ;;  %9018 = vmatpush1.bf16.msra.mxu1 %v12635_v48  ;;  %v12727_v47 = vld [vmem:[#allocation5 + $0x23a8] ss:$16 sps:$4 sm:$0xff]   ;;  %v12732_v48 = vld [vmem:[#allocation5 + $0x23c4] ss:$16 sps:$4 sm:$0xff]  }
 0x496   :  { %8240 = vmatprep.subr.bf16.mxu0 %v12640_v49  ;;  %9019 = vmatprep.subr.bf16.mxu1 %v12643_v50  ;;  %v12735_v49 = vld [vmem:[#allocation5 + $0x23cc] ss:$16 sps:$4 sm:$0xff]   ;;  %v12730_v50 = vld [vmem:[#allocation5 + $0x23c0] ss:$16 sps:$4 sm:$0xff]  }
 0x499   :  { %8241 = vmatpush1.bf16.msra.mxu0 %v12638_v51  ;;  %9020 = vmatpush1.bf16.msra.mxu1 %v12641_v52  ;;  %v12733_v51 = vld [vmem:[#allocation5 + $0x23c8] ss:$16 sps:$4 sm:$0xff]   ;;  %v12738_v52 = vld [vmem:[#allocation5 + $0x23e4] ss:$16 sps:$4 sm:$0xff]  }
 0x49a   :  { %8251 = vmatprep.subr.bf16.mxu0 %v12648_v53  ;;  %9030 = vmatprep.subr.bf16.mxu1 %v12651_v54  ;;  %v12741_v53 = vld [vmem:[#allocation5 + $0x23ec] ss:$16 sps:$4 sm:$0xff]   ;;  %v12736_v54 = vld [vmem:[#allocation5 + $0x23e0] ss:$16 sps:$4 sm:$0xff]  }
 0x49c   :  { %8243 = vmatmul.mubr.bf16.vlgmr.msra.gmra.mrb[0].mxu0 %v9523_v55  ;;  %9022 = vmatmul.mubr.bf16.vlgmr.msra.gmra.mrb[0].mxu1 %v9523_v55  ;;  %v12739_v55 = vld [vmem:[#allocation5 + $0x23e8] ss:$16 sps:$4 sm:$0xff]  }
 0x49d   :  { %8252 = vmatpush1.bf16.msra.mxu0 %v12646_v56  ;;  %9031 = vmatpush1.bf16.msra.mxu1 %v12649_v57  ;;  %v12746_v56 = vld [vmem:[#allocation5 + $0x2404] ss:$16 sps:$4 sm:$0xff]   ;;  %v12749_v57 = vld [vmem:[#allocation5 + $0x240c] ss:$16 sps:$4 sm:$0xff]  }
 0x49e   :  { %8253 = vmatprep.subr.bf16.mxu0 %v12654_v58  ;;  %9032 = vmatprep.subr.bf16.mxu1 %v12657_v31  ;;  %v9525_v58 = vcombine.low %v13214_v37, %v13214_v37  ;;  %v13220_v31 = vld [vmem:[#allocation2 + $0x90] sm:$0xff]  ;;  %v12758_v37 = vld [vmem:[#allocation5 + $0x2444] ss:$16 sps:$4 sm:$0xff]  }
 0x49f   :  { %8283 = vmatprep.mubr.bf16.mxu0 %v9526_v59  ;;  %9062 = vmatprep.mubr.bf16.mxu1 %v9526_v59  ;;  %v12744_v59 = vld [vmem:[#allocation5 + $0x2400] ss:$16 sps:$4 sm:$0xff]  }
 0x4a1   :  { %8254 = vmatpush1.bf16.msra.mxu0 %v12652_v60  ;;  %9033 = vmatpush1.bf16.msra.mxu1 %v12655_v61  ;;  %v12747_v60 = vld [vmem:[#allocation5 + $0x2408] ss:$16 sps:$4 sm:$0xff]   ;;  %v12752_v61 = vld [vmem:[#allocation5 + $0x2424] ss:$16 sps:$4 sm:$0xff]  }
 0x4a2   :  { %8255 = vmatprep.subr.bf16.mxu0 %v12660_v34  ;;  %9034 = vmatprep.subr.bf16.mxu1 %v12663_v62  ;;  %v12755_v34 = vld [vmem:[#allocation5 + $0x242c] ss:$16 sps:$4 sm:$0xff]   ;;  %v9528_v62 = vcombine.high %v13220_v31, %v13220_v31 }
 0x4a5   :  { %8256 = vmatpush1.bf16.msra.mxu0 %v12658_v63  ;;  %9035 = vmatpush1.bf16.msra.mxu1 %v12661_v0  ;;  %v12750_v63 = vld [vmem:[#allocation5 + $0x2420] ss:$16 sps:$4 sm:$0xff]   ;;  %v12753_v0 = vld [vmem:[#allocation5 + $0x2428] ss:$16 sps:$4 sm:$0xff]  }
 0x4a6   :  { %8257 = vmatprep.subr.bf16.mxu0 %v12666_v1  ;;  %9036 = vmatprep.subr.bf16.mxu1 %v12669_v2  ;;  %v12761_v1 = vld [vmem:[#allocation5 + $0x244c] ss:$16 sps:$4 sm:$0xff]   ;;  %v12756_v2 = vld [vmem:[#allocation5 + $0x2440] ss:$16 sps:$4 sm:$0xff]  }
 0x4a9   :  { %8258 = vmatpush1.bf16.msra.mxu0 %v12664_v3  ;;  %9037 = vmatpush1.bf16.msra.mxu1 %v12667_v4  ;;  %v12759_v3 = vld [vmem:[#allocation5 + $0x2448] ss:$16 sps:$4 sm:$0xff]   ;;  %v12764_v4 = vld [vmem:[#allocation5 + $0x2464] ss:$16 sps:$4 sm:$0xff]  }
 0x4aa   :  { %8259 = vmatprep.subr.bf16.mxu0 %v12672_v5  ;;  %9038 = vmatprep.subr.bf16.mxu1 %v12675_v6  ;;  %v12767_v5 = vld [vmem:[#allocation5 + $0x246c] ss:$16 sps:$4 sm:$0xff]   ;;  %v12762_v6 = vld [vmem:[#allocation5 + $0x2460] ss:$16 sps:$4 sm:$0xff]  }
 0x4ad   :  { %8260 = vmatpush1.bf16.msra.mxu0 %v12670_v7  ;;  %9039 = vmatpush1.bf16.msra.mxu1 %v12673_v8  ;;  %v12765_v7 = vld [vmem:[#allocation5 + $0x2468] ss:$16 sps:$4 sm:$0xff]   ;;  %v12770_v8 = vld [vmem:[#allocation5 + $0x2484] ss:$16 sps:$4 sm:$0xff]  }
 0x4ae   :  { %8261 = vmatprep.subr.bf16.mxu0 %v12678_v9  ;;  %9040 = vmatprep.subr.bf16.mxu1 %v12681_v10  ;;  %v12773_v9 = vld [vmem:[#allocation5 + $0x248c] ss:$16 sps:$4 sm:$0xff]   ;;  %v12768_v10 = vld [vmem:[#allocation5 + $0x2480] ss:$16 sps:$4 sm:$0xff]  }
 0x4b1   :  { %8262 = vmatpush1.bf16.msra.mxu0 %v12676_v12  ;;  %9041 = vmatpush1.bf16.msra.mxu1 %v12679_v13  ;;  %v12771_v12 = vld [vmem:[#allocation5 + $0x2488] ss:$16 sps:$4 sm:$0xff]   ;;  %v12776_v13 = vld [vmem:[#allocation5 + $0x24a4] ss:$16 sps:$4 sm:$0xff]  }
 0x4b2   :  { %8263 = vmatprep.subr.bf16.mxu0 %v12684_v15  ;;  %9042 = vmatprep.subr.bf16.mxu1 %v12687_v16  ;;  %v12779_v15 = vld [vmem:[#allocation5 + $0x24ac] ss:$16 sps:$4 sm:$0xff]   ;;  %v12774_v16 = vld [vmem:[#allocation5 + $0x24a0] ss:$16 sps:$4 sm:$0xff]  }
 0x4b5   :  { %8264 = vmatpush1.bf16.msra.mxu0 %v12682_v18  ;;  %9043 = vmatpush1.bf16.msra.mxu1 %v12685_v20  ;;  %v12777_v18 = vld [vmem:[#allocation5 + $0x24a8] ss:$16 sps:$4 sm:$0xff]   ;;  %v12782_v20 = vld [vmem:[#allocation5 + $0x24c4] ss:$16 sps:$4 sm:$0xff]  }
 0x4b6   :  { %8265 = vmatprep.subr.bf16.mxu0 %v12690_v11  ;;  %9044 = vmatprep.subr.bf16.mxu1 %v12693_v21  ;;  %v12785_v11 = vld [vmem:[#allocation5 + $0x24cc] ss:$16 sps:$4 sm:$0xff]   ;;  %v12780_v21 = vld [vmem:[#allocation5 + $0x24c0] ss:$16 sps:$4 sm:$0xff]  }
 0x4b9   :  { %8266 = vmatpush1.bf16.msra.mxu0 %v12688_v14  ;;  %9045 = vmatpush1.bf16.msra.mxu1 %v12691_v23  ;;  %v12783_v14 = vld [vmem:[#allocation5 + $0x24c8] ss:$16 sps:$4 sm:$0xff]   ;;  %v12788_v23 = vld [vmem:[#allocation5 + $0x24e4] ss:$16 sps:$4 sm:$0xff]  }
 0x4ba   :  { %8267 = vmatprep.subr.bf16.mxu0 %v12696_v24  ;;  %9046 = vmatprep.subr.bf16.mxu1 %v12699_v17  ;;  %v12791_v24 = vld [vmem:[#allocation5 + $0x24ec] ss:$16 sps:$4 sm:$0xff]   ;;  %v12786_v17 = vld [vmem:[#allocation5 + $0x24e0] ss:$16 sps:$4 sm:$0xff]  }
 0x4bd   :  { %8268 = vmatpush1.bf16.msra.mxu0 %v12694_v26  ;;  %9047 = vmatpush1.bf16.msra.mxu1 %v12697_v27  ;;  %v12789_v26 = vld [vmem:[#allocation5 + $0x24e8] ss:$16 sps:$4 sm:$0xff]   ;;  %v12794_v27 = vld [vmem:[#allocation5 + $0x2504] ss:$16 sps:$4 sm:$0xff]  }
 0x4be   :  { %8269 = vmatprep.subr.bf16.mxu0 %v12702_v19  ;;  %9048 = vmatprep.subr.bf16.mxu1 %v12705_v29  ;;  %v12797_v19 = vld [vmem:[#allocation5 + $0x250c] ss:$16 sps:$4 sm:$0xff]   ;;  %v12792_v29 = vld [vmem:[#allocation5 + $0x2500] ss:$16 sps:$4 sm:$0xff]  }
 0x4c1   :  { %8270 = vmatpush1.bf16.msra.mxu0 %v12700_v30  ;;  %9049 = vmatpush1.bf16.msra.mxu1 %v12703_v22  ;;  %v12795_v30 = vld [vmem:[#allocation5 + $0x2508] ss:$16 sps:$4 sm:$0xff]   ;;  %v12800_v22 = vld [vmem:[#allocation5 + $0x2524] ss:$16 sps:$4 sm:$0xff]  }
 0x4c2   :  { %8271 = vmatprep.subr.bf16.mxu0 %v12708_v32  ;;  %9050 = vmatprep.subr.bf16.mxu1 %v12711_v33  ;;  %v12803_v32 = vld [vmem:[#allocation5 + $0x252c] ss:$16 sps:$4 sm:$0xff]   ;;  %v12798_v33 = vld [vmem:[#allocation5 + $0x2520] ss:$16 sps:$4 sm:$0xff]  }
 0x4c5   :  { %8272 = vmatpush1.bf16.msra.mxu0 %v12706_v25  ;;  %9051 = vmatpush1.bf16.msra.mxu1 %v12709_v35  ;;  %v12801_v25 = vld [vmem:[#allocation5 + $0x2528] ss:$16 sps:$4 sm:$0xff]   ;;  %v12806_v35 = vld [vmem:[#allocation5 + $0x2544] ss:$16 sps:$4 sm:$0xff]  }
 0x4c6   :  { %8273 = vmatprep.subr.bf16.mxu0 %v12714_v36  ;;  %9052 = vmatprep.subr.bf16.mxu1 %v12717_v28  ;;  %v12809_v36 = vld [vmem:[#allocation5 + $0x254c] ss:$16 sps:$4 sm:$0xff]   ;;  %v12804_v28 = vld [vmem:[#allocation5 + $0x2540] ss:$16 sps:$4 sm:$0xff]  }
 0x4c9   :  { %8274 = vmatpush1.bf16.msra.mxu0 %v12712_v38  ;;  %9053 = vmatpush1.bf16.msra.mxu1 %v12715_v39  ;;  %v12807_v38 = vld [vmem:[#allocation5 + $0x2548] ss:$16 sps:$4 sm:$0xff]   ;;  %v12812_v39 = vld [vmem:[#allocation5 + $0x2564] ss:$16 sps:$4 sm:$0xff]  }
 0x4ca   :  { %8275 = vmatprep.subr.bf16.mxu0 %v12720_v40  ;;  %9054 = vmatprep.subr.bf16.mxu1 %v12723_v41  ;;  %v12815_v40 = vld [vmem:[#allocation5 + $0x256c] ss:$16 sps:$4 sm:$0xff]   ;;  %v12810_v41 = vld [vmem:[#allocation5 + $0x2560] ss:$16 sps:$4 sm:$0xff]  }
 0x4cd   :  { %8276 = vmatpush1.bf16.msra.mxu0 %v12718_v42  ;;  %9055 = vmatpush1.bf16.msra.mxu1 %v12721_v43  ;;  %v12813_v42 = vld [vmem:[#allocation5 + $0x2568] ss:$16 sps:$4 sm:$0xff]   ;;  %v12818_v43 = vld [vmem:[#allocation5 + $0x2584] ss:$16 sps:$4 sm:$0xff]  }
 0x4ce   :  { %8277 = vmatprep.subr.bf16.mxu0 %v12726_v44  ;;  %9056 = vmatprep.subr.bf16.mxu1 %v12729_v45  ;;  %v12821_v44 = vld [vmem:[#allocation5 + $0x258c] ss:$16 sps:$4 sm:$0xff]   ;;  %v12816_v45 = vld [vmem:[#allocation5 + $0x2580] ss:$16 sps:$4 sm:$0xff]  }
 0x4d1   :  { %8278 = vmatpush1.bf16.msra.mxu0 %v12724_v46  ;;  %9057 = vmatpush1.bf16.msra.mxu1 %v12727_v47  ;;  %v12819_v46 = vld [vmem:[#allocation5 + $0x2588] ss:$16 sps:$4 sm:$0xff]   ;;  %v12824_v47 = vld [vmem:[#allocation5 + $0x25a4] ss:$16 sps:$4 sm:$0xff]  }
 0x4d2   :  { %8279 = vmatprep.subr.bf16.mxu0 %v12732_v48  ;;  %9058 = vmatprep.subr.bf16.mxu1 %v12735_v49  ;;  %v12827_v48 = vld [vmem:[#allocation5 + $0x25ac] ss:$16 sps:$4 sm:$0xff]   ;;  %v12822_v49 = vld [vmem:[#allocation5 + $0x25a0] ss:$16 sps:$4 sm:$0xff]  }
 0x4d5   :  { %8280 = vmatpush1.bf16.msra.mxu0 %v12730_v50  ;;  %9059 = vmatpush1.bf16.msra.mxu1 %v12733_v51  ;;  %v12825_v50 = vld [vmem:[#allocation5 + $0x25a8] ss:$16 sps:$4 sm:$0xff]   ;;  %v12830_v51 = vld [vmem:[#allocation5 + $0x25c4] ss:$16 sps:$4 sm:$0xff]  }
 0x4d6   :  { %8281 = vmatprep.subr.bf16.mxu0 %v12738_v52  ;;  %9060 = vmatprep.subr.bf16.mxu1 %v12741_v53  ;;  %v12833_v52 = vld [vmem:[#allocation5 + $0x25cc] ss:$16 sps:$4 sm:$0xff]   ;;  %v12828_v53 = vld [vmem:[#allocation5 + $0x25c0] ss:$16 sps:$4 sm:$0xff]  }
 0x4d9   :  { %8282 = vmatpush1.bf16.msra.mxu0 %v12736_v54  ;;  %9061 = vmatpush1.bf16.msra.mxu1 %v12739_v55  ;;  %v12831_v54 = vld [vmem:[#allocation5 + $0x25c8] ss:$16 sps:$4 sm:$0xff]   ;;  %v12836_v55 = vld [vmem:[#allocation5 + $0x25e4] ss:$16 sps:$4 sm:$0xff]  }
 0x4da   :  { %8292 = vmatprep.subr.bf16.mxu0 %v12746_v56  ;;  %9071 = vmatprep.subr.bf16.mxu1 %v12749_v57  ;;  %v12839_v56 = vld [vmem:[#allocation5 + $0x25ec] ss:$16 sps:$4 sm:$0xff]   ;;  %v12834_v57 = vld [vmem:[#allocation5 + $0x25e0] ss:$16 sps:$4 sm:$0xff]  }
 0x4dc   :  { %8284 = vmatmul.mubr.bf16.vlgmr.msra.gmra.mrb[0].mxu0 %v9525_v58  ;;  %9063 = vmatmul.mubr.bf16.vlgmr.msra.gmra.mrb[0].mxu1 %v9525_v58  ;;  %v12837_v58 = vld [vmem:[#allocation5 + $0x25e8] ss:$16 sps:$4 sm:$0xff]  }
 0x4dd   :  { %8293 = vmatpush1.bf16.msra.mxu0 %v12744_v59  ;;  %9072 = vmatpush1.bf16.msra.mxu1 %v12747_v60  ;;  %v12842_v59 = vld [vmem:[#allocation8 + $0x40] sm:$0xff]  }
 0x4de   :  { %8294 = vmatprep.subr.bf16.mxu0 %v12752_v61  ;;  %9073 = vmatprep.subr.bf16.mxu1 %v12755_v34  ;;  %v12843_v60 = vld [vmem:[#allocation8 + $0xc0] sm:$0xff]   ;;  %v9527_v61 = vcombine.low %v13220_v31, %v13220_v31  ;;  %v12852_v31 = vld [vmem:[#allocation8 + $0x10] sm:$0xff]  }
 0x4df   :  { %8324 = vmatprep.mubr.bf16.mxu0 %v9528_v62  ;;  %9103 = vmatprep.mubr.bf16.mxu1 %v9528_v62  ;;  %v12844_v34 = vld [vmem:[#allocation8] sm:$0xff]  }
 0x4e0   :  { %v12845_v62 = vld [vmem:[#allocation8 + $0x80] sm:$0xff]  }
 0x4e1   :  { %8295 = vmatpush1.bf16.msra.mxu0 %v12750_v63  ;;  %9074 = vmatpush1.bf16.msra.mxu1 %v12753_v0  ;;  %v12846_v63 = vld [vmem:[#allocation8 + $0x48] sm:$0xff]  }
 0x4e2   :  { %8296 = vmatprep.subr.bf16.mxu0 %v12758_v37  ;;  %9075 = vmatprep.subr.bf16.mxu1 %v12761_v1  ;;  %v12847_v0 = vld [vmem:[#allocation8 + $0xc8] sm:$0xff]  }
 0x4e3   :  { %v12848_v37 = vld [vmem:[#allocation8 + $0x8] sm:$0xff]  }
 0x4e4   :  { %v12849_v1 = vld [vmem:[#allocation8 + $0x88] sm:$0xff]  }
 0x4e5   :  { %8297 = vmatpush1.bf16.msra.mxu0 %v12756_v2  ;;  %9076 = vmatpush1.bf16.msra.mxu1 %v12759_v3  ;;  %v12850_v2 = vld [vmem:[#allocation8 + $0x50] sm:$0xff]  }
 0x4e6   :  { %8298 = vmatprep.subr.bf16.mxu0 %v12764_v4  ;;  %9077 = vmatprep.subr.bf16.mxu1 %v12767_v5  ;;  %v12851_v3 = vld [vmem:[#allocation8 + $0xd0] sm:$0xff]   ;;  %v12854_v5 = vld [vmem:[#allocation8 + $0x58] sm:$0xff]  }
 0x4e7   :  { %v12853_v4 = vld [vmem:[#allocation8 + $0x90] sm:$0xff]  }
 0x4e9   :  { %8299 = vmatpush1.bf16.msra.mxu0 %v12762_v6  ;;  %9078 = vmatpush1.bf16.msra.mxu1 %v12765_v7  ;;  %v12855_v6 = vld [vmem:[#allocation8 + $0xd8] sm:$0xff]  }
 0x4ea   :  { %8300 = vmatprep.subr.bf16.mxu0 %v12770_v8  ;;  %9079 = vmatprep.subr.bf16.mxu1 %v12773_v9  ;;  %v12856_v7 = vld [vmem:[#allocation8 + $0x18] sm:$0xff]   ;;  %v12858_v9 = vld [vmem:[#allocation8 + $0x60] sm:$0xff]  }
 0x4eb   :  { %v12857_v8 = vld [vmem:[#allocation8 + $0x98] sm:$0xff]  }
 0x4ed   :  { %8301 = vmatpush1.bf16.msra.mxu0 %v12768_v10  ;;  %9080 = vmatpush1.bf16.msra.mxu1 %v12771_v12  ;;  %v12859_v10 = vld [vmem:[#allocation8 + $0xe0] sm:$0xff]  }
 0x4ee   :  { %8302 = vmatprep.subr.bf16.mxu0 %v12776_v13  ;;  %9081 = vmatprep.subr.bf16.mxu1 %v12779_v15  ;;  %v12860_v12 = vld [vmem:[#allocation8 + $0x20] sm:$0xff]   ;;  %v12862_v15 = vld [vmem:[#allocation8 + $0x68] sm:$0xff]  }
 0x4ef   :  { %v12861_v13 = vld [vmem:[#allocation8 + $0xa0] sm:$0xff]  }
 0x4f1   :  { %8303 = vmatpush1.bf16.msra.mxu0 %v12774_v16  ;;  %9082 = vmatpush1.bf16.msra.mxu1 %v12777_v18  ;;  %v12863_v16 = vld [vmem:[#allocation8 + $0xe8] sm:$0xff]  }
 0x4f2   :  { %8304 = vmatprep.subr.bf16.mxu0 %v12782_v20  ;;  %9083 = vmatprep.subr.bf16.mxu1 %v12785_v11  ;;  %v12864_v18 = vld [vmem:[#allocation8 + $0x28] sm:$0xff]   ;;  %v12866_v11 = vld [vmem:[#allocation8 + $0x70] sm:$0xff]  }
 0x4f3   :  { %v12865_v20 = vld [vmem:[#allocation8 + $0xa8] sm:$0xff]  }
 0x4f5   :  { %8305 = vmatpush1.bf16.msra.mxu0 %v12780_v21  ;;  %9084 = vmatpush1.bf16.msra.mxu1 %v12783_v14  ;;  %v12867_v21 = vld [vmem:[#allocation8 + $0xf0] sm:$0xff]  }
 0x4f6   :  { %8306 = vmatprep.subr.bf16.mxu0 %v12788_v23  ;;  %9085 = vmatprep.subr.bf16.mxu1 %v12791_v24  ;;  %v12868_v14 = vld [vmem:[#allocation8 + $0x30] sm:$0xff]   ;;  %v12870_v24 = vld [vmem:[#allocation8 + $0x78] sm:$0xff]  }
 0x4f7   :  { %v12869_v23 = vld [vmem:[#allocation8 + $0xb0] sm:$0xff]  }
 0x4f9   :  { %8307 = vmatpush1.bf16.msra.mxu0 %v12786_v17  ;;  %9086 = vmatpush1.bf16.msra.mxu1 %v12789_v26  ;;  %v12871_v17 = vld [vmem:[#allocation8 + $0xf8] sm:$0xff]  }
 0x4fa   :  { %8308 = vmatprep.subr.bf16.mxu0 %v12794_v27  ;;  %9087 = vmatprep.subr.bf16.mxu1 %v12797_v19  ;;  %v12872_v26 = vld [vmem:[#allocation8 + $0x38] sm:$0xff]   ;;  %v1321_v19 = vlaneseq }
 0x4fb   :  { %v12873_v27 = vld [vmem:[#allocation8 + $0xb8] sm:$0xff]  }
 0x4fd   :  { %8309 = vmatpush1.bf16.msra.mxu0 %v12792_v29  ;;  %9088 = vmatpush1.bf16.msra.mxu1 %v12795_v30  ;;  %v1322_v29 = vshrl.u32 %v1321_v19, 7 }
 0x4fe   :  { %8310 = vmatprep.subr.bf16.mxu0 %v12800_v22  ;;  %9089 = vmatprep.subr.bf16.mxu1 %v12803_v32  ;;  %v1319_v32 = vld [vmem:[#allocation7] sm:$0xf] }
 0x4ff   :  { %v1323_v30 = vsub.s32 0, %v1322_v29  ;;  %v1331_v22 = vsub.s32 2, %v1322_v29 }
 0x501   :  { %8311 = vmatpush1.bf16.msra.mxu0 %v12798_v33  ;;  %9090 = vmatpush1.bf16.msra.mxu1 %v12801_v25  ;;  %v1327_v33 = vsub.s32 1, %v1322_v29  ;;  %v1335_v25 = vsub.s32 3, %v1322_v29 }
 0x502   :  { %8312 = vmatprep.subr.bf16.mxu0 %v12806_v35  ;;  %9091 = vmatprep.subr.bf16.mxu1 %v12809_v36  ;;  %v1324_v35 = vrot.slane %v1319_v32, %v1323_v30  ;;  %v1332_v36 = vrot.slane %v1319_v32, %v1331_v22 }
 0x505   :  { %8313 = vmatpush1.bf16.msra.mxu0 %v12804_v28  ;;  %9092 = vmatpush1.bf16.msra.mxu1 %v12807_v38  ;;  %v1328_v28 = vrot.slane %v1319_v32, %v1327_v33  ;;  %v1336_v38 = vrot.slane %v1319_v32, %v1335_v25 }
 0x506   :  { %8314 = vmatprep.subr.bf16.mxu0 %v12812_v39  ;;  %9093 = vmatprep.subr.bf16.mxu1 %v12815_v40 }
 0x509   :  { %8315 = vmatpush1.bf16.msra.mxu0 %v12810_v41  ;;  %9094 = vmatpush1.bf16.msra.mxu1 %v12813_v42 }
 0x50a   :  { %8316 = vmatprep.subr.bf16.mxu0 %v12818_v43  ;;  %9095 = vmatprep.subr.bf16.mxu1 %v12821_v44 }
 0x50d   :  { %8317 = vmatpush1.bf16.msra.mxu0 %v12816_v45  ;;  %9096 = vmatpush1.bf16.msra.mxu1 %v12819_v46 }
 0x50e   :  { %8318 = vmatprep.subr.bf16.mxu0 %v12824_v47  ;;  %9097 = vmatprep.subr.bf16.mxu1 %v12827_v48 }
 0x511   :  { %8319 = vmatpush1.bf16.msra.mxu0 %v12822_v49  ;;  %9098 = vmatpush1.bf16.msra.mxu1 %v12825_v50 }
 0x512   :  { %8320 = vmatprep.subr.bf16.mxu0 %v12830_v51  ;;  %9099 = vmatprep.subr.bf16.mxu1 %v12833_v52 }
 0x515   :  { %8321 = vmatpush1.bf16.msra.mxu0 %v12828_v53  ;;  %9100 = vmatpush1.bf16.msra.mxu1 %v12831_v54 }
 0x516   :  { %8322 = vmatprep.subr.bf16.mxu0 %v12836_v55  ;;  %9101 = vmatprep.subr.bf16.mxu1 %v12839_v56 }
 0x519   :  { %8323 = vmatpush1.bf16.msra.mxu0 %v12834_v57  ;;  %9102 = vmatpush1.bf16.msra.mxu1 %v12837_v58 }
 0x51a   :  { %10778 = vmatprep.subr.bf16.mxu0 %v12842_v59  ;;  %10800 = vmatprep.subr.bf16.mxu1 %v12843_v60 }
 0x51c   :  { %8325 = vmatmul.mubr.bf16.vlgmr.msra.gmra.mrb[0].mxu0 %v9527_v61  ;;  %9104 = vmatmul.mubr.bf16.vlgmr.msra.gmra.mrb[0].mxu1 %v9527_v61  ;;  %v10745_v61 = vld [vmem:[#allocation10] ss:$0 sm:$0xff] }
 0x51d   :  { %10779 = vmatpush3.bf16.msra.mxu0 %v12844_v34  ;;  %10801 = vmatpush3.bf16.msra.mxu1 %v12845_v62 }
 0x51e   :  { %10780 = vmatprep.subr.bf16.mxu0 %v12846_v63  ;;  %10802 = vmatprep.subr.bf16.mxu1 %v12847_v0 }
 0x521   :  { %10781 = vmatpush3.bf16.msra.mxu0 %v12848_v37  ;;  %10803 = vmatpush3.bf16.msra.mxu1 %v12849_v1 }
 0x522   :  { %10782 = vmatprep.subr.bf16.mxu0 %v12850_v2  ;;  %10804 = vmatprep.subr.bf16.mxu1 %v12851_v3 }
 0x525   :  { %10783 = vmatpush3.bf16.msra.mxu0 %v12852_v31  ;;  %10805 = vmatpush3.bf16.msra.mxu1 %v12853_v4 }
 0x526   :  { %10784 = vmatprep.subr.bf16.mxu0 %v12854_v5  ;;  %10806 = vmatprep.subr.bf16.mxu1 %v12855_v6 }
 0x529   :  { %10785 = vmatpush3.bf16.msra.mxu0 %v12856_v7  ;;  %10807 = vmatpush3.bf16.msra.mxu1 %v12857_v8 }
 0x52a   :  { %10786 = vmatprep.subr.bf16.mxu0 %v12858_v9  ;;  %10808 = vmatprep.subr.bf16.mxu1 %v12859_v10 }
 0x52d   :  { %10787 = vmatpush3.bf16.msra.mxu0 %v12860_v12  ;;  %10809 = vmatpush3.bf16.msra.mxu1 %v12861_v13 }
 0x52e   :  { %10788 = vmatprep.subr.bf16.mxu0 %v12862_v15  ;;  %10810 = vmatprep.subr.bf16.mxu1 %v12863_v16 }
 0x531   :  { %10789 = vmatpush3.bf16.msra.mxu0 %v12864_v18  ;;  %10811 = vmatpush3.bf16.msra.mxu1 %v12865_v20 }
 0x532   :  { %10790 = vmatprep.subr.bf16.mxu0 %v12866_v11  ;;  %10812 = vmatprep.subr.bf16.mxu1 %v12867_v21 }
 0x535   :  { %10791 = vmatpush3.bf16.msra.mxu0 %v12868_v14  ;;  %10813 = vmatpush3.bf16.msra.mxu1 %v12869_v23 }
 0x536   :  { %10792 = vmatprep.subr.bf16.mxu0 %v12870_v24  ;;  %10814 = vmatprep.subr.bf16.mxu1 %v12871_v17 }
 0x539   :  { %10793 = vmatpush3.bf16.msra.mxu0 %v12872_v26  ;;  %10815 = vmatpush3.bf16.msra.mxu1 %v12873_v27 }
 0x5ef   :  { %v8326_v39 = vpop.f32.mrb[0].mxu0  ;;  %v9105_v40 = vpop.f32.mrb[0].mxu1 }
 0x5f0   :  { %v10822_v41 = vadd.f32 %v8326_v39, %v1324_v35  ;;  %v10824_v42 = vadd.f32 %v9105_v40, %v1332_v36  ;;  %v8328_v43 = vpop.f32.mrb[1].mxu0  ;;  %v9107_v44 = vpop.f32.mrb[1].mxu1 }
 0x5f1   :  { %v10823_v45 = vadd.f32 %v8328_v43, %v1328_v28  ;;  %v10825_v46 = vadd.f32 %v9107_v44, %v1336_v38  ;;  %v8330_v47 = vpop.f32.mrb[2].mxu0  ;;  %v9109_v48 = vpop.f32.mrb[2].mxu1 }
 0x5f2   :  { %v9112_v49 = vmax.f32 %v10822_v41, 0.0  ;;  %v9114_v50 = vmax.f32 %v10824_v42, 0.0  ;;  %v8331_v51 = vpop.f32.mrb[3].mxu0  ;;  %v9110_v52 = vpop.f32.mrb[3].mxu1 }
 0x5f3   :  { %v9113_v53 = vmax.f32 %v10823_v45, 0.0  ;;  %v9115_v54 = vmax.f32 %v10825_v46, 0.0 }
 0x5f4   :  { %v9116_v57 = vpack.c.bf16 %v9112_v49, %v9112_v49  ;;  %v9118_v58 = vpack.c.bf16 %v9114_v50, %v9114_v50 }
 0x5f5   :  { %v9117_v55 = vpack.c.bf16 %v9113_v53, %v9113_v53  ;;  %v9119_v56 = vpack.c.bf16 %v9115_v54, %v9115_v54 }
 0x5f7   :  { %9415 = vmatprep.mubr.bf16.mxu0 %v9117_v55  ;;  %9455 = vmatprep.mubr.bf16.mxu1 %v9119_v56 }
 0x5f8   :  { %9416 = vmatmul.mubr.bf16.vlgmr.msra.gmra.mrb[4].mxu0 %v9116_v57  ;;  %9456 = vmatmul.mubr.bf16.vlgmr.msra.gmra.mrb[4].mxu1 %v9118_v58 }
 0x6cb   :  { %v10794_v59 = vpop.f32.mrb[4].mxu0  ;;  %v10816_v60 = vpop.f32.mrb[4].mxu1 }
 0x6cc   :  { %v10795_v34 = vpop.f32.mrb[5].mxu0  ;;  %v10817_v62 = vpop.f32.mrb[5].mxu1 }
 0x6cd   :  { %v10796_v63 = vadd.f32 %v10795_v34, %v10794_v59  ;;  %v10818_v0 = vadd.f32 %v10817_v62, %v10816_v60  ;;  %v10797_v37 = vpop.f32.mrb[6].mxu0  ;;  %v10819_v1 = vpop.f32.mrb[6].mxu1 }
 0x6ce   :  { %v10798_v2 = vpop.f32.mrb[7].mxu0  ;;  %v10820_v3 = vpop.f32.mrb[7].mxu1 }
 0x6cf   :  { %v9418_v31 = vadd.f32 %v10796_v63, %v10745_v61 }
 0x6d1   :  { %v9458_v4 = vadd.f32 %v10818_v0, %v9418_v31 }
 0x6d3   :  { %9463 = vmax.xlane.f32.xlu0 %v9458_v4 }
 0x760   :  { %v9464_v5 = vpop.xlane.xlu0 %9463 }
 0x761   :  { %v9465_v6 = vsub.f32 %v9458_v4, %v9464_v5 }
 0x763   :  { %v9466_v7 = vmul.f32 1.442695, %v9465_v6 }
 0x765   :  { %12874 = vpow2.f32 %v9466_v7 }
 0x76f   :  { %v12875_v8 = vpop.eup %12874 }
 0x770   :  { %9468 = vadd.xlane.f32.xlu0 %v12875_v8 }
 0x7fd   :  { %v9469_v9 = vpop.xlane.xlu0 %9468 }
 0x7fe   :  { %12876 = vlog2.f32 %v9469_v9 }
 0x808   :  { %v12877_v10 = vpop.eup %12876 }
 0x809   :  { %v9471_v12 = vmul.f32 0.6931472, %v12877_v10 }
 0x80b   :  { %v9472_v13 = vsub.f32 %v9465_v6, %v9471_v12 }
 0x80d   :  { %9473 = vst [vmem:[#allocation11] sm:$0xff] %v9472_v13 }
 0x80e   :  { %12999 = shalt.err (!%p12996_p2)
}
 0x80f   :  { %s13000_s6 = scalar_lea.hbm %s13243_s5, 128 }
 0x810   :  { %p13001_p3 = scmp.ne.s32.totalorder %s13243_s5, %s13000_s6  ;;  %p13004_p4 = scmp.lt.u32.totalorder %s13000_s6, %s13243_s5 }
 0x812   :  { %p13006_p5 = pnand %p13004_p4, %p13001_p3 }
 0x814   :  { %13009 = shalt.err (!%p13006_p5)
}
 0x815   :  { %9483 = dma.vmem_to_hbm [thread:$0]  %s9481_s28, 128, %s13243_s5, [#allocation4]  }
 0x816   :  { %13016 = dma.done.wait [#allocation4], 128  }
 0x817   :  { %13017 = vsyncadd [#allocation4], 4294967168 }
 0x818   :  { %9487 = vsyncpa [#allocation3], 1 }
 0x819   :  { %9488 = vsyncpa [#allocation6], 1 }
 0x81a   :  { %9489 = vsyncpa [#allocation9], 1 }
 0x81b   :  { %9490 = vsyncpa [#allocation4], 1 }

</bundles_post_ra>
